<compile_context>
chip_gen: v6e
topology: v6e:2x2x1
jax: 0.10.0
libtpu: 0.0.40
codegen_flags: <defaults>
</compile_context>

<pallas_src>
import functools

import jax
import jax.numpy as jnp
from jax import lax
from jax.experimental import pallas as pl
from jax.experimental.pallas import tpu as pltpu


def _round_up(v, m):
    return (v + m - 1) // m * m


def _dnn2_kernel(x_ref, w_ref, b_ref, o_ref, *, d_in_p, h1_p, h2_p, out_p,
                 out_dim):
    """One batch tile of the fused MLP + log_softmax.

    x_ref : (tile_b, d_in_p)              activations (f32)
    w_ref : (d_in_p+h1_p+h2_p, lane_p)    packed, pre-transposed, zero-padded weights
    b_ref : (3, lane_p)                   packed, zero-padded biases
    o_ref : (tile_b, out_p)               lane-dense log-probabilities (padded cols
                                          sliced off by the wrapper)
    """
    x = x_ref[...]                               # (tb, d_in_p)
    b = b_ref[...]                               # (3, lane_p)
    hp = lax.Precision.HIGHEST

    # ---- fc1 + ReLU -------------------------------------------------------
    w1 = w_ref[0:d_in_p, 0:h1_p]                 # (d_in_p, h1_p)
    h = jnp.dot(x, w1, preferred_element_type=jnp.float32, precision=hp)
    h = jnp.maximum(h + b[0:1, 0:h1_p], 0.0)

    # ---- fc2 + ReLU -------------------------------------------------------
    r2 = d_in_p
    w2 = w_ref[r2:r2 + h1_p, 0:h2_p]             # (h1_p, h2_p)
    h = jnp.dot(h, w2, preferred_element_type=jnp.float32, precision=hp)
    h = jnp.maximum(h + b[1:2, 0:h2_p], 0.0)

    # ---- fc3 (logits, padded to out_p lanes) ------------------------------
    r3 = d_in_p + h1_p
    w3 = w_ref[r3:r3 + h2_p, 0:out_p]            # (h2_p, out_p)
    logits = jnp.dot(h, w3, preferred_element_type=jnp.float32, precision=hp)
    logits = logits + b[2:3, 0:out_p]

    # Mask padded logit columns so they don't participate in log_softmax.
    if out_dim != out_p:
        col = lax.broadcasted_iota(jnp.int32, logits.shape, 1)
        logits = jnp.where(col < out_dim, logits, jnp.float32(-1e30))

    # ---- numerically stable log_softmax over the feature axis -------------
    m = jnp.max(logits, axis=-1, keepdims=True)
    z = logits - m
    lse = jnp.log(jnp.sum(jnp.exp(z), axis=-1, keepdims=True))

    # Lane-dense store of the full padded tile (no masked partial stores).
    o_ref[...] = (z - lse).astype(o_ref.dtype)


def dnn2_forward(x, params, *, batch_tile=None):
    """x: (B, ...) -> flattened to (B, input_dim).  params: 3 (W, b) tuples in
    PyTorch (out_features, in_features) layout.  Returns (B, output_dim)
    log-probabilities."""
    (w1, b1), (w2, b2), (w3, b3) = params

    B = x.shape[0]
    x2 = jnp.asarray(x, jnp.float32).reshape(B, -1)   # torch.flatten(x, 1)
    d_in = x2.shape[1]
    mid_in, mid_out, out_dim = w1.shape[0], w2.shape[0], w3.shape[0]
    assert w1.shape[1] == d_in and w2.shape[1] == mid_in and w3.shape[1] == mid_out

    # Padded (lane/sublane friendly) sizes.
    d_in_p = _round_up(d_in, 8)
    h1_p = _round_up(mid_in, 128)
    h2_p = _round_up(mid_out, 128)
    out_p = _round_up(out_dim, 128)
    lane_p = max(h1_p, h2_p, out_p)

    # ---- pack parameters (one-time, in the wrapper) ------------------------
    def pad_wt(w, rows, cols):
        # torch (out, in) -> pre-transposed (in, out), zero padded.
        wt = jnp.asarray(w, jnp.float32).T
        return jnp.pad(wt, ((0, rows - wt.shape[0]), (0, cols - wt.shape[1])))

    wpack = jnp.concatenate(
        [pad_wt(w1, d_in_p, lane_p),
         pad_wt(w2, h1_p, lane_p),
         pad_wt(w3, h2_p, lane_p)],
        axis=0,
    )  # (d_in_p + h1_p + h2_p, lane_p)

    def pad_b(bv):
        bv = jnp.asarray(bv, jnp.float32)
        return jnp.pad(bv, (0, lane_p - bv.shape[0]))

    bpack = jnp.stack([pad_b(b1), pad_b(b2), pad_b(b3)], axis=0)  # (3, lane_p)

    # ---- batch tiling -------------------------------------------------------
    if batch_tile is None:
        # >= 2 grid steps so the "parallel" axis can split across both
        # TensorCores (v7x); cap at 1024 rows/step (per-step overhead amortized,
        # VMEM cost ~3.2 MB double-buffered — well under every generation).
        batch_tile = min(1024, _round_up((B + 1) // 2, 8))
    batch_tile = max(8, _round_up(int(batch_tile), 8))   # sublane multiple of 8
    Bp = _round_up(B, batch_tile)

    if Bp != B or d_in_p != d_in:
        # Pad only when required (avoids an extra HBM->HBM copy of the input
        # when B divides evenly and d_in is already a multiple of 8).
        xp = jnp.pad(x2, ((0, Bp - B), (0, d_in_p - d_in)))
    else:
        xp = x2

    grid = (Bp // batch_tile,)
    kernel = functools.partial(
        _dnn2_kernel,
        d_in_p=d_in_p, h1_p=h1_p, h2_p=h2_p, out_p=out_p, out_dim=out_dim,
    )

    flops = 2 * Bp * (d_in_p * h1_p + h1_p * h2_p + h2_p * out_p)
    bytes_accessed = 4 * (Bp * d_in_p + int(wpack.size) + int(bpack.size)
                          + Bp * out_p)

    out = pl.pallas_call(
        kernel,
        out_shape=jax.ShapeDtypeStruct((Bp, out_p), jnp.float32),
        grid_spec=pl.GridSpec(
            grid=grid,
            in_specs=[
                pl.BlockSpec((batch_tile, d_in_p), lambda i: (i, 0)),
                # Invariant blocks: single-buffered (constant index_map).
                pl.BlockSpec(wpack.shape, lambda i: (0, 0),
                             pipeline_mode=pl.Buffered(1)),
                pl.BlockSpec(bpack.shape, lambda i: (0, 0),
                             pipeline_mode=pl.Buffered(1)),
            ],
            out_specs=pl.BlockSpec((batch_tile, out_p), lambda i: (i, 0)),
        ),
        compiler_params=pltpu.CompilerParams(
            dimension_semantics=("parallel",),
        ),
        cost_estimate=pl.CostEstimate(
            flops=flops,
            transcendentals=Bp * (out_p + 1),
            bytes_accessed=bytes_accessed,
        ),
    )(xp, wpack, bpack)

    # Slice off batch padding and the padded (lane-dense) logit columns.
    return out[:B, :out_dim]


def init_params(key, input_dim=784, mid_dim_in=100, mid_dim_out=100,
                output_dim=10):
    """nn.Linear-style init, PyTorch (out_features, in_features) layout."""
    dims = [(input_dim, mid_dim_in), (mid_dim_in, mid_dim_out),
            (mid_dim_out, output_dim)]
    params = []
    for (d_in, d_out) in dims:
        key, kw, kb = jax.random.split(key, 3)
        bound = 1.0 / jnp.sqrt(d_in)
        w = jax.random.uniform(kw, (d_out, d_in), jnp.float32, -bound, bound)
        b = jax.random.uniform(kb, (d_out,), jnp.float32, -bound, bound)
        params.append((w, b))
    return params


def reference_forward(x, params):
    """Pure-JAX reference mirroring the PyTorch DNN2.forward."""
    (w1, b1), (w2, b2), (w3, b3) = params
    h = jnp.asarray(x, jnp.float32).reshape(x.shape[0], -1)
    hp = lax.Precision.HIGHEST
    h = jnp.maximum(jnp.dot(h, w1.T, precision=hp) + b1, 0.0)
    h = jnp.maximum(jnp.dot(h, w2.T, precision=hp) + b2, 0.0)
    logits = jnp.dot(h, w3.T, precision=hp) + b3
    return jax.nn.log_softmax(logits, axis=1)


if __name__ == "__main__":
    key = jax.random.PRNGKey(0)
    k_x, k_p = jax.random.split(key)

    batch = 64
    input_dim, mid_dim_in, mid_dim_out, output_dim = 784, 100, 100, 10

    # (B, 1, 28, 28) image-like input; the wrapper flattens like torch.flatten(x, 1).
    x = jax.random.normal(k_x, (batch, 1, 28, 28), jnp.float32)
    params = init_params(k_p, input_dim, mid_dim_in, mid_dim_out, output_dim)

    out = dnn2_forward(x, params)          # default tiling -> 2 grid steps
    out = jax.block_until_ready(out)

    ref = reference_forward(x, params)
    assert out.shape == (batch, output_dim)
    assert jnp.allclose(out, ref, atol=1e-4, rtol=1e-4)
    # log_softmax sanity: probabilities per row sum to 1.
    assert jnp.allclose(jnp.sum(jnp.exp(out), axis=1), 1.0, atol=1e-4)

    print("KERNEL_OK")
</pallas_src>

<mosaic_0001>
module attributes {stable_mosaic.version = 11 : i64} {
  func.func @_dnn2_kernel(%arg0: i32, %arg1: memref<32x784xf32, #tpu.memory_space<vmem>>, %arg2: memref<1040x128xf32, #tpu.memory_space<vmem>>, %arg3: memref<3x128xf32, #tpu.memory_space<vmem>>, %arg4: memref<32x128xf32, #tpu.memory_space<vmem>>) attributes {dimension_semantics = [#tpu.dimension_semantics<parallel>], iteration_bounds = array<i64: 2>, scalar_prefetch = 0 : i64, scratch_operands = 0 : i64, tpu.core_type = #tpu.core_type<tc>, window_params = [{transform_indices = @transform_0, window_bounds = array<i64: 32, 784>}, {pipeline_mode = #tpu.pipeline_mode<synchronous>, transform_indices = @transform_1, window_bounds = array<i64: 1040, 128>}, {pipeline_mode = #tpu.pipeline_mode<synchronous>, transform_indices = @transform_2, window_bounds = array<i64: 3, 128>}, {transform_indices = @transform_3, window_bounds = array<i64: 32, 128>}]} {
    %c0 = arith.constant 0 : index
    %c0_0 = arith.constant 0 : index
    %0 = vector.load %arg1[%c0, %c0_0] : memref<32x784xf32, #tpu.memory_space<vmem>>, vector<32x784xf32>
    %c0_1 = arith.constant 0 : index
    %c0_2 = arith.constant 0 : index
    %1 = vector.load %arg3[%c0_1, %c0_2] : memref<3x128xf32, #tpu.memory_space<vmem>>, vector<3x128xf32>
    %c0_3 = arith.constant 0 : index
    %c0_4 = arith.constant 0 : index
    %2 = vector.load %arg2[%c0_3, %c0_4] : memref<1040x128xf32, #tpu.memory_space<vmem>>, vector<784x128xf32>
    %cst = arith.constant dense<0.000000e+00> : vector<32x128xf32>
    %3 = tpu.matmul %0, %2, %cst {dimension_numbers = #tpu.dot_dimension_numbers<[1], [0], [0], [1], [0, 0, 1, 1], [], []>, precision = #tpu.contract_precision<fp32>} : vector<32x784xf32>, vector<784x128xf32>, vector<32x128xf32> -> vector<32x128xf32>
    %4 = vector.extract_strided_slice %1 {offsets = [0, 0], sizes = [1, 128], strides = [1, 1]} : vector<3x128xf32> to vector<1x128xf32>
    %5 = vector.broadcast %4 : vector<1x128xf32> to vector<32x128xf32>
    %6 = arith.addf %3, %5 : vector<32x128xf32>
    %cst_5 = arith.constant 0.000000e+00 : f32
    %7 = vector.broadcast %cst_5 : f32 to vector<32x128xf32>
    %8 = arith.maximumf %6, %7 : vector<32x128xf32>
    %c784 = arith.constant 784 : index
    %c0_6 = arith.constant 0 : index
    %9 = vector.load %arg2[%c784, %c0_6] : memref<1040x128xf32, #tpu.memory_space<vmem>>, vector<128x128xf32>
    %cst_7 = arith.constant dense<0.000000e+00> : vector<32x128xf32>
    %10 = tpu.matmul %8, %9, %cst_7 {dimension_numbers = #tpu.dot_dimension_numbers<[1], [0], [0], [1], [0, 0, 1, 1], [], []>, precision = #tpu.contract_precision<fp32>} : vector<32x128xf32>, vector<128x128xf32>, vector<32x128xf32> -> vector<32x128xf32>
    %11 = vector.extract_strided_slice %1 {offsets = [1, 0], sizes = [1, 128], strides = [1, 1]} : vector<3x128xf32> to vector<1x128xf32>
    %12 = vector.broadcast %11 : vector<1x128xf32> to vector<32x128xf32>
    %13 = arith.addf %10, %12 : vector<32x128xf32>
    %cst_8 = arith.constant 0.000000e+00 : f32
    %14 = vector.broadcast %cst_8 : f32 to vector<32x128xf32>
    %15 = arith.maximumf %13, %14 : vector<32x128xf32>
    %c912 = arith.constant 912 : index
    %c0_9 = arith.constant 0 : index
    %16 = vector.load %arg2[%c912, %c0_9] : memref<1040x128xf32, #tpu.memory_space<vmem>>, vector<128x128xf32>
    %cst_10 = arith.constant dense<0.000000e+00> : vector<32x128xf32>
    %17 = tpu.matmul %15, %16, %cst_10 {dimension_numbers = #tpu.dot_dimension_numbers<[1], [0], [0], [1], [0, 0, 1, 1], [], []>, precision = #tpu.contract_precision<fp32>} : vector<32x128xf32>, vector<128x128xf32>, vector<32x128xf32> -> vector<32x128xf32>
    %18 = vector.extract_strided_slice %1 {offsets = [2, 0], sizes = [1, 128], strides = [1, 1]} : vector<3x128xf32> to vector<1x128xf32>
    %19 = vector.broadcast %18 : vector<1x128xf32> to vector<32x128xf32>
    %20 = arith.addf %17, %19 : vector<32x128xf32>
    %21 = tpu.iota {dimensions = array<i32: 1>} : vector<32x128xi32>
    %c10_i32 = arith.constant 10 : i32
    %22 = vector.broadcast %c10_i32 : i32 to vector<32x128xi32>
    %23 = arith.cmpi slt, %21, %22 : vector<32x128xi32>
    %cst_11 = arith.constant -1.000000e+30 : f32
    %24 = vector.broadcast %cst_11 : f32 to vector<32x128xf32>
    %25 = arith.select %23, %20, %24 : vector<32x128xi1>, vector<32x128xf32>
    %cst_12 = arith.constant dense<0xFF800000> : vector<32xf32>
    %26 = vector.multi_reduction <maximumf>, %25, %cst_12 [1] : vector<32x128xf32> to vector<32xf32>
    %27 = vector.shape_cast %26 : vector<32xf32> to vector<32x1xf32>
    %28 = vector.broadcast %27 : vector<32x1xf32> to vector<32x128xf32>
    %29 = arith.subf %25, %28 : vector<32x128xf32>
    %30 = math.exp %29 : vector<32x128xf32>
    %cst_13 = arith.constant dense<0.000000e+00> : vector<32xf32>
    %31 = vector.multi_reduction <add>, %30, %cst_13 [1] : vector<32x128xf32> to vector<32xf32>
    %32 = vector.shape_cast %31 : vector<32xf32> to vector<32x1xf32>
    %33 = math.log %32 : vector<32x1xf32>
    %34 = vector.broadcast %33 : vector<32x1xf32> to vector<32x128xf32>
    %35 = arith.subf %29, %34 : vector<32x128xf32>
    %c0_14 = arith.constant 0 : index
    %c0_15 = arith.constant 0 : index
    %36 = vector.load %arg4[%c0_14, %c0_15] : memref<32x128xf32, #tpu.memory_space<vmem>>, vector<32x128xf32>
    tpu.vector_store %arg4[%c0_14, %c0_15], %35 {strides = array<i32>} : memref<32x128xf32, #tpu.memory_space<vmem>>, vector<32x128xf32>,
    return
  }
  func.func @transform_0(%arg0: i32) -> (i32, i32) {
    %c0_i32 = arith.constant 0 : i32
    %c0_i32_0 = arith.constant 0 : i32
    return %arg0, %c0_i32 : i32, i32
  }
  func.func @transform_1(%arg0: i32) -> (i32, i32) {
    %c0_i32 = arith.constant 0 : i32
    %c0_i32_0 = arith.constant 0 : i32
    %c0_i32_1 = arith.constant 0 : i32
    return %c0_i32, %c0_i32_0 : i32, i32
  }
  func.func @transform_2(%arg0: i32) -> (i32, i32) {
    %c0_i32 = arith.constant 0 : i32
    %c0_i32_0 = arith.constant 0 : i32
    %c0_i32_1 = arith.constant 0 : i32
    return %c0_i32, %c0_i32_0 : i32, i32
  }
  func.func @transform_3(%arg0: i32) -> (i32, i32) {
    %c0_i32 = arith.constant 0 : i32
    %c0_i32_0 = arith.constant 0 : i32
    return %arg0, %c0_i32 : i32, i32
  }
}

</mosaic_0001>

<bundles_post_ra>
// kernel: tpu_custom_call.1
= control target key start
LH: loop header
LB: loop body
LE: loop exit
PB: predicated region body
PF: predicated region fallthrough
CT: control target
= control target key end

     0   :  { %8 = vsyncpa [#allocation3], 0  ;;  %s10987_s0 = inlined_call_operand.hbm [shape: f32[64,784], index: 0, kind: input, shape index: {}]   ;;  %s10988_s1 = inlined_call_operand.hbm [shape: f32[1040,128], index: 1, kind: input, shape index: {}]   ;;  %s10989_s2 = inlined_call_operand.hbm [shape: f32[3,128], index: 2, kind: input, shape index: {}]   ;;  %s10990_s3 = inlined_call_operand.hbm [shape: f32[64,128], index: 3, kind: output, shape index: {}]  }
   0x1   :  { %10 = vsyncpa [#allocation3 + $0x1], 0 }
   0x2   :  { %11 = vsyncpa [#allocation6], 0 }
   0x3   :  { %12 = vsyncpa [#allocation4], 0 }
   0x4   :  { %14 = vsyncpa [#allocation4 + $0x1], 0  ;;  %s7661_s12 = smov 0   ;;  %s7663_s13 = smov 0  }
   0x5   :  { %s7665_s14 = smov 0   ;;  %s7667_s15 = smov 0  }
   0x6 LB: > { %s7682_s16 = sadd.s32 4294967295, %s7629_s15   ;;  %s5786_s17 = sadd.s32 4294967294, %s7629_s15   ;;  %s7629_s15 = sphi %s7667_s15, %s12141_s15   ;;  %s7625_s14 = sphi %s7665_s14, %s12140_s14   ;;  %s7621_s13 = sphi %s7663_s13, %s12139_s13   ;;  %s7617_s12 = sphi %s7661_s12, %s12138_s12  }
   0x7   : > { %p40_p0 = scmp.ne.s32.totalorder %s7621_s13, %s7617_s12  ;;  %p10991_p1 = scmp.eq.s32.totalorder %s7682_s16, 0 }
   0x8   : > { %p112_p3 = scmp.eq.s32.totalorder %s5786_s17, 1  ;;  %p5787_p5 = scmp.ge.s32.totalorder %s7629_s15, 1 }
   0x9   : > { %p7691_p4 = por %p10991_p1, %p40_p0  ;;  %p119_p7 = scmp.lt.s32.totalorder %s7629_s15, 3 }
   0xa   : > { %p7696_p6 = por %p112_p3, %p40_p0  ;;  %s7631_s21 = smov [#allocation5]  }
   0xb   : > { %s11447_s18 = scalar_select %p7691_p4, 1, 0 }
   0xc   : > { %s11448_s19 = scalar_select %p7696_p6, 1, 0 }
   0xd   : > { %p7701_p8 = pnand %p5787_p5, %p119_p7  ;;  %s131_s22 = sshll.u32 %s7631_s21, 4  ;;  %s132_s22 = int_to_ptr.vmem [resolvable:$true] %s131_s22 }
   0xe   : > { %s7632_s24 = smov [#allocation7]   ;;  %s7492_s26 = scalar_lea.vmem %s132_s22, 16640 }
   0xf   : > { %s11449_s20 = scalar_select %p7701_p8, 1, 0 }
  0x10   : > { %p7403_p9 = pneg %p7701_p8  ;;  %s145_s25 = sshll.u32 %s7632_s24, 4  ;;  %s146_s25 = int_to_ptr.vmem [resolvable:$true] %s145_s25 }
  0x11   : > { %p7493_p13 = scmp.ne.s32.totalorder %s132_s22, %s7492_s26  ;;  %p7500_p5 = scmp.lt.s32.totalorder %s132_s22, %s132_s22 }
  0x12   : > { %p7710_p11 = pnand %p7403_p9, %p10991_p1  ;;  %p7501_p7 = scmp.lt.s32.totalorder %s7492_s26, %s7492_s26 }
  0x14   : > { %p7483_p12 = pneg %p7710_p11  ;;  %p7502_p10 = por %p7501_p7, %p7500_p5 }
  0x16   : > { %p7495_p0 = pnand %p7493_p13, %p7483_p12 }
  0x18   : > { %p7496_p3 = pneg %p7495_p0 }
  0x1a   : > { %p7503_p9 = pnand %p7502_p10, %p7496_p3 }
  0x1c   : > { %7506 = shalt.err (!%p7503_p9)
}
  0x1d   : > { %s7633_s27 = smov 128   ;;  %s7634_s28 = smov 8  }
  0x1e   : > { %7406 = dma.hbm_to_vmem [thread:$0]  (!%p7710_p11), %s10988_s1, 16640, %s132_s22, [#allocation6], %s7633_s27, %s7633_s27, %s7634_s28  }
  0x1f   : > { %s7518_s4 = scalar_lea.vmem %s146_s25, 64  ;;  %p7526_p2 = scmp.lt.s32.totalorder %s146_s25, %s146_s25 }
  0x20   : > { %p7519_p1 = scmp.ne.s32.totalorder %s146_s25, %s7518_s4  ;;  %p7527_p6 = scmp.lt.s32.totalorder %s7518_s4, %s7518_s4 }
  0x22   : > { %p7521_p13 = pnand %p7519_p1, %p7483_p12  ;;  %p7528_p5 = por %p7527_p6, %p7526_p2 }
  0x24   : > { %p7522_p0 = pneg %p7521_p13 }
  0x26   : > { %p7529_p10 = pnand %p7528_p5, %p7522_p0 }
  0x28   : > { %7532 = shalt.err (!%p7529_p10)
}
  0x29   : > { %7409 = dma.hbm_to_vmem [thread:$0]  (!%p7710_p11), %s10989_s2, 64, %s146_s25, [#allocation6]  }
  0x2a   : > { %s7733_s7 = sadd.s32 1, %s7629_s15   ;;  %s27_s8 = sadd.s32 1, %s7625_s14 }
  0x2b   : > { %s24_s9 = ssub.s32 %s7629_s15, %s7733_s7  ;;  %p34_p1 = scmp.ne.s32.totalorder %s7625_s14, %s7621_s13 }
  0x2c   : > { %p25_p2 = scmp.eq.s32.totalorder %s24_s9, 0  ;;  %p35_p6 = scmp.eq.s32.totalorder %s7629_s15, 0 }
  0x2d   : > { %p11451_p12 = scmp.eq.s32.totalorder %s7682_s16, 1  ;;  %p7420_p7 = scmp.lt.s32.totalorder %s7629_s15, 2 }
  0x2e   : > { %s7749_s11 = scalar_select %p25_p2, %s7625_s14, %s27_s8  }
  0x2f   : > { %p7743_p3 = por %p11451_p12, %p34_p1  ;;  %p36_p9 = por %p35_p6, %p34_p1 }
  0x30   : > { %s156_s17 = sand.u32 1, %s7625_s14   ;;  %s7389_s22 = smul.u32 3584, %s7629_s15 }
  0x31   : > { %s11452_s10 = scalar_select %p7743_p3, 1, 0 }
  0x32   : > { %s7388_s21 = smul.u32 224, %s156_s17  ;;  %p7753_p11 = pnand %p7420_p7, %p36_p9 }
  0x33   : > { %s7760_s26 = scalar_lea.hbm %s10987_s0, %s7389_s22  ;;  %s7764_s29 = scalar_lea.sflag [#allocation3], %s156_s17 }
  0x34   : > { %s160_s27 = scalar_lea.vmem [#allocation2], %s7388_s21  ;;  %s7533_s30 = scalar_lea.hbm %s7760_s26, 3584 }
  0x35   : > { %s168_s28 = sshll.u32 %s160_s27, 4  ;;  %p7534_p13 = scmp.ne.s32.totalorder %s7760_s26, %s7533_s30  ;;  %s7762_s28 = int_to_ptr.vmem [resolvable:$true] %s168_s28 }
  0x36   : > { %p7535_p0 = pneg %p7753_p11  ;;  %s7538_s6 = scalar_lea.hbm %s10987_s0, 7168 }
  0x37   : > { %p7539_p1 = scmp.lt.s32.totalorder %s7760_s26, %s10987_s0  ;;  %p7540_p2 = scmp.lt.s32.totalorder %s7538_s6, %s7533_s30 }
  0x38   : > { %p7536_p5 = pnand %p7535_p0, %p7534_p13 }
  0x39   : > { %p7541_p6 = por %p7540_p2, %p7539_p1 }
  0x3a   : > { %p7537_p10 = pneg %p7536_p5 }
  0x3c   : > { %p7542_p12 = pnand %p7541_p6, %p7537_p10 }
  0x3e   : > { %7545 = shalt.err (!%p7542_p12)
}
  0x3f   : > { %s7546_s17 = scalar_lea.vmem %s7762_s28, 3584  ;;  %s7635_s21 = smov [#allocation2]  }
  0x40   : > { %p7547_p7 = scmp.ne.s32.totalorder %s7762_s28, %s7546_s17  ;;  %s7551_s22 = sshll.u32 %s7635_s21, 4  ;;  %s7552_s22 = int_to_ptr.vmem [resolvable:$false] %s7551_s22 }
  0x41   : > { %s7553_s24 = scalar_lea.vmem %s7552_s22, 7168  ;;  %p7554_p5 = scmp.lt.s32.totalorder %s7762_s28, %s7552_s22 }
  0x42   : > { %p7549_p9 = pnand %p7547_p7, %p7535_p0  ;;  %p7555_p3 = scmp.lt.s32.totalorder %s7553_s24, %s7546_s17 }
  0x44   : > { %p7550_p13 = pneg %p7549_p9  ;;  %p7556_p4 = por %p7555_p3, %p7554_p5 }
  0x46   : > { %p7557_p8 = pnand %p7556_p4, %p7550_p13 }
  0x48   : > { %7560 = shalt.err (!%p7557_p8)
}
  0x49   : > { %s7636_s25 = smov 896   ;;  %s7637_s27 = smov 56  }
  0x4a   : > { %7413 = dma.hbm_to_vmem [thread:$0]  (!%p7753_p11), %s7760_s26, 3584, %s7762_s28, %s7764_s29, %s7636_s25, %s7636_s25, %s7637_s27  }
  0x4b   : > { %p11454_p0 = scmp.ne.s32.totalorder %s11449_s20, 0 }
  0x4d   : > { %180 = sbr.rel (%p11454_p0) target bundleno = 1589 (0x635), region = 32 }
  0x52   : > { %s7788_s30 = sand.u32 1, %s7621_s13   ;;  %p11455_p4 = scmp.ne.s32.totalorder %s11447_s18, 0 }
  0x53   : > { %s7390_s4 = smul.u32 224, %s7788_s30  ;;  %s183_s5 = scalar_lea.sflag [#allocation3], %s7788_s30 }
  0x55   : > { %s7792_s6 = scalar_lea.vmem [#allocation2], %s7390_s4 }
  0x56   : > { %7604 = dma.done.wait (%p11455_p4), %s183_s5, 3584  }
  0x57   : > { %7606 = vsyncadd (%p11455_p4), %s183_s5, 4294963712  ;;  %p11456_p8 = scmp.eq.s32.totalorder %s7682_s16, 0 }
  0x59   : > { %7608 = dma.done.wait (%p11456_p8), [#allocation6], 16704   ;;  %p11457_p3 = pmov %p11456_p8 }
  0x5a   : > { %v279_v0 = vld [vmem:[#allocation5 + $0xf8] sm:$0xff]  ;;  %v278_v2 = vld [vmem:[#allocation5 + $0xf0] sm:$0xff]  ;;  %v277_v7 = vld [vmem:[#allocation5 + $0xe8] sm:$0xff]  ;;  %vm350_vm0 = vcmask 130048   ;;  %s5797_s18 = sshll.u32 %s7788_s30, 5  ;;  %s5803_s26 = sshll.u32 %s7682_s16, 9 }
  0x5b   : > { %7610 = vsyncadd (%p11457_p3), [#allocation6], 4294950592  ;;  %v263_v1 = vld [vmem:[#allocation5 + $0x78] sm:$0xff]  ;;  %v7802_v3 = vand.u32 4294901760, %v279_v0  ;;  %v7806_v5 = vand.u32 4294901760, %v278_v2  ;;  %v262_v6 = vld [vmem:[#allocation5 + $0x70] sm:$0xff]  ;;  %s10944_s8 = scalar_lea.hbm %s10990_s3, %s5803_s26 }
  0x5c   : > { %v7804_v4 = vand.u32 4294901760, %v263_v1  ;;  %v261_v8 = vld [vmem:[#allocation5 + $0x68] sm:$0xff]  ;;  %v7808_v9 = vand.u32 4294901760, %v262_v6  ;;  %v7810_v10 = vand.u32 4294901760, %v277_v7  ;;  %v276_v12 = vld [vmem:[#allocation5 + $0xe0] sm:$0xff]  ;;  %v275_v14 = vld [vmem:[#allocation5 + $0xd8] sm:$0xff] }
  0x5d   : > { %v7812_v11 = vand.u32 4294901760, %v261_v8  ;;  %v260_v13 = vld [vmem:[#allocation5 + $0x60] sm:$0xff]  ;;  %5804 = vmatprep.subr.mxu0 %v7802_v3  ;;  %v7815_v15 = vand.u32 4294901760, %v276_v12  ;;  %v7819_v17 = vand.u32 4294901760, %v275_v14  ;;  %v7822_v18 = vsub.f32 %v279_v0, %v7802_v3  ;;  %v7824_v19 = vld [vmem:[#allocation5 + $0x58] sm:$0xff]  ;;  %v7826_v20 = vld [vmem:[#allocation5 + $0xd0] sm:$0xff] }
  0x5e   : > { %v7817_v16 = vand.u32 4294901760, %v260_v13  ;;  %v7828_v21 = vld [vmem:[#allocation5 + $0x50] sm:$0xff]  ;;  %5805 = vmatpush3.msra.mxu0 %v7804_v4  ;;  %v7832_v22 = vand.u32 4294901760, %v7824_v19  ;;  %v7835_v23 = vsub.f32 %v263_v1, %v7804_v4  ;;  %v7838_v24 = vand.u32 4294901760, %v7826_v20  ;;  %v7843_v26 = vld [vmem:[#allocation5 + $0xc8] sm:$0xff]  ;;  %v7847_v28 = vld [vmem:[#allocation5 + $0xc0] sm:$0xff] }
  0x5f   : > { %11458 = vst [vmem:[#allocation12_spill] sm:$0xff] %v7812_v11  ;;  %11460 = vst [vmem:[#allocation14_spill] sm:$0xff] %v7822_v18  ;;  %v7841_v25 = vsub.f32 %v278_v2, %v7806_v5  ;;  %v7845_v27 = vld [vmem:[#allocation5 + $0x48] sm:$0xff]  ;;  %5806 = vmatprep.subr.mxu0 %v7806_v5  ;;  %v11008_v29 = vand.u32 4294901760, %v7822_v18  ;;  %v7852_v30 = vand.u32 4294901760, %v7828_v21  ;;  %v7855_v31 = vsub.f32 %v262_v6, %v7808_v9  ;;  %v7869_v37 = vld [vmem:[#allocation5 + $0x40] sm:$0xff] }
  0x60   : > { %11459 = vst [vmem:[#allocation13_spill] sm:$0xff] %v7817_v16  ;;  %11461 = vst [vmem:[#allocation15_spill] sm:$0xff] %v7832_v22  ;;  %v7858_v32 = vand.u32 4294901760, %v7843_v26  ;;  %5807 = vmatpush3.msra.mxu0 %v7808_v9  ;;  %v11006_v33 = vand.u32 4294901760, %v7835_v23  ;;  %v7864_v35 = vsub.f32 %v277_v7, %v7810_v10  ;;  %v7867_v36 = vand.u32 4294901760, %v7845_v27  ;;  %v7893_v46 = vld [vmem:[#allocation5 + $0xb8] sm:$0xff] }
  0x61   : > { %11462 = vst [vmem:[#allocation16_spill] sm:$0xff] %v7838_v24  ;;  %11463 = vst [vmem:[#allocation17_spill] sm:$0xff] %v7852_v30  ;;  %v11005_v34 = vand.u32 4294901760, %v7841_v25  ;;  %5808 = vmatprep.subr.mxu0 %v7810_v10  ;;  %v636_v38 = vsub.f32 %v7822_v18, %v11008_v29  ;;  %v11003_v39 = vand.u32 4294901760, %v7855_v31  ;;  %v7877_v40 = vsub.f32 %v261_v8, %v7812_v11  ;;  %v7903_v51 = vld [vmem:[#allocation5 + $0x38] sm:$0xff]  ;;  %v7910_v56 = vld [vmem:[#allocation5 + $0xb0] sm:$0xff] }
  0x62   : > { %11464 = vst [vmem:[#allocation18_spill] sm:$0xff] %v7858_v32  ;;  %11465 = vst [vmem:[#allocation19_spill] sm:$0xff] %v7867_v36  ;;  %v7880_v41 = vand.u32 4294901760, %v7847_v28  ;;  %5809 = vmatpush3.msra.mxu0 %v7812_v11  ;;  %v524_v42 = vsub.f32 %v7835_v23, %v11006_v33  ;;  %v11001_v44 = vand.u32 4294901760, %v7864_v35  ;;  %v7891_v45 = vsub.f32 %v276_v12, %v7815_v15  ;;  %v7922_v61 = vld [vmem:[#allocation5 + $0x30] sm:$0xff]  ;;  %v7934_v2 = vld [vmem:[#allocation5 + $0xa8] sm:$0xff] }
  0x63   : > { %v643_v43 = vsub.f32 %v7841_v25, %v11005_v34  ;;  %5810 = vmatprep.subr.mxu0 %v7815_v15  ;;  %v637_v47 = vand.u32 4294901760, %v636_v38  ;;  %v531_v48 = vsub.f32 %v7855_v31, %v11003_v39  ;;  %v11000_v49 = vand.u32 4294901760, %v7877_v40  ;;  %v8025_v39 = vld [vmem:[#allocation5 + $0x90] sm:$0xff]  ;;  %s216_s20 = scalar_lea.vmem [#allocation8], %s5797_s18  ;;  %s5681_s9 = scalar_lea.sflag [#allocation4], %s7788_s30 }
  0x64   : > { %11466 = vst [vmem:[#allocation20_spill] sm:$0xff] %v7880_v41  ;;  %v7901_v50 = vand.u32 4294901760, %v7869_v37  ;;  %5811 = vmatpush3.msra.mxu0 %v7817_v16  ;;  %v525_v52 = vand.u32 4294901760, %v524_v42  ;;  %v650_v54 = vsub.f32 %v7864_v35, %v11001_v44  ;;  %v10998_v55 = vand.u32 4294901760, %v7891_v45  ;;  %v8035_v34 = vld [vmem:[#allocation5 + $0x10] sm:$0xff]  ;;  %s5694_s23 = sshll.u32 %s216_s20, 4  ;;  %s10939_s23 = int_to_ptr.vmem [resolvable:$true] %s5694_s23 }
  0x65   : > { %v644_v53 = vand.u32 4294901760, %v643_v43  ;;  %5812 = vmatprep.subr.mxu0 %v7819_v17  ;;  %5848 = vmatprep.subr.mxu1 %v637_v47  ;;  %v532_v57 = vand.u32 4294901760, %v531_v48  ;;  %v538_v58 = vsub.f32 %v7877_v40, %v11000_v49  ;;  %v7917_v59 = vsub.f32 %v260_v13, %v7817_v16  ;;  %v7945_v13 = vld [vmem:[#allocation5 + $0x28] sm:$0xff]  ;;  %v8012_v49 = vld [vmem:[#allocation5 + $0x18] sm:$0xff]  ;;  %s7561_s17 = scalar_lea.vmem %s10939_s23, 512  ;;  %p12135_p10 = scmp.ne.s32.totalorder %s11452_s10, 0 }
  0x66   : > { %11467 = vst [vmem:[#allocation21_spill] sm:$0xff] %v7901_v50  ;;  %v7920_v60 = vand.u32 4294901760, %v7893_v46  ;;  %5813 = vmatpush3.msra.mxu0 %v7832_v22  ;;  %5849 = vmatpush3.msra.mxu1 %v525_v52  ;;  %v651_v62 = vand.u32 4294901760, %v650_v54  ;;  %v657_v63 = vsub.f32 %v7891_v45, %v10998_v55  ;;  %v7929_v0 = vsub.f32 %v275_v14, %v7819_v17  ;;  %p7562_p11 = scmp.ne.s32.totalorder %s10939_s23, %s7561_s17  ;;  %s7638_s16 = smov [#allocation8]  }
  0x67   : > { %v7932_v1 = vand.u32 4294901760, %v7903_v51  ;;  %5814 = vmatprep.subr.mxu0 %v7838_v24  ;;  %5850 = vmatprep.subr.mxu1 %v644_v53  ;;  %v539_v6 = vand.u32 4294901760, %v538_v58  ;;  %v10996_v7 = vand.u32 4294901760, %v7917_v59  ;;  %v7940_v8 = vsub.f32 %v7824_v19, %v7832_v22  ;;  %s7565_s21 = sshll.u32 %s7638_s16, 4  ;;  %s7566_s21 = int_to_ptr.vmem [resolvable:$false] %s7565_s21 }
  0x68   : > { %11468 = vst [vmem:[#allocation22_spill] sm:$0xff] %v7920_v60  ;;  %v7943_v12 = vand.u32 4294901760, %v7910_v56  ;;  %5815 = vmatpush3.msra.mxu0 %v7852_v30  ;;  %5851 = vmatpush3.msra.mxu1 %v532_v57  ;;  %v658_v14 = vand.u32 4294901760, %v657_v63  ;;  %v10995_v38 = vand.u32 4294901760, %v7929_v0  ;;  %v7951_v42 = vsub.f32 %v7826_v20, %v7838_v24  ;;  %v7968_v20 = vld [vmem:[#allocation5 + $0xa0] sm:$0xff]  ;;  %p7563_p1 = pnand %p7562_p11, %p12135_p10  ;;  %s7567_s22 = scalar_lea.vmem %s7566_s21, 1024 }
  0x69   : > { %11469 = vst [vmem:[#allocation23_spill] sm:$0xff] %v7932_v1  ;;  %v7954_v43 = vand.u32 4294901760, %v7922_v61  ;;  %5816 = vmatprep.subr.mxu0 %v7858_v32  ;;  %5852 = vmatprep.subr.mxu1 %v651_v62  ;;  %v545_v19 = vsub.f32 %v7917_v59, %v10996_v7  ;;  %v10997_v47 = vand.u32 4294901760, %v7940_v8  ;;  %v7963_v48 = vsub.f32 %v7828_v21, %v7852_v30  ;;  %p7568_p6 = scmp.lt.s32.totalorder %s10939_s23, %s7566_s21  ;;  %p7569_p12 = scmp.lt.s32.totalorder %s7567_s22, %s7561_s17 }
  0x6a   : > { %11470 = vst [vmem:[#allocation24_spill] sm:$0xff] %v7943_v12  ;;  %v7966_v52 = vand.u32 4294901760, %v7934_v2  ;;  %5817 = vmatpush3.msra.mxu0 %v7867_v36  ;;  %5853 = vmatpush3.msra.mxu1 %v539_v6  ;;  %v664_v53 = vsub.f32 %v7929_v0, %v10995_v38  ;;  %v10999_v54 = vand.u32 4294901760, %v7951_v42  ;;  %v7977_v57 = vsub.f32 %v7843_v26, %v7858_v32  ;;  %v7991_v38 = vld [vmem:[#allocation5 + $0x20] sm:$0xff]  ;;  %p7564_p2 = pneg %p7563_p1 }
  0x6b   : > { %11471 = vst [vmem:[#allocation25_spill] sm:$0xff] %v7954_v43  ;;  %v7980_v21 = vand.u32 4294901760, %v7945_v13  ;;  %5818 = vmatprep.subr.mxu0 %v7880_v41  ;;  %5854 = vmatprep.subr.mxu1 %v658_v14  ;;  %v546_v58 = vand.u32 4294901760, %v545_v19  ;;  %v552_v62 = vsub.f32 %v7940_v8, %v10997_v47  ;;  %v11002_v63 = vand.u32 4294901760, %v7963_v48  ;;  %v8001_v47 = vld [vmem:[#allocation5 + $0x98] sm:$0xff]  ;;  %p7570_p7 = por %p7569_p12, %p7568_p6 }
  0x6c   : > { %11472 = vst [vmem:[#allocation26_spill] sm:$0xff] %v7966_v52  ;;  %11473 = vst [vmem:[#allocation27_spill] sm:$0xff] %v7977_v57  ;;  %v7989_v6 = vsub.f32 %v7845_v27, %v7867_v36  ;;  %5819 = vmatpush3.msra.mxu0 %v7901_v50  ;;  %v665_v26 = vand.u32 4294901760, %v664_v53  ;;  %v671_v14 = vsub.f32 %v7951_v42, %v10999_v54  ;;  %v11004_v19 = vand.u32 4294901760, %v7977_v57  ;;  %v220_v36 = vld [vmem:[%s7792_s6 + $0x8] sm:$0xff] }
  0x6d   : > { %11474 = vst [vmem:[#allocation28_spill] sm:$0xff] %v7980_v21  ;;  %v7999_v7 = vand.u32 4294901760, %v7968_v20  ;;  %5855 = vmatpush3.msra.mxu1 %v546_v58  ;;  %5820 = vmatprep.subr.mxu0 %v7920_v60  ;;  %v553_v27 = vand.u32 4294901760, %v552_v62  ;;  %v559_v55 = vsub.f32 %v7963_v48, %v11002_v63  ;;  %v8010_v54 = vsub.f32 %v7847_v28, %v7880_v41  ;;  %p7571_p9 = pnand %p7570_p7, %p7564_p2 }
  0x6e   : > { %v11007_v53 = vand.u32 4294901760, %v7989_v6  ;;  %5856 = vmatprep.subr.mxu1 %v665_v26  ;;  %5821 = vmatpush3.msra.mxu0 %v7932_v1  ;;  %v672_v44 = vand.u32 4294901760, %v671_v14  ;;  %v678_v58 = vsub.f32 %v7977_v57, %v11004_v19  ;;  %v8019_v62 = vand.u32 4294901760, %v7991_v38 }
  0x6f   : > { %11475 = vst [vmem:[#allocation29_spill] sm:$0xff] %v7999_v7  ;;  %11476 = vst [vmem:[#allocation30_spill] sm:$0xff] %v8010_v54  ;;  %v8023_v63 = vsub.f32 %v7869_v37, %v7901_v50  ;;  %5857 = vmatpush3.msra.mxu1 %v553_v27  ;;  %5822 = vmatprep.subr.mxu0 %v7943_v12  ;;  %v560_v28 = vand.u32 4294901760, %v559_v55  ;;  %v11011_v14 = vand.u32 4294901760, %v8010_v54  ;;  %v8033_v19 = vand.u32 4294901760, %v8001_v47 }
  0x70   : > { %v566_v26 = vsub.f32 %v7989_v6, %v11007_v53  ;;  %5858 = vmatprep.subr.mxu1 %v672_v44  ;;  %5823 = vmatpush3.msra.mxu0 %v7954_v43  ;;  %v679_v37 = vand.u32 4294901760, %v678_v58  ;;  %v8041_v55 = vsub.f32 %v7893_v46, %v7920_v60  ;;  %v8044_v33 = vand.u32 4294901760, %v8012_v49  ;;  %v8046_v53 = vld [vmem:[#allocation5 + $0x88] sm:$0xff] }
  0x71   : > { %11477 = vst [vmem:[#allocation31_spill] sm:$0xff] %v8033_v19  ;;  %v11014_v27 = vand.u32 4294901760, %v8023_v63  ;;  %5859 = vmatpush3.msra.mxu1 %v560_v28  ;;  %5824 = vmatprep.subr.mxu0 %v7966_v52  ;;  %v685_v44 = vsub.f32 %v8010_v54, %v11011_v14  ;;  %v8054_v58 = vsub.f32 %v7903_v51, %v7932_v1  ;;  %v8057_v46 = vand.u32 4294901760, %v8025_v39  ;;  %v8071_v51 = vld [vmem:[#allocation5 + $0x8] sm:$0xff] }
  0x72   : > { %11478 = vst [vmem:[#allocation32_spill] sm:$0xff] %v8041_v55  ;;  %11479 = vst [vmem:[#allocation33_spill] sm:$0xff] %v8044_v33  ;;  %v567_v29 = vand.u32 4294901760, %v566_v26  ;;  %5860 = vmatprep.subr.mxu1 %v679_v37  ;;  %5825 = vmatpush3.msra.mxu0 %v7980_v21  ;;  %v8066_v60 = vsub.f32 %v7910_v56, %v7943_v12  ;;  %v8069_v14 = vand.u32 4294901760, %v8035_v34  ;;  %v8080_v26 = vand.u32 4294901760, %v8046_v53  ;;  %v8082_v56 = vld [vmem:[#allocation5 + $0x80] sm:$0xff] }
  0x73   : > { %11480 = vst [vmem:[#allocation34_spill] sm:$0xff] %v8057_v46  ;;  %v573_v28 = vsub.f32 %v8023_v63, %v11014_v27  ;;  %5826 = vmatprep.subr.mxu0 %v7999_v7  ;;  %v686_v37 = vand.u32 4294901760, %v685_v44  ;;  %v8077_v27 = vsub.f32 %v7922_v61, %v7954_v43  ;;  %v11484_v50 = vand.u32 4294901760, %v8041_v55  ;;  %v8105_v44 = vld [vmem:[#allocation5] sm:$0xff] }
  0x74   : > { %11481 = vst [vmem:[#allocation35_spill] sm:$0xff] %v8066_v60  ;;  %11482 = vst [vmem:[#allocation36_spill] sm:$0xff] %v8069_v14  ;;  %5861 = vmatpush3.msra.mxu1 %v567_v29  ;;  %5827 = vmatpush3.msra.mxu0 %v8019_v62  ;;  %v8091_v1 = vsub.f32 %v7934_v2, %v7966_v52  ;;  %v11486_v61 = vand.u32 4294901760, %v8054_v58  ;;  %v8099_v41 = vand.u32 4294901760, %v8071_v51  ;;  %v8113_v52 = vand.u32 4294901760, %v8082_v56 }
  0x75   : > { %11483 = vst [vmem:[#allocation37_spill] sm:$0xff] %v8080_v26  ;;  %v574_v12 = vand.u32 4294901760, %v573_v28  ;;  %v692_v29 = vsub.f32 %v8041_v55, %v11484_v50  ;;  %5862 = vmatprep.subr.mxu1 %v686_v37  ;;  %5828 = vmatprep.subr.mxu0 %v8033_v19  ;;  %v8103_v50 = vsub.f32 %v7945_v13, %v7980_v21  ;;  %v11487_v37 = vand.u32 4294901760, %v8066_v60 }
  0x76   : > { %11485 = vst [vmem:[#allocation38_spill] sm:$0xff] %v8091_v1  ;;  %v580_v43 = vsub.f32 %v8054_v58, %v11486_v61  ;;  %5829 = vmatpush3.msra.mxu0 %v8044_v33  ;;  %v11488_v13 = vand.u32 4294901760, %v8077_v27  ;;  %v8123_v21 = vsub.f32 %v7968_v20, %v7999_v7  ;;  %v11490_v30 = vand.u32 4294901760, %v8091_v1 }
  0x77   : > { %5863 = vmatpush3.msra.mxu1 %v574_v12  ;;  %v693_v2 = vand.u32 4294901760, %v692_v29  ;;  %v699_v61 = vsub.f32 %v8066_v60, %v11487_v37  ;;  %5830 = vmatprep.subr.mxu0 %v8057_v46  ;;  %v219_v37 = vld [vmem:[%s7792_s6] sm:$0xff]  ;;  %v8131_v24 = vand.u32 4294901760, %v8105_v44  ;;  %v11491_v20 = vand.u32 4294901760, %v8103_v50 }
  0x78   : > { %v581_v32 = vand.u32 4294901760, %v580_v43  ;;  %v587_v12 = vsub.f32 %v8077_v27, %v11488_v13  ;;  %11489 = vst [vmem:[#allocation39_spill] sm:$0xff] %v8123_v21  ;;  %5831 = vmatpush3.msra.mxu0 %v8069_v14  ;;  %v706_v43 = vsub.f32 %v8091_v1, %v11490_v30  ;;  %v8135_v13 = vsub.f32 %v7991_v38, %v8019_v62 }
  0x79   : > { %5864 = vmatprep.subr.mxu1 %v693_v2  ;;  %v700_v28 = vand.u32 4294901760, %v699_v61  ;;  %5832 = vmatprep.subr.mxu0 %v8080_v26  ;;  %v594_v2 = vsub.f32 %v8103_v50, %v11491_v20  ;;  %v11039_v61 = vand.u32 4294901760, %v8123_v21  ;;  %v8142_v7 = vand.u32 4294901760, %v220_v36 }
  0x7a   : > { %5865 = vmatpush3.msra.mxu1 %v581_v32  ;;  %v588_v29 = vand.u32 4294901760, %v587_v12  ;;  %v707_v30 = vand.u32 4294901760, %v706_v43  ;;  %5833 = vmatpush3.msra.mxu0 %v8099_v41  ;;  %v11040_v1 = vand.u32 4294901760, %v8135_v13  ;;  %v8148_v32 = vsub.f32 %v8001_v47, %v8033_v19 }
  0x7b   : > { %11492 = vst [vmem:[#allocation40_spill] sm:$0xff] %v8142_v7  ;;  %5866 = vmatprep.subr.mxu1 %v700_v28  ;;  %v8150_v38 = vand.u32 4294901760, %v219_v37  ;;  %v595_v12 = vand.u32 4294901760, %v594_v2  ;;  %5834 = vmatprep.subr.mxu0 %v8113_v52  ;;  %v713_v20 = vsub.f32 %v8123_v21, %v11039_v61  ;;  %v8157_v28 = vsub.f32 %v220_v36, %v8142_v7 }
  0x7c   : > { %5867 = vmatpush3.msra.mxu1 %v588_v29  ;;  %v8161_v43 = vsub.f32 %v8012_v49, %v8044_v33  ;;  %5835 = vmatpush3.msra.mxu0 %v8131_v24  ;;  %v601_v47 = vsub.f32 %v8135_v13, %v11040_v1  ;;  %v8173_v36 = vsub.f32 %v8025_v39, %v8057_v46 }
  0x7d   : > { %11493 = vst [vmem:[#allocation41_spill] sm:$0xff] %v8150_v38  ;;  %5868 = vmatprep.subr.mxu1 %v707_v30  ;;  %v8169_v2 = vsub.f32 %v219_v37, %v8150_v38  ;;  %v714_v61 = vand.u32 4294901760, %v713_v20  ;;  %v11045_v49 = vand.u32 4294901760, %v8157_v28  ;;  %5892 = vmatprep.subr.mxu0 %v7822_v18  ;;  %v8180_v1 = vsub.f32 %v8035_v34, %v8069_v14 }
  0x7e   : > { %5869 = vmatpush3.msra.mxu1 %v595_v12  ;;  %v11046_v30 = vand.u32 4294901760, %v8161_v43  ;;  %v602_v29 = vand.u32 4294901760, %v601_v47  ;;  %v11494_v37 = vand.u32 4294901760, %v8148_v32  ;;  %745 = vmatprep.mubr.f32.mxu1 %v8142_v7  ;;  %v11495_v7 = vand.u32 4294901760, %v8173_v36  ;;  %v227_v47 = vld [vmem:[%s7792_s6 + $0x40] sm:$0xff] }
  0x7f   : > { %v11053_v39 = vand.u32 4294901760, %v8169_v2  ;;  %5870 = vmatprep.subr.mxu1 %v714_v61  ;;  %v462_v20 = vsub.f32 %v8157_v28, %v11045_v49 }
  0x80   : > { %v720_v33 = vsub.f32 %v8148_v32, %v11494_v37  ;;  %v608_v34 = vsub.f32 %v8161_v43, %v11046_v30  ;;  %v8197_v37 = vsub.f32 %v8046_v53, %v8080_v26  ;;  %5871 = vmatpush3.msra.mxu1 %v602_v29  ;;  %v727_v49 = vsub.f32 %v8173_v36, %v11495_v7 }
  0x81   : > { %v468_v61 = vsub.f32 %v8169_v2, %v11053_v39  ;;  %v8207_v30 = vsub.f32 %v8071_v51, %v8099_v41  ;;  %v463_v14 = vand.u32 4294901760, %v462_v20  ;;  %v11496_v53 = vand.u32 4294901760, %v8180_v1  ;;  %v226_v51 = vld [vmem:[%s7792_s6 + $0x38] sm:$0xff] }
  0x82   : > { %v721_v12 = vand.u32 4294901760, %v720_v33  ;;  %v609_v46 = vand.u32 4294901760, %v608_v34  ;;  %v11058_v33 = vand.u32 4294901760, %v8197_v37  ;;  %v728_v39 = vand.u32 4294901760, %v727_v49 }
  0x83   : > { %v615_v29 = vsub.f32 %v8180_v1, %v11496_v53  ;;  %v469_v26 = vand.u32 4294901760, %v468_v61  ;;  %v11055_v18 = vand.u32 4294901760, %v8207_v30  ;;  %v8217_v7 = vsub.f32 %v8082_v56, %v8113_v52  ;;  %464 = vmatprep.mubr.f32.mxu0 %v463_v14 }
  0x84   : > { %5872 = vmatprep.subr.mxu1 %v721_v12  ;;  %v734_v34 = vsub.f32 %v8197_v37, %v11058_v33  ;;  %v8225_v12 = vsub.f32 %v8105_v44, %v8131_v24  ;;  %v8227_v49 = vand.u32 4294901760, %v227_v47  ;;  %v8235_v53 = vand.u32 4294901760, %v226_v51  ;;  %v234_v44 = vld [vmem:[%s7792_s6 + $0x78] sm:$0xff] }
  0x85   : > { %5873 = vmatpush3.msra.mxu1 %v609_v46  ;;  %v616_v20 = vand.u32 4294901760, %v615_v29  ;;  %470 = vmatmul.mubr.f32.vlgmr.msra.gmra.mxu0 %v469_v26  ;;  %v622_v56 = vsub.f32 %v8207_v30, %v11055_v18  ;;  %v11056_v14 = vand.u32 4294901760, %v8217_v7  ;;  %v8251_v18 = vand.u32 4294901760, %v234_v44 }
  0x86   : > { %11497 = vst [vmem:[#allocation42_spill] sm:$0xff] %v8225_v12  ;;  %11498 = vst [vmem:[#allocation43_spill] sm:$0xff] %v8227_v49  ;;  %5874 = vmatprep.subr.mxu1 %v728_v39  ;;  %5893 = vmatpush3.msra.mxu0 %v7835_v23  ;;  %v735_v46 = vand.u32 4294901760, %v734_v34  ;;  %v11057_v61 = vand.u32 4294901760, %v8225_v12  ;;  %v233_v34 = vld [vmem:[%s7792_s6 + $0x70] sm:$0xff] }
  0x87   : > { %5875 = vmatpush3.msra.mxu1 %v616_v20  ;;  %11499 = vst [vmem:[#allocation44_spill] sm:$0xff] %v8235_v53  ;;  %5894 = vmatprep.subr.mxu0 %v7841_v25  ;;  %v623_v26 = vand.u32 4294901760, %v622_v56  ;;  %v741_v39 = vsub.f32 %v8217_v7, %v11056_v14  ;;  %v8247_v20 = vsub.f32 %v227_v47, %v8227_v49  ;;  %11500 = vst [vmem:[#allocation45_spill] sm:$0xff] %v8251_v18 }
  0x88   : > { %5895 = vmatpush3.msra.mxu0 %v7855_v31  ;;  %5876 = vmatprep.subr.mxu1 %v735_v46  ;;  %v629_v29 = vsub.f32 %v8225_v12, %v11057_v61  ;;  %v8255_v46 = vsub.f32 %v226_v51, %v8235_v53  ;;  %v8258_v61 = vand.u32 4294901760, %v233_v34 }
  0x89   : > { %5896 = vmatprep.subr.mxu0 %v7864_v35  ;;  %5877 = vmatpush3.msra.mxu1 %v623_v26  ;;  %v742_v56 = vand.u32 4294901760, %v741_v39  ;;  %v11061_v47 = vand.u32 4294901760, %v8247_v20  ;;  %v241_v26 = vld [vmem:[%s7792_s6 + $0xb0] sm:$0xff]  ;;  %v8266_v39 = vsub.f32 %v234_v44, %v8251_v18 }
  0x8a   : > { %5897 = vmatpush3.msra.mxu0 %v7877_v40  ;;  %v630_v14 = vand.u32 4294901760, %v629_v29  ;;  %11501 = vst [vmem:[#allocation46_spill] sm:$0xff] %v8258_v61  ;;  %v240_v29 = vld [vmem:[%s7792_s6 + $0xa8] sm:$0xff] }
  0x8b   : > { %5878 = vmatprep.subr.mxu1 %v742_v56  ;;  %5898 = vmatprep.subr.mxu0 %v7891_v45  ;;  %v8277_v56 = vand.u32 4294901760, %v241_v26  ;;  %v477_v44 = vsub.f32 %v8247_v20, %v11061_v47  ;;  %v8287_v51 = vand.u32 4294901760, %v240_v29 }
  0x8c   : > { %5879 = vmatpush3.msra.mxu1 %v630_v14  ;;  %5899 = vmatpush3.msra.mxu0 %v7917_v59  ;;  %v8275_v14 = vsub.f32 %v233_v34, %v8258_v61  ;;  %v11502_v34 = vand.u32 4294901760, %v8255_v46 }
  0x8d   : > { %747 = vmatmul.mubr.f32.vlgmr.msra.gmra.mxu1 %v8150_v38  ;;  %5900 = vmatprep.subr.mxu0 %v7929_v0  ;;  %v478_v33 = vand.u32 4294901760, %v477_v44 }
  0x8e   : > { %5936 = vmatprep.subr.mxu1 %v7802_v3  ;;  %5901 = vmatpush3.msra.mxu0 %v7940_v8  ;;  %v483_v38 = vsub.f32 %v8255_v46, %v11502_v34  ;;  %v11069_v47 = vand.u32 4294901760, %v8275_v14  ;;  %v11503_v34 = vand.u32 4294901760, %v8266_v39 }
  0x8f   : > { %5937 = vmatpush3.msra.mxu1 %v7804_v4  ;;  %5902 = vmatprep.subr.mxu0 %v7951_v42 }
  0x90   : > { %5938 = vmatprep.subr.mxu1 %v7806_v5  ;;  %5903 = vmatpush3.msra.mxu0 %v7963_v48  ;;  %v498_v44 = vsub.f32 %v8275_v14, %v11069_v47 }
  0x91   : > { %5939 = vmatpush3.msra.mxu1 %v7808_v9  ;;  %5904 = vmatprep.subr.mxu0 %v7977_v57  ;;  %v8298_v57 = vsub.f32 %v241_v26, %v8277_v56  ;;  %v484_v26 = vand.u32 4294901760, %v483_v38 }
  0x92   : > { %5940 = vmatprep.subr.mxu1 %v7810_v10  ;;  %5905 = vmatpush3.msra.mxu0 %v7989_v6  ;;  %v499_v47 = vand.u32 4294901760, %v498_v44 }
  0x93   : > { %5941 = vmatpush3.msra.mxu1 %v7812_v11  ;;  %5906 = vmatprep.subr.mxu0 %v8010_v54  ;;  %v492_v11 = vsub.f32 %v8266_v39, %v11503_v34  ;;  %v8308_v54 = vsub.f32 %v240_v29, %v8287_v51  ;;  %v11505_v29 = vld [vmem:[#allocation17_spill] sm:$0xff] }
  0x94   : > { %5942 = vmatprep.subr.mxu1 %v7815_v15  ;;  %5907 = vmatpush3.msra.mxu0 %v8023_v63 }
  0x95   : > { %5943 = vmatpush3.msra.mxu1 %v7817_v16  ;;  %5908 = vmatprep.subr.mxu0 %v8041_v55  ;;  %v11070_v55 = vand.u32 4294901760, %v8298_v57  ;;  %v11504_v16 = vld [vmem:[#allocation16_spill] sm:$0xff]  ;;  %v493_v34 = vand.u32 4294901760, %v492_v11  ;;  %v11072_v38 = vand.u32 4294901760, %v8308_v54 }
  0x96   : > { %5944 = vmatprep.subr.mxu1 %v7819_v17  ;;  %5909 = vmatpush3.msra.mxu0 %v8054_v58 }
  0x97   : > { %5945 = vmatpush3.msra.mxu1 %v7832_v22  ;;  %5910 = vmatprep.subr.mxu0 %v8066_v60  ;;  %v11506_v22 = vld [vmem:[#allocation38_spill] sm:$0xff]  ;;  %v513_v11 = vsub.f32 %v8308_v54, %v11072_v38  ;;  %v11513_v38 = vld [vmem:[#allocation24_spill] sm:$0xff] }
  0x98   : > { %5946 = vmatprep.subr.mxu1 %v11504_v16  ;;  %479 = vmatprep.mubr.f32.mxu0 %v478_v33  ;;  %v11507_v60 = vld [vmem:[#allocation18_spill] sm:$0xff]  ;;  %v507_v16 = vsub.f32 %v8298_v57, %v11070_v55  ;;  %v11508_v33 = vld [vmem:[#allocation19_spill] sm:$0xff] }
  0x99   : > { %5911 = vmatpush3.msra.mxu0 %v8077_v27  ;;  %5947 = vmatpush3.msra.mxu1 %v11505_v29  ;;  %v11509_v29 = vld [vmem:[#allocation20_spill] sm:$0xff]  ;;  %v11511_v55 = vld [vmem:[#allocation22_spill] sm:$0xff] }
  0x9a   : > { %485 = vmatmul.mubr.f32.gmra.mxu0 %v484_v26  ;;  %5912 = vmatprep.subr.mxu0 %v11506_v22  ;;  %v11510_v26 = vld [vmem:[#allocation21_spill] sm:$0xff]  ;;  %v508_v44 = vand.u32 4294901760, %v507_v16  ;;  %v11515_v16 = vld [vmem:[#allocation26_spill] sm:$0xff] }
  0x9b   : > { %5948 = vmatprep.subr.mxu1 %v11507_v60  ;;  %5913 = vmatpush3.msra.mxu0 %v8103_v50 }
  0x9c   : > { %5949 = vmatpush3.msra.mxu1 %v11508_v33  ;;  %5914 = vmatprep.subr.mxu0 %v8123_v21  ;;  %v11512_v21 = vld [vmem:[#allocation23_spill] sm:$0xff] }
  0x9d   : > { %5950 = vmatprep.subr.mxu1 %v11509_v29  ;;  %494 = vmatprep.mubr.f32.mxu0 %v493_v34  ;;  %v514_v34 = vand.u32 4294901760, %v513_v11  ;;  %v11517_v11 = vld [vmem:[#allocation29_spill] sm:$0xff] }
  0x9e   : > { %5915 = vmatpush3.msra.mxu0 %v8135_v13  ;;  %5951 = vmatpush3.msra.mxu1 %v11510_v26 }
  0x9f   : > { %500 = vmatmul.mubr.f32.gmra.mxu0 %v499_v47  ;;  %5916 = vmatprep.subr.mxu0 %v8148_v32  ;;  %v11514_v47 = vld [vmem:[#allocation25_spill] sm:$0xff] }
  0xa0   : > { %5952 = vmatprep.subr.mxu1 %v11511_v55  ;;  %5917 = vmatpush3.msra.mxu0 %v8161_v43 }
  0xa1   : > { %5953 = vmatpush3.msra.mxu1 %v11512_v21  ;;  %752 = vmatprep.mubr.f32.mxu1 %v8227_v49  ;;  %v11516_v49 = vld [vmem:[#allocation28_spill] sm:$0xff] }
  0xa2   : > { %5918 = vmatprep.subr.mxu0 %v8173_v36  ;;  %5954 = vmatprep.subr.mxu1 %v11513_v38 }
  0xa3   : > { %509 = vmatprep.mubr.f32.mxu0 %v508_v44  ;;  %754 = vmatmul.mubr.f32.gmra.mxu1 %v8235_v53  ;;  %v11518_v44 = vld [vmem:[#allocation14_spill] sm:$0xff]  ;;  %v11521_v53 = vand.u32 4294901760, %v7835_v23  ;;  %v11526_v23 = vld [vmem:[#allocation37_spill] sm:$0xff] }
  0xa4   : > { %5919 = vmatpush3.msra.mxu0 %v8180_v1  ;;  %5955 = vmatpush3.msra.mxu1 %v11514_v47 }
  0xa5   : > { %515 = vmatmul.mubr.f32.gmra.mxu0 %v514_v34  ;;  %5920 = vmatprep.subr.mxu0 %v8197_v37  ;;  %v11519_v34 = vand.u32 4294901760, %v11518_v44  ;;  %v11525_v44 = vand.u32 4294901760, %v7855_v31  ;;  %v11530_v31 = vand.u32 4294901760, %v8157_v28 }
  0xa6   : > { %5956 = vmatprep.subr.mxu1 %v11515_v16  ;;  %5921 = vmatpush3.msra.mxu0 %v8207_v30 }
  0xa7   : > { %5957 = vmatpush3.msra.mxu1 %v11516_v49  ;;  %759 = vmatprep.mubr.f32.mxu1 %v8251_v18  ;;  %v11520_v18 = vld [vmem:[#allocation33_spill] sm:$0xff] }
  0xa8   : > { %5922 = vmatprep.subr.mxu0 %v8217_v7  ;;  %5958 = vmatprep.subr.mxu1 %v11517_v11 }
  0xa9   : > { %761 = vmatmul.mubr.f32.gmra.mxu1 %v8258_v61  ;;  %5923 = vmatpush3.msra.mxu0 %v8225_v12  ;;  %v11522_v61 = vld [vmem:[#allocation34_spill] sm:$0xff]  ;;  %v11523_v12 = vand.u32 4294901760, %v7841_v25  ;;  %v11528_v25 = vand.u32 4294901760, %v7877_v40  ;;  %v11533_v40 = vand.u32 4294901760, %v7929_v0  ;;  %v11537_v0 = vand.u32 4294901760, %v7963_v48 }
  0xaa   : > { %903 = vmatprep.mubr.f32.mxu0 %v8157_v28  ;;  %5959 = vmatpush3.msra.mxu1 %v8019_v62  ;;  %v11535_v28 = vand.u32 4294901760, %v7951_v42  ;;  %v11542_v42 = vld [vmem:[#allocation12_spill] sm:$0xff] }
  0xab   : > { %906 = vmatmul.mubr.f32.vlgmr.msra.gmra.mxu0 %v8169_v2  ;;  %5960 = vmatprep.subr.mxu1 %v8033_v19  ;;  %v11524_v19 = vld [vmem:[#allocation36_spill] sm:$0xff] }
  0xac   : > { %5980 = vmatprep.subr.mxu0 %v11519_v34  ;;  %5961 = vmatpush3.msra.mxu1 %v11520_v18  ;;  %v11532_v34 = vand.u32 4294901760, %v8169_v2  ;;  %v11543_v2 = vld [vmem:[#allocation30_spill] sm:$0xff] }
  0xad   : > { %5981 = vmatpush3.msra.mxu0 %v11521_v53  ;;  %766 = vmatprep.mubr.f32.mxu1 %v8277_v56  ;;  %v11527_v53 = vand.u32 4294901760, %v7864_v35  ;;  %v11531_v35 = vand.u32 4294901760, %v7917_v59  ;;  %v11536_v59 = vand.u32 4294901760, %v8247_v20  ;;  %v11544_v48 = vand.u32 4294901760, %v11543_v2 }
  0xae   : > { %5962 = vmatprep.subr.mxu1 %v11522_v61  ;;  %5982 = vmatprep.subr.mxu0 %v11523_v12  ;;  %v11529_v12 = vand.u32 4294901760, %v7891_v45  ;;  %v11534_v45 = vand.u32 4294901760, %v7940_v8  ;;  %v11572_v2 = vand.u32 4294901760, %v8180_v1 }
  0xaf   : > { %768 = vmatmul.mubr.f32.gmra.mxu1 %v8287_v51  ;;  %912 = vmatprep.mubr.f32.mxu0 %v8247_v20  ;;  %v11546_v20 = vand.u32 4294901760, %v8023_v63  ;;  %v311_v63 = vld [vmem:[#allocation5 + $0x1f8] sm:$0xff] }
  0xb0   : > { %5963 = vmatpush3.msra.mxu1 %v11524_v19  ;;  %5983 = vmatpush3.msra.mxu0 %v11525_v44 }
  0xb1   : > { %915 = vmatmul.mubr.f32.gmra.mxu0 %v8255_v46  ;;  %5964 = vmatprep.subr.mxu1 %v11526_v23 }
  0xb2   : > { %5984 = vmatprep.subr.mxu0 %v11527_v53  ;;  %5965 = vmatpush3.msra.mxu1 %v8099_v41  ;;  %v11551_v53 = vand.u32 4294901760, %v8054_v58  ;;  %v11560_v58 = vand.u32 4294901760, %v11506_v22  ;;  %v11564_v22 = vand.u32 4294901760, %v8135_v13  ;;  %v11568_v13 = vand.u32 4294901760, %v8161_v43 }
  0xb3   : > { %5985 = vmatpush3.msra.mxu0 %v11528_v25  ;;  %5966 = vmatprep.subr.mxu1 %v8113_v52 }
  0xb4   : > { %5986 = vmatprep.subr.mxu0 %v11529_v12  ;;  %921 = vmatprep.mubr.f32.mxu0 %v8266_v39  ;;  %v295_v12 = vld [vmem:[#allocation5 + $0x178] sm:$0xff] }
  0xb5   : > { %5967 = vmatpush3.msra.mxu1 %v8131_v24  ;;  %1037 = vmatprep.mubr.f32.mxu1 %v11530_v31  ;;  %v11555_v31 = vld [vmem:[#allocation16_spill] sm:$0xff] }
  0xb6   : > { %5987 = vmatpush3.msra.mxu0 %v11531_v35  ;;  %1041 = vmatmul.mubr.f32.vlgmr.msra.gmra.mxu1 %v11532_v34  ;;  %v11557_v35 = vand.u32 4294901760, %v8077_v27  ;;  %v11558_v34 = vld [vmem:[#allocation17_spill] sm:$0xff]  ;;  %v11562_v27 = vld [vmem:[#allocation39_spill] sm:$0xff] }
  0xb7   : > { %924 = vmatmul.mubr.f32.gmra.mxu0 %v8275_v14  ;;  %5988 = vmatprep.subr.mxu0 %v11533_v40  ;;  %v8444_v40 = vand.u32 4294901760, %v311_v63 }
  0xb8   : > { %6024 = vmatprep.subr.mxu1 %v7802_v3  ;;  %5989 = vmatpush3.msra.mxu0 %v11534_v45  ;;  %v11538_v3 = vand.u32 4294901760, %v8255_v46  ;;  %v11547_v46 = vld [vmem:[#allocation13_spill] sm:$0xff]  ;;  %v8446_v45 = vand.u32 4294901760, %v295_v12 }
  0xb9   : > { %6025 = vmatpush3.msra.mxu1 %v7804_v4  ;;  %5990 = vmatprep.subr.mxu0 %v11535_v28  ;;  %v11539_v4 = vld [vmem:[#allocation27_spill] sm:$0xff] }
  0xba   : > { %6026 = vmatprep.subr.mxu1 %v7806_v5  ;;  %930 = vmatprep.mubr.f32.mxu0 %v8298_v57  ;;  %v11540_v8 = vand.u32 4294901760, %v11539_v4  ;;  %v11541_v5 = vand.u32 4294901760, %v7989_v6  ;;  %v11549_v6 = vld [vmem:[#allocation32_spill] sm:$0xff] }
  0xbb   : > { %1048 = vmatprep.mubr.f32.mxu1 %v11536_v59  ;;  %5991 = vmatpush3.msra.mxu0 %v11537_v0  ;;  %v11550_v44 = vand.u32 4294901760, %v11549_v6  ;;  %v310_v28 = vld [vmem:[#allocation5 + $0x1f0] sm:$0xff]  ;;  %v11563_v0 = vand.u32 4294901760, %v11562_v27 }
  0xbc   : > { %6027 = vmatpush3.msra.mxu1 %v7808_v9  ;;  %933 = vmatmul.mubr.f32.gmra.mxu0 %v8308_v54  ;;  %v11545_v9 = vand.u32 4294901760, %v8266_v39  ;;  %v11553_v39 = vld [vmem:[#allocation35_spill] sm:$0xff]  ;;  %v8457_v4 = vand.u32 4294901760, %v310_v28 }
  0xbd   : > { %1052 = vmatmul.mubr.f32.gmra.mxu1 %v11538_v3  ;;  %5992 = vmatprep.subr.mxu0 %v11540_v8  ;;  %v11554_v25 = vand.u32 4294901760, %v11553_v39  ;;  %v294_v59 = vld [vmem:[#allocation5 + $0x170] sm:$0xff]  ;;  %v293_v3 = vld [vmem:[#allocation5 + $0x168] sm:$0xff] }
  0xbe   : > { %6028 = vmatprep.subr.mxu1 %v7810_v10  ;;  %5993 = vmatpush3.msra.mxu0 %v11541_v5  ;;  %v11548_v10 = vand.u32 4294901760, %v8275_v14  ;;  %v11556_v14 = vand.u32 4294901760, %v8298_v57  ;;  %v11561_v57 = vand.u32 4294901760, %v8103_v50  ;;  %11565 = vst [vmem:[#allocation38_spill] sm:$0xff] %v8457_v4  ;;  %v8459_v8 = vand.u32 4294901760, %v294_v59 }
  0xbf   : > { %6029 = vmatpush3.msra.mxu1 %v11542_v42  ;;  %5994 = vmatprep.subr.mxu0 %v11544_v48  ;;  %v8465_v50 = vsub.f32 %v295_v12, %v8446_v45  ;;  %v8468_v5 = vsub.f32 %v311_v63, %v8444_v40  ;;  %v8475_v42 = vand.u32 4294901760, %v293_v3  ;;  %v307_v48 = vld [vmem:[#allocation5 + $0x1d8] sm:$0xff] }
  0xc0   : > { %6030 = vmatprep.subr.mxu1 %v7815_v15  ;;  %1059 = vmatprep.mubr.f32.mxu1 %v11545_v9  ;;  %v11552_v15 = vld [vmem:[#allocation15_spill] sm:$0xff]  ;;  %11566 = vst [vmem:[#allocation18_spill] sm:$0xff] %v8459_v8  ;;  %v291_v9 = vld [vmem:[#allocation5 + $0x158] sm:$0xff] }
  0xc1   : > { %5995 = vmatpush3.msra.mxu0 %v11546_v20  ;;  %6031 = vmatpush3.msra.mxu1 %v11547_v46  ;;  %11570 = vst [vmem:[#allocation20_spill] sm:$0xff] %v8475_v42  ;;  %v8489_v20 = vsub.f32 %v310_v28, %v8457_v4  ;;  %v11089_v1 = vand.u32 4294901760, %v8468_v5  ;;  %v290_v46 = vld [vmem:[#allocation5 + $0x150] sm:$0xff]  ;;  %v8502_v6 = vsub.f32 %v293_v3, %v8475_v42 }
  0xc2   : > { %1063 = vmatmul.mubr.f32.gmra.mxu1 %v11548_v10  ;;  %5996 = vmatprep.subr.mxu0 %v11550_v44  ;;  %v11576_v10 = vand.u32 4294901760, %v8207_v30  ;;  %v306_v44 = vld [vmem:[#allocation5 + $0x1d0] sm:$0xff]  ;;  %v11580_v30 = vld [vmem:[#allocation42_spill] sm:$0xff]  ;;  %v8521_v12 = vand.u32 4294901760, %v290_v46 }
  0xc3   : > { %6032 = vmatprep.subr.mxu1 %v7819_v17  ;;  %5997 = vmatpush3.msra.mxu0 %v11551_v53  ;;  %v11559_v17 = vand.u32 4294901760, %v8308_v54  ;;  %v309_v54 = vld [vmem:[#allocation5 + $0x1e8] sm:$0xff]  ;;  %v8510_v53 = vand.u32 4294901760, %v307_v48  ;;  %v11581_v39 = vand.u32 4294901760, %v11580_v30  ;;  %v11087_v63 = vand.u32 4294901760, %v8489_v20 }
  0xc4   : > { %6033 = vmatpush3.msra.mxu1 %v11552_v15  ;;  %5998 = vmatprep.subr.mxu0 %v11554_v25  ;;  %v8512_v15 = vand.u32 4294901760, %v291_v9  ;;  %11582 = vst [vmem:[#allocation25_spill] sm:$0xff] %v8521_v12 }
  0xc5   : > { %6034 = vmatprep.subr.mxu1 %v11555_v31  ;;  %1070 = vmatprep.mubr.f32.mxu1 %v11556_v14  ;;  %11578 = vst [vmem:[#allocation23_spill] sm:$0xff] %v8510_v53  ;;  %v11583_v31 = vld [vmem:[#allocation40_spill] sm:$0xff]  ;;  %v8562_v3 = vsub.f32 %v8489_v20, %v11087_v63  ;;  %v11599_v63 = vld [vmem:[#allocation45_spill] sm:$0xff] }
  0xc6   : > { %5999 = vmatpush3.msra.mxu0 %v11557_v35  ;;  %6035 = vmatpush3.msra.mxu1 %v11558_v34  ;;  %11579 = vst [vmem:[#allocation24_spill] sm:$0xff] %v8512_v15  ;;  %v8536_v35 = vand.u32 4294901760, %v306_v44 }
  0xc7   : > { %1074 = vmatmul.mubr.f32.gmra.mxu1 %v11559_v17  ;;  %6000 = vmatprep.subr.mxu0 %v11560_v58  ;;  %v11585_v17 = vld [vmem:[#allocation41_spill] sm:$0xff]  ;;  %v11586_v58 = vld [vmem:[#allocation31_spill] sm:$0xff] }
  0xc8   : > { %6036 = vmatprep.subr.mxu1 %v11507_v60  ;;  %6001 = vmatpush3.msra.mxu0 %v11561_v57  ;;  %v11567_v60 = vand.u32 4294901760, %v8148_v32  ;;  %v11571_v32 = vand.u32 4294901760, %v8173_v36  ;;  %11584 = vst [vmem:[#allocation26_spill] sm:$0xff] %v8536_v35  ;;  %v8550_v57 = vsub.f32 %v291_v9, %v8512_v15 }
  0xc9   : > { %6037 = vmatpush3.msra.mxu1 %v11508_v33  ;;  %6002 = vmatprep.subr.mxu0 %v11563_v0  ;;  %v292_v33 = vld [vmem:[#allocation5 + $0x160] sm:$0xff] }
  0xca   : > { %6038 = vmatprep.subr.mxu1 %v11509_v29  ;;  %6003 = vmatpush3.msra.mxu0 %v11564_v22  ;;  %v8473_v29 = vand.u32 4294901760, %v309_v54  ;;  %v8486_v43 = vand.u32 4294901760, %v292_v33  ;;  %v288_v0 = vld [vmem:[#allocation5 + $0x140] sm:$0xff] }
  0xcb   : > { %6039 = vmatpush3.msra.mxu1 %v11510_v26  ;;  %6004 = vmatprep.subr.mxu0 %v11567_v60  ;;  %v308_v26 = vld [vmem:[#allocation5 + $0x1e0] sm:$0xff] }
  0xcc   : > { %6040 = vmatprep.subr.mxu1 %v11511_v55  ;;  %6005 = vmatpush3.msra.mxu0 %v11568_v13  ;;  %11569 = vst [vmem:[#allocation19_spill] sm:$0xff] %v8473_v29  ;;  %v8484_v55 = vsub.f32 %v294_v59, %v8459_v8  ;;  %11573 = vst [vmem:[#allocation21_spill] sm:$0xff] %v8486_v43  ;;  %v8494_v36 = vand.u32 4294901760, %v308_v26  ;;  %v8518_v25 = vsub.f32 %v292_v33, %v8486_v43  ;;  %v304_v60 = vld [vmem:[#allocation5 + $0x1c0] sm:$0xff]  ;;  %v287_v13 = vld [vmem:[#allocation5 + $0x138] sm:$0xff] }
  0xcd   : > { %6041 = vmatpush3.msra.mxu1 %v11512_v21  ;;  %6006 = vmatprep.subr.mxu0 %v11571_v32  ;;  %v11574_v21 = vand.u32 4294901760, %v8197_v37  ;;  %v11577_v37 = vand.u32 4294901760, %v8217_v7  ;;  %v11083_v59 = vand.u32 4294901760, %v8502_v6 }
  0xce   : > { %6042 = vmatprep.subr.mxu1 %v11513_v38  ;;  %6007 = vmatpush3.msra.mxu0 %v11572_v2  ;;  %11575 = vst [vmem:[#allocation22_spill] sm:$0xff] %v8494_v36  ;;  %v11088_v38 = vand.u32 4294901760, %v8465_v50  ;;  %v11085_v7 = vand.u32 4294901760, %v8484_v55  ;;  %v8539_v34 = vsub.f32 %v308_v26, %v8494_v36  ;;  %v11086_v33 = vand.u32 4294901760, %v8518_v25 }
  0xcf   : > { %6043 = vmatpush3.msra.mxu1 %v11514_v47  ;;  %6008 = vmatprep.subr.mxu0 %v11574_v21  ;;  %v8505_v47 = vsub.f32 %v309_v54, %v8473_v29  ;;  %v8555_v54 = vsub.f32 %v307_v48, %v8510_v53  ;;  %v8579_v48 = vsub.f32 %v306_v44, %v8536_v35  ;;  %v303_v44 = vld [vmem:[#allocation5 + $0x1b8] sm:$0xff] }
  0xd0   : > { %6044 = vmatprep.subr.mxu1 %v11515_v16  ;;  %6009 = vmatpush3.msra.mxu0 %v11576_v10  ;;  %v289_v16 = vld [vmem:[#allocation5 + $0x148] sm:$0xff]  ;;  %v8534_v14 = vsub.f32 %v8465_v50, %v11088_v38  ;;  %v8570_v22 = vsub.f32 %v8484_v55, %v11085_v7  ;;  %v11090_v2 = vand.u32 4294901760, %v8539_v34  ;;  %v8596_v10 = vand.u32 4294901760, %v288_v0  ;;  %v286_v7 = vld [vmem:[#allocation5 + $0x130] sm:$0xff] }
  0xd1   : > { %6045 = vmatpush3.msra.mxu1 %v11516_v49  ;;  %6010 = vmatprep.subr.mxu0 %v11577_v37  ;;  %v305_v49 = vld [vmem:[#allocation5 + $0x1c8] sm:$0xff]  ;;  %v8544_v28 = vand.u32 4294901760, %v289_v16  ;;  %11591 = vst [vmem:[#allocation33_spill] sm:$0xff] %v8579_v48  ;;  %v11594_v37 = vld [vmem:[#allocation44_spill] sm:$0xff]  ;;  %v11091_v30 = vand.u32 4294901760, %v8555_v54 }
  0xd2   : > { %6046 = vmatprep.subr.mxu1 %v11517_v11  ;;  %6011 = vmatpush3.msra.mxu0 %v11581_v39  ;;  %v8529_v11 = vsub.f32 %v8468_v5, %v11089_v1  ;;  %v8552_v27 = vand.u32 4294901760, %v305_v49  ;;  %11593 = vst [vmem:[#allocation36_spill] sm:$0xff] %v8596_v10  ;;  %v8603_v39 = vand.u32 4294901760, %v287_v13  ;;  %v8634_v1 = vsub.f32 %v288_v0, %v8596_v10  ;;  %v285_v0 = vld [vmem:[#allocation5 + $0x128] sm:$0xff] }
  0xd3   : > { %1240 = vmatprep.mubr.f32.mxu0 %v11583_v31  ;;  %6047 = vmatpush3.msra.mxu1 %v8019_v62  ;;  %v11084_v62 = vand.u32 4294901760, %v8505_v47  ;;  %11587 = vst [vmem:[#allocation28_spill] sm:$0xff] %v8544_v28  ;;  %v8589_v21 = vsub.f32 %v289_v16, %v8544_v28  ;;  %v8644_v32 = vsub.f32 %v8555_v54, %v11091_v30  ;;  %v8663_v30 = vand.u32 4294901760, %v286_v7 }
  0xd4   : > { %1242 = vmatmul.mubr.f32.vlgmr.msra.gmra.mxu0 %v11585_v17  ;;  %6048 = vmatprep.subr.mxu1 %v11586_v58  ;;  %11588 = vst [vmem:[#allocation29_spill] sm:$0xff] %v8552_v27  ;;  %v1667_v26 = vand.u32 4294901760, %v8529_v11  ;;  %11596 = vst [vmem:[#allocation27_spill] sm:$0xff] %v8603_v39  ;;  %v8606_v16 = vsub.f32 %v305_v49, %v8552_v27  ;;  %v1674_v11 = vand.u32 4294901760, %v8562_v3  ;;  %v302_v3 = vld [vmem:[#allocation5 + $0x1b0] sm:$0xff]  ;;  %v11606_v58 = vand.u32 4294901760, %v8579_v48 }
  0xd5   : > { %6068 = vmatprep.subr.mxu0 %v8444_v40  ;;  %6049 = vmatpush3.msra.mxu1 %v11520_v18  ;;  %v8565_v18 = vsub.f32 %v290_v46, %v8521_v12  ;;  %v8586_v9 = vsub.f32 %v8505_v47, %v11084_v62  ;;  %11592 = vst [vmem:[#allocation34_spill] sm:$0xff] %v8589_v21  ;;  %11600 = vst [vmem:[#allocation13_spill] sm:$0xff] %v8634_v1  ;;  %v284_v62 = vld [vmem:[#allocation5 + $0x120] sm:$0xff] }
  0xd6   : > { %6069 = vmatpush3.msra.mxu0 %v8446_v45  ;;  %6050 = vmatprep.subr.mxu1 %v11522_v61  ;;  %v11590_v61 = vld [vmem:[#allocation43_spill] sm:$0xff]  ;;  %v8594_v46 = vsub.f32 %v8502_v6, %v11083_v59  ;;  %11597 = vst [vmem:[#allocation12_spill] sm:$0xff] %v8606_v16  ;;  %v11092_v59 = vand.u32 4294901760, %v8550_v57  ;;  %v8623_v49 = vsub.f32 %v8539_v34, %v11090_v2  ;;  %11604 = vst [vmem:[#allocation16_spill] sm:$0xff] %v8663_v30 }
  0xd7   : > { %11589 = vst [vmem:[#allocation14_spill] sm:$0xff] %v8565_v18  ;;  %6070 = vmatprep.subr.mxu0 %v8457_v4  ;;  %1247 = vmatprep.mubr.f32.mxu0 %v11590_v61  ;;  %v8636_v2 = vld [vmem:[#allocation5 + $0x1a8] sm:$0xff]  ;;  %v8647_v38 = vsub.f32 %v287_v13, %v8603_v39  ;;  %v8661_v13 = vand.u32 4294901760, %v302_v3  ;;  %v11621_v4 = vand.u32 4294901760, %v8586_v9 }
  0xd8   : > { %6051 = vmatpush3.msra.mxu1 %v11524_v19  ;;  %6071 = vmatpush3.msra.mxu0 %v8459_v8  ;;  %v8600_v19 = vand.u32 4294901760, %v304_v60  ;;  %v11613_v8 = vand.u32 4294901760, %v8534_v14  ;;  %v299_v14 = vld [vmem:[#allocation5 + $0x198] sm:$0xff]  ;;  %v11623_v9 = vand.u32 4294901760, %v8594_v46 }
  0xd9   : > { %1249 = vmatmul.mubr.f32.gmra.mxu0 %v11594_v37  ;;  %6052 = vmatprep.subr.mxu1 %v11526_v23  ;;  %v8615_v23 = vsub.f32 %v8518_v25, %v11086_v33  ;;  %11601 = vst [vmem:[#allocation32_spill] sm:$0xff] %v8647_v38  ;;  %11603 = vst [vmem:[#allocation35_spill] sm:$0xff] %v8661_v13 }
  0xda   : > { %11595 = vst [vmem:[#allocation37_spill] sm:$0xff] %v8600_v19  ;;  %6072 = vmatprep.subr.mxu0 %v8473_v29  ;;  %6053 = vmatpush3.msra.mxu1 %v8099_v41  ;;  %v8625_v41 = vand.u32 4294901760, %v303_v44  ;;  %v8651_v33 = vsub.f32 %v304_v60, %v8600_v19  ;;  %v1688_v60 = vand.u32 4294901760, %v8623_v49  ;;  %v11610_v49 = vand.u32 4294901760, %v8589_v21 }
  0xdb   : > { %6073 = vmatpush3.msra.mxu0 %v8475_v42  ;;  %6054 = vmatprep.subr.mxu1 %v8113_v52  ;;  %v11605_v52 = vld [vmem:[#allocation46_spill] sm:$0xff]  ;;  %v8689_v29 = vand.u32 4294901760, %v284_v62 }
  0xdc   : > { %11598 = vst [vmem:[#allocation30_spill] sm:$0xff] %v8625_v41  ;;  %6074 = vmatprep.subr.mxu0 %v8494_v36  ;;  %1254 = vmatprep.mubr.f32.mxu0 %v11599_v63  ;;  %11602 = vst [vmem:[#allocation15_spill] sm:$0xff] %v8651_v33  ;;  %v283_v36 = vld [vmem:[#allocation5 + $0x118] sm:$0xff]  ;;  %v8687_v42 = vsub.f32 %v8589_v21, %v11610_v49  ;;  %v11617_v49 = vand.u32 4294901760, %v8570_v22  ;;  %v11622_v22 = vand.u32 4294901760, %v8647_v38 }
  0xdd   : > { %6055 = vmatpush3.msra.mxu1 %v8131_v24  ;;  %1365 = vmatprep.mubr.f32.mxu1 %v11583_v31  ;;  %v8659_v31 = vsub.f32 %v8550_v57, %v11092_v59  ;;  %v11607_v24 = vand.u32 4294901760, %v8565_v18  ;;  %11611 = vst [vmem:[#allocation42_spill] sm:$0xff] %v8689_v29 }
  0xde   : > { %6075 = vmatpush3.msra.mxu0 %v8486_v43  ;;  %1367 = vmatmul.mubr.f32.vlgmr.msra.gmra.mxu1 %v11585_v17  ;;  %v8671_v17 = vsub.f32 %v8579_v48, %v11606_v58  ;;  %v8679_v43 = vand.u32 4294901760, %v8636_v2  ;;  %v300_v58 = vld [vmem:[#allocation5 + $0x1a0] sm:$0xff] }
  0xdf   : > { %1256 = vmatmul.mubr.f32.gmra.mxu0 %v11605_v52  ;;  %6076 = vmatprep.subr.mxu0 %v8510_v53  ;;  %v8676_v59 = vsub.f32 %v8565_v18, %v11607_v24  ;;  %v8682_v53 = vand.u32 4294901760, %v285_v0  ;;  %v8692_v24 = vsub.f32 %v303_v44, %v8625_v41  ;;  %v8717_v21 = vand.u32 4294901760, %v300_v58 }
  0xe0   : > { %11608 = vst [vmem:[#allocation17_spill] sm:$0xff] %v8679_v43  ;;  %6112 = vmatprep.subr.mxu1 %v1667_v26  ;;  %6077 = vmatpush3.msra.mxu0 %v8512_v15  ;;  %v11614_v15 = vand.u32 4294901760, %v8606_v16  ;;  %v8720_v44 = vsub.f32 %v302_v3, %v8661_v13  ;;  %v222_v3 = vld [vmem:[%s7792_s6 + $0x18] sm:$0xff]  ;;  %v11619_v26 = vand.u32 4294901760, %v8634_v1 }
  0xe1   : > { %11609 = vst [vmem:[#allocation39_spill] sm:$0xff] %v8682_v53  ;;  %11612 = vst [vmem:[#allocation40_spill] sm:$0xff] %v8692_v24  ;;  %6113 = vmatpush3.msra.mxu1 %v11613_v8  ;;  %6078 = vmatprep.subr.mxu0 %v8536_v35  ;;  %v8708_v8 = vsub.f32 %v286_v7, %v8663_v30  ;;  %v8710_v35 = vand.u32 4294901760, %v283_v36  ;;  %v282_v7 = vld [vmem:[#allocation5 + $0x110] sm:$0xff] }
  0xe2   : > { %v8701_v18 = vsub.f32 %v8606_v16, %v11614_v15  ;;  %6114 = vmatprep.subr.mxu1 %v1674_v11  ;;  %1261 = vmatprep.mubr.f32.mxu0 %v8277_v56  ;;  %v8730_v15 = vsub.f32 %v284_v62, %v8689_v29  ;;  %v8747_v62 = vsub.f32 %v8634_v1, %v11619_v26  ;;  %v8749_v11 = vand.u32 4294901760, %v299_v14  ;;  %v221_v16 = vld [vmem:[%s7792_s6 + $0x10] sm:$0xff]  ;;  %v8765_v26 = vld [vmem:[#allocation5 + $0x188] sm:$0xff] }
  0xe3   : > { %11615 = vst [vmem:[#allocation41_spill] sm:$0xff] %v8708_v8  ;;  %11616 = vst [vmem:[#allocation31_spill] sm:$0xff] %v8710_v35  ;;  %1372 = vmatprep.mubr.f32.mxu1 %v11590_v61  ;;  %6079 = vmatpush3.msra.mxu0 %v8521_v12  ;;  %v8726_v61 = vsub.f32 %v285_v0, %v8682_v53  ;;  %v8733_v12 = vld [vmem:[#allocation5 + $0x190] sm:$0xff]  ;;  %v8769_v1 = vsub.f32 %v8636_v2, %v8679_v43  ;;  %v11625_v2 = vand.u32 4294901760, %v8692_v24 }
  0xe4   : > { %6115 = vmatpush3.msra.mxu1 %v11617_v49  ;;  %1263 = vmatmul.mubr.f32.gmra.mxu0 %v8287_v51  ;;  %v11618_v49 = vand.u32 4294901760, %v8651_v33  ;;  %11620 = vst [vmem:[#allocation43_spill] sm:$0xff] %v8749_v11 }
  0xe5   : > { %1374 = vmatmul.mubr.f32.gmra.mxu1 %v11594_v37  ;;  %6080 = vmatprep.subr.mxu0 %v8552_v27  ;;  %v8756_v37 = vsub.f32 %v283_v36, %v8710_v35  ;;  %v8763_v27 = vand.u32 4294901760, %v282_v7  ;;  %v8775_v36 = vand.u32 4294901760, %v8733_v12 }
  0xe6   : > { %v8742_v0 = vsub.f32 %v8651_v33, %v11618_v49  ;;  %6116 = vmatprep.subr.mxu1 %v11621_v4  ;;  %6081 = vmatpush3.msra.mxu0 %v8544_v28  ;;  %v8761_v49 = vsub.f32 %v8647_v38, %v11622_v22  ;;  %v281_v4 = vld [vmem:[#allocation5 + $0x108] sm:$0xff]  ;;  %v8779_v38 = vand.u32 4294901760, %v222_v3  ;;  %v8785_v33 = vsub.f32 %v8692_v24, %v11625_v2  ;;  %v229_v22 = vld [vmem:[%s7792_s6 + $0x50] sm:$0xff] }
  0xe7   : > { %6117 = vmatpush3.msra.mxu1 %v11623_v9  ;;  %6082 = vmatprep.subr.mxu0 %v8600_v19  ;;  %v8789_v9 = vsub.f32 %v300_v58, %v8717_v21  ;;  %v8791_v19 = vand.u32 4294901760, %v221_v16  ;;  %v1604_v28 = vand.u32 4294901760, %v8747_v62  ;;  %v8800_v2 = vand.u32 4294901760, %v8765_v26  ;;  %v228_v62 = vld [vmem:[%s7792_s6 + $0x48] sm:$0xff] }
  0xe8   : > { %11624 = vst [vmem:[#allocation44_spill] sm:$0xff] %v8779_v38  ;;  %6118 = vmatprep.subr.mxu1 %v1688_v60  ;;  %1379 = vmatprep.mubr.f32.mxu1 %v11599_v63  ;;  %v11627_v60 = vand.u32 4294901760, %v8615_v23  ;;  %v1716_v63 = vand.u32 4294901760, %v8742_v0  ;;  %v8802_v46 = vand.u32 4294901760, %v281_v4  ;;  %v8812_v0 = vsub.f32 %v299_v14, %v8749_v11  ;;  %v280_v23 = vld [vmem:[#allocation5 + $0x100] sm:$0xff] }
  0xe9   : > { %11626 = vst [vmem:[#allocation45_spill] sm:$0xff] %v8791_v19  ;;  %6083 = vmatpush3.msra.mxu0 %v8596_v10  ;;  %11628 = vst [vmem:[#allocation46_spill] sm:$0xff] %v8800_v2  ;;  %1381 = vmatmul.mubr.f32.gmra.mxu1 %v11605_v52  ;;  %v8808_v10 = vsub.f32 %v282_v7, %v8763_v27  ;;  %v11630_v24 = vand.u32 4294901760, %v8644_v32  ;;  %v11631_v52 = vand.u32 4294901760, %v8720_v44  ;;  %v11632_v7 = vand.u32 4294901760, %v8708_v8 }
  0xea   : > { %6119 = vmatpush3.msra.mxu1 %v11627_v60  ;;  %11629 = vst [vmem:[#allocation47_spill] sm:$0xff] %v8802_v46  ;;  %6084 = vmatprep.subr.mxu0 %v8625_v41  ;;  %v296_v60 = vld [vmem:[#allocation5 + $0x180] sm:$0xff]  ;;  %v8829_v14 = vsub.f32 %v222_v3, %v8779_v38  ;;  %v8831_v48 = vand.u32 4294901760, %v229_v22  ;;  %v11635_v32 = vand.u32 4294901760, %v8659_v31  ;;  %v11637_v3 = vand.u32 4294901760, %v8671_v17 }
  0xeb   : > { %6120 = vmatprep.subr.mxu1 %v11630_v24  ;;  %6085 = vmatpush3.msra.mxu0 %v8603_v39  ;;  %v8821_v41 = vsub.f32 %v8720_v44, %v11631_v52  ;;  %v8826_v58 = vsub.f32 %v8708_v8, %v11632_v7  ;;  %v1723_v24 = vand.u32 4294901760, %v8785_v33  ;;  %v11636_v52 = vand.u32 4294901760, %v8726_v61 }
  0xec   : > { %11633 = vst [vmem:[#allocation48_spill] sm:$0xff] %v8829_v14  ;;  %11634 = vst [vmem:[#allocation49_spill] sm:$0xff] %v8831_v48  ;;  %6121 = vmatpush3.msra.mxu1 %v11635_v32  ;;  %6086 = vmatprep.subr.mxu0 %v8661_v13  ;;  %v8844_v8 = vsub.f32 %v221_v16, %v8791_v19  ;;  %v8850_v31 = vsub.f32 %v281_v4, %v8802_v46  ;;  %v8852_v32 = vand.u32 4294901760, %v296_v60 }
  0xed   : > { %v8840_v39 = vsub.f32 %v8726_v61, %v11636_v52  ;;  %6122 = vmatprep.subr.mxu1 %v11637_v3  ;;  %1386 = vmatprep.mubr.f32.mxu1 %v8277_v56  ;;  %v8855_v13 = vand.u32 4294901760, %v228_v62  ;;  %v236_v52 = vld [vmem:[%s7792_s6 + $0x88] sm:$0xff]  ;;  %v11641_v16 = vand.u32 4294901760, %v8676_v59  ;;  %v11642_v17 = vand.u32 4294901760, %v8769_v1 }
  0xee   : > { %11638 = vst [vmem:[#allocation50_spill] sm:$0xff] %v8850_v31  ;;  %11639 = vst [vmem:[#allocation51_spill] sm:$0xff] %v8852_v32  ;;  %6087 = vmatpush3.msra.mxu0 %v8663_v30  ;;  %v8864_v56 = vand.u32 4294901760, %v280_v23  ;;  %v8869_v33 = vsub.f32 %v8733_v12, %v8775_v36  ;;  %1388 = vmatmul.mubr.f32.gmra.mxu1 %v8287_v51  ;;  %v1730_v59 = vand.u32 4294901760, %v8821_v41  ;;  %v11645_v30 = vand.u32 4294901760, %v8701_v18 }
  0xef   : > { %11640 = vst [vmem:[#allocation52_spill] sm:$0xff] %v8855_v13  ;;  %6123 = vmatpush3.msra.mxu1 %v11641_v16  ;;  %v1736_v3 = vsub.f32 %v8769_v1, %v11642_v17  ;;  %6088 = vmatprep.subr.mxu0 %v8679_v43  ;;  %v1618_v16 = vand.u32 4294901760, %v8826_v58  ;;  %v8877_v17 = vsub.f32 %v229_v22, %v8831_v48  ;;  %v1625_v12 = vand.u32 4294901760, %v8840_v39  ;;  %v235_v58 = vld [vmem:[%s7792_s6 + $0x80] sm:$0xff] }
  0xf0   : > { %11643 = vst [vmem:[#allocation53_spill] sm:$0xff] %v8864_v56  ;;  %11644 = vst [vmem:[#allocation54_spill] sm:$0xff] %v8869_v33  ;;  %6124 = vmatprep.subr.mxu1 %v11645_v30  ;;  %6089 = vmatpush3.msra.mxu0 %v8682_v53  ;;  %v11646_v51 = vand.u32 4294901760, %v8789_v9  ;;  %v8887_v43 = vand.u32 4294901760, %v236_v52  ;;  %v11648_v7 = vand.u32 4294901760, %v8687_v42  ;;  %v11649_v18 = vand.u32 4294901760, %v8730_v15 }
  0xf1   : > { %6090 = vmatprep.subr.mxu0 %v8717_v21  ;;  %v8898_v22 = vsub.f32 %v228_v62, %v8855_v13  ;;  %v1737_v42 = vand.u32 4294901760, %v1736_v3  ;;  %v11651_v41 = vand.u32 4294901760, %v8812_v0  ;;  %v11652_v62 = vand.u32 4294901760, %v8829_v14  ;;  %1775 = vmatprep.mubr.f32.mxu1 %v8779_v38  ;;  %v11695_v38 = vld [vmem:[#allocation17_spill] sm:$0xff] }
  0xf2   : > { %v1743_v4 = vsub.f32 %v8789_v9, %v11646_v51  ;;  %11647 = vst [vmem:[#allocation55_spill] sm:$0xff] %v8887_v43  ;;  %6125 = vmatpush3.msra.mxu1 %v11648_v7  ;;  %v1631_v30 = vsub.f32 %v8730_v15, %v11649_v18  ;;  %v8902_v51 = vsub.f32 %v8765_v26, %v8800_v2 }
  0xf3   : > { %6126 = vmatprep.subr.mxu1 %v1716_v63  ;;  %6091 = vmatpush3.msra.mxu0 %v8689_v29  ;;  %v8906_v7 = vsub.f32 %v280_v23, %v8864_v56  ;;  %v1750_v18 = vsub.f32 %v8812_v0, %v11651_v41  ;;  %v1492_v26 = vsub.f32 %v8829_v14, %v11652_v62  ;;  %v8920_v23 = vand.u32 4294901760, %v235_v58  ;;  %v243_v29 = vld [vmem:[%s7792_s6 + $0xc0] sm:$0xff] }
  0xf4   : > { %6127 = vmatpush3.msra.mxu1 %v1604_v28  ;;  %6092 = vmatprep.subr.mxu0 %v8749_v11  ;;  %v8918_v3 = vsub.f32 %v296_v60, %v8852_v32  ;;  %v1744_v41 = vand.u32 4294901760, %v1743_v4  ;;  %v11654_v28 = vand.u32 4294901760, %v8844_v8  ;;  %v8929_v62 = vsub.f32 %v236_v52, %v8887_v43 }
  0xf5   : > { %11650 = vst [vmem:[#allocation56_spill] sm:$0xff] %v8906_v7  ;;  %11653 = vst [vmem:[#allocation57_spill] sm:$0xff] %v8920_v23  ;;  %6128 = vmatprep.subr.mxu1 %v1723_v24  ;;  %6093 = vmatpush3.msra.mxu0 %v8710_v35  ;;  %v11655_v63 = vand.u32 4294901760, %v8761_v49  ;;  %v1632_v60 = vand.u32 4294901760, %v1631_v30  ;;  %v11656_v24 = vand.u32 4294901760, %v8756_v37  ;;  %v1751_v52 = vand.u32 4294901760, %v1750_v18 }
  0xf6   : > { %v1498_v39 = vsub.f32 %v8844_v8, %v11654_v28  ;;  %6094 = vmatprep.subr.mxu0 %v8775_v36  ;;  %v242_v28 = vld [vmem:[%s7792_s6 + $0xb8] sm:$0xff]  ;;  %v11657_v11 = vand.u32 4294901760, %v8869_v33  ;;  %v8945_v30 = vand.u32 4294901760, %v243_v29  ;;  %v11659_v4 = vand.u32 4294901760, %v8877_v17 }
  0xf7   : > { %6129 = vmatpush3.msra.mxu1 %v11655_v63  ;;  %v1638_v35 = vsub.f32 %v8756_v37, %v11656_v24  ;;  %6095 = vmatpush3.msra.mxu0 %v8763_v27  ;;  %v1493_v24 = vand.u32 4294901760, %v1492_v26  ;;  %v8953_v18 = vsub.f32 %v235_v58, %v8920_v23  ;;  %v11660_v63 = vand.u32 4294901760, %v8808_v10 }
  0xf8   : > { %6130 = vmatprep.subr.mxu1 %v1730_v59  ;;  %v1757_v49 = vsub.f32 %v8869_v33, %v11657_v11  ;;  %11658 = vst [vmem:[#allocation58_spill] sm:$0xff] %v8945_v30  ;;  %6096 = vmatprep.subr.mxu0 %v8800_v2  ;;  %v1507_v14 = vsub.f32 %v8877_v17, %v11659_v4  ;;  %v1499_v11 = vand.u32 4294901760, %v1498_v39  ;;  %v8960_v26 = vand.u32 4294901760, %v242_v28 }
  0xf9   : > { %6131 = vmatpush3.msra.mxu1 %v1618_v16  ;;  %6097 = vmatpush3.msra.mxu0 %v8802_v46  ;;  %v1645_v16 = vsub.f32 %v8808_v10, %v11660_v63  ;;  %v1639_v4 = vand.u32 4294901760, %v1638_v35  ;;  %v11662_v59 = vand.u32 4294901760, %v8898_v22  ;;  %v11664_v2 = vand.u32 4294901760, %v8850_v31 }
  0xfa   : > { %6132 = vmatprep.subr.mxu1 %v1737_v42  ;;  %11661 = vst [vmem:[#allocation59_spill] sm:$0xff] %v8960_v26  ;;  %6098 = vmatprep.subr.mxu0 %v8852_v32  ;;  %v11663_v42 = vand.u32 4294901760, %v8902_v51  ;;  %v1758_v63 = vand.u32 4294901760, %v1757_v49  ;;  %v8975_v35 = vsub.f32 %v243_v29, %v8945_v30  ;;  %v11665_v32 = vand.u32 4294901760, %v8918_v3 }
  0xfb   : > { %6133 = vmatpush3.msra.mxu1 %v1625_v12  ;;  %v1513_v58 = vsub.f32 %v8898_v22, %v11662_v59  ;;  %6099 = vmatpush3.msra.mxu0 %v8864_v56  ;;  %v1652_v12 = vsub.f32 %v8850_v31, %v11664_v2  ;;  %v1508_v59 = vand.u32 4294901760, %v1507_v14  ;;  %v11167_v46 = vand.u32 4294901760, %v8953_v18 }
  0xfc   : > { %v1764_v39 = vsub.f32 %v8902_v51, %v11663_v42  ;;  %6134 = vmatprep.subr.mxu1 %v1744_v41  ;;  %1494 = vmatprep.mubr.f32.mxu0 %v1493_v24  ;;  %v1771_v42 = vsub.f32 %v8918_v3, %v11665_v32  ;;  %v1646_v41 = vand.u32 4294901760, %v1645_v16  ;;  %v11666_v49 = vand.u32 4294901760, %v8929_v62 }
  0xfd   : > { %6135 = vmatpush3.msra.mxu1 %v1632_v60  ;;  %1500 = vmatmul.mubr.f32.vlgmr.msra.gmra.mxu0 %v1499_v11  ;;  %v8985_v2 = vsub.f32 %v242_v28, %v8960_v26  ;;  %v1514_v29 = vand.u32 4294901760, %v1513_v58  ;;  %v11667_v60 = vand.u32 4294901760, %v8906_v7  ;;  %v11166_v24 = vand.u32 4294901760, %v8975_v35 }
  0xfe   : > { %6136 = vmatprep.subr.mxu1 %v1751_v52  ;;  %v1522_v56 = vsub.f32 %v8929_v62, %v11666_v49  ;;  %6156 = vmatprep.subr.mxu0 %v8468_v5  ;;  %v1765_v14 = vand.u32 4294901760, %v1764_v39  ;;  %v1653_v52 = vand.u32 4294901760, %v1652_v12  ;;  %v1772_v28 = vand.u32 4294901760, %v1771_v42  ;;  %v11668_v42 = vld [vmem:[#allocation33_spill] sm:$0xff]  ;;  %v11670_v49 = vld [vmem:[#allocation14_spill] sm:$0xff] }
  0xff   : > { %6137 = vmatpush3.msra.mxu1 %v1639_v4  ;;  %v1659_v32 = vsub.f32 %v8906_v7, %v11667_v60  ;;  %6157 = vmatpush3.msra.mxu0 %v8465_v50  ;;  %v1528_v11 = vsub.f32 %v8953_v18, %v11167_v46  ;;  %v11165_v4 = vand.u32 4294901760, %v8985_v2  ;;  %v1537_v39 = vsub.f32 %v8975_v35, %v11166_v24  ;;  %v11673_v60 = vld [vmem:[#allocation19_spill] sm:$0xff]  ;;  %v11686_v24 = vld [vmem:[#allocation25_spill] sm:$0xff] }
 0x100   : > { %6138 = vmatprep.subr.mxu1 %v1758_v63  ;;  %6158 = vmatprep.subr.mxu0 %v8489_v20  ;;  %v1523_v16 = vand.u32 4294901760, %v1522_v56  ;;  %v11687_v46 = vld [vmem:[#allocation29_spill] sm:$0xff] }
 0x101   : > { %1509 = vmatprep.mubr.f32.mxu0 %v1508_v59  ;;  %6139 = vmatpush3.msra.mxu1 %v1646_v41  ;;  %v1660_v58 = vand.u32 4294901760, %v1659_v32  ;;  %v1529_v63 = vand.u32 4294901760, %v1528_v11  ;;  %v1543_v56 = vsub.f32 %v8985_v2, %v11165_v4  ;;  %v1538_v12 = vand.u32 4294901760, %v1537_v39  ;;  %v11669_v41 = vld [vmem:[#allocation38_spill] sm:$0xff]  ;;  %v11680_v39 = vld [vmem:[#allocation40_spill] sm:$0xff]  ;;  %v11685_v4 = vld [vmem:[#allocation41_spill] sm:$0xff] }
 0x102   : > { %6159 = vmatpush3.msra.mxu0 %v8484_v55  ;;  %6140 = vmatprep.subr.mxu1 %v1765_v14  ;;  %v11672_v14 = vld [vmem:[#allocation12_spill] sm:$0xff]  ;;  %v11674_v32 = vld [vmem:[#allocation34_spill] sm:$0xff] }
 0x103   : > { %1515 = vmatmul.mubr.f32.gmra.mxu0 %v1514_v29  ;;  %6160 = vmatprep.subr.mxu0 %v8505_v47  ;;  %v1544_v59 = vand.u32 4294901760, %v1543_v56  ;;  %v11671_v29 = vld [vmem:[#allocation18_spill] sm:$0xff]  ;;  %v11682_v56 = vld [vmem:[#allocation32_spill] sm:$0xff] }
 0x104   : > { %6141 = vmatpush3.msra.mxu1 %v1653_v52  ;;  %6161 = vmatpush3.msra.mxu0 %v8502_v6  ;;  %v11675_v52 = vld [vmem:[#allocation20_spill] sm:$0xff]  ;;  %v11677_v11 = vld [vmem:[#allocation22_spill] sm:$0xff] }
 0x105   : > { %6142 = vmatprep.subr.mxu1 %v1772_v28  ;;  %6162 = vmatprep.subr.mxu0 %v8539_v34  ;;  %v11676_v28 = vld [vmem:[#allocation15_spill] sm:$0xff] }
 0x106   : > { %1524 = vmatprep.mubr.f32.mxu0 %v1523_v16  ;;  %6143 = vmatpush3.msra.mxu1 %v1660_v58  ;;  %v11678_v16 = vld [vmem:[#allocation13_spill] sm:$0xff] }
 0x107   : > { %6163 = vmatpush3.msra.mxu0 %v8518_v25  ;;  %1777 = vmatmul.mubr.f32.vlgmr.msra.gmra.mxu1 %v8791_v19  ;;  %v11679_v58 = vld [vmem:[#allocation21_spill] sm:$0xff]  ;;  %v11694_v19 = vld [vmem:[#allocation16_spill] sm:$0xff] }
 0x108   : > { %1530 = vmatmul.mubr.f32.gmra.mxu0 %v1529_v63  ;;  %6164 = vmatprep.subr.mxu0 %v8555_v54  ;;  %v11681_v63 = vld [vmem:[#allocation23_spill] sm:$0xff] }
 0x109   : > { %6200 = vmatprep.subr.mxu1 %v8444_v40  ;;  %6165 = vmatpush3.msra.mxu0 %v8550_v57 }
 0x10a   : > { %6201 = vmatpush3.msra.mxu1 %v8446_v45  ;;  %6166 = vmatprep.subr.mxu0 %v11668_v42 }
 0x10b   : > { %6202 = vmatprep.subr.mxu1 %v11669_v41  ;;  %1539 = vmatprep.mubr.f32.mxu0 %v1538_v12  ;;  %v11683_v12 = vld [vmem:[#allocation24_spill] sm:$0xff] }
 0x10c   : > { %1782 = vmatprep.mubr.f32.mxu1 %v8831_v48  ;;  %6167 = vmatpush3.msra.mxu0 %v11670_v49  ;;  %v11693_v48 = vld [vmem:[#allocation35_spill] sm:$0xff] }
 0x10d   : > { %6203 = vmatpush3.msra.mxu1 %v11671_v29  ;;  %1545 = vmatmul.mubr.f32.gmra.mxu0 %v1544_v59  ;;  %v11684_v59 = vld [vmem:[#allocation26_spill] sm:$0xff] }
 0x10e   : > { %1784 = vmatmul.mubr.f32.gmra.mxu1 %v8855_v13  ;;  %6168 = vmatprep.subr.mxu0 %v11672_v14  ;;  %v11691_v13 = vld [vmem:[#allocation30_spill] sm:$0xff] }
 0x10f   : > { %6204 = vmatprep.subr.mxu1 %v11673_v60  ;;  %6169 = vmatpush3.msra.mxu0 %v11674_v32 }
 0x110   : > { %6205 = vmatpush3.msra.mxu1 %v11675_v52  ;;  %6170 = vmatprep.subr.mxu0 %v11676_v28 }
 0x111   : > { %6206 = vmatprep.subr.mxu1 %v11677_v11  ;;  %1789 = vmatprep.mubr.f32.mxu1 %v8887_v43  ;;  %v11689_v43 = vld [vmem:[#allocation37_spill] sm:$0xff] }
 0x112   : > { %6171 = vmatpush3.msra.mxu0 %v11678_v16  ;;  %6207 = vmatpush3.msra.mxu1 %v11679_v58 }
 0x113   : > { %1791 = vmatmul.mubr.f32.gmra.mxu1 %v8920_v23  ;;  %6172 = vmatprep.subr.mxu0 %v11680_v39  ;;  %v11688_v23 = vld [vmem:[#allocation28_spill] sm:$0xff] }
 0x114   : > { %6208 = vmatprep.subr.mxu1 %v11681_v63  ;;  %6173 = vmatpush3.msra.mxu0 %v11682_v56 }
 0x115   : > { %6209 = vmatpush3.msra.mxu1 %v11683_v12  ;;  %6174 = vmatprep.subr.mxu0 %v8720_v44 }
 0x116   : > { %6210 = vmatprep.subr.mxu1 %v11684_v59  ;;  %1796 = vmatprep.mubr.f32.mxu1 %v8945_v30  ;;  %v11690_v30 = vld [vmem:[#allocation36_spill] sm:$0xff] }
 0x117   : > { %6175 = vmatpush3.msra.mxu0 %v11685_v4  ;;  %6211 = vmatpush3.msra.mxu1 %v11686_v24 }
 0x118   : > { %1798 = vmatmul.mubr.f32.gmra.mxu1 %v8960_v26  ;;  %6176 = vmatprep.subr.mxu0 %v8769_v1  ;;  %v11692_v26 = vld [vmem:[#allocation27_spill] sm:$0xff] }
 0x119   : > { %6212 = vmatprep.subr.mxu1 %v11687_v46  ;;  %6177 = vmatpush3.msra.mxu0 %v8726_v61 }
 0x11a   : > { %6213 = vmatpush3.msra.mxu1 %v11688_v23  ;;  %6178 = vmatprep.subr.mxu0 %v8789_v9 }
 0x11b   : > { %6214 = vmatprep.subr.mxu1 %v11689_v43  ;;  %6179 = vmatpush3.msra.mxu0 %v8730_v15 }
 0x11c   : > { %6215 = vmatpush3.msra.mxu1 %v11690_v30  ;;  %6180 = vmatprep.subr.mxu0 %v8812_v0 }
 0x11d   : > { %6216 = vmatprep.subr.mxu1 %v11691_v13  ;;  %6181 = vmatpush3.msra.mxu0 %v8756_v37 }
 0x11e   : > { %6217 = vmatpush3.msra.mxu1 %v11692_v26  ;;  %6182 = vmatprep.subr.mxu0 %v8869_v33  ;;  %v11696_v33 = vld [vmem:[#allocation48_spill] sm:$0xff] }
 0x11f   : > { %6218 = vmatprep.subr.mxu1 %v11693_v48  ;;  %6183 = vmatpush3.msra.mxu0 %v8808_v10  ;;  %v11697_v48 = vld [vmem:[#allocation42_spill] sm:$0xff] }
 0x120   : > { %6219 = vmatpush3.msra.mxu1 %v11694_v19  ;;  %6184 = vmatprep.subr.mxu0 %v8902_v51  ;;  %v11698_v19 = vld [vmem:[#allocation43_spill] sm:$0xff] }
 0x121   : > { %6220 = vmatprep.subr.mxu1 %v11695_v38  ;;  %6185 = vmatpush3.msra.mxu0 %v8850_v31  ;;  %v11699_v38 = vand.u32 4294901760, %v8468_v5  ;;  %v11700_v31 = vld [vmem:[#allocation31_spill] sm:$0xff]  ;;  %v11704_v5 = vld [vmem:[#allocation46_spill] sm:$0xff] }
 0x122   : > { %6221 = vmatpush3.msra.mxu1 %v8682_v53  ;;  %6186 = vmatprep.subr.mxu0 %v8918_v3  ;;  %v11701_v53 = vand.u32 4294901760, %v8465_v50  ;;  %v11706_v50 = vld [vmem:[#allocation47_spill] sm:$0xff] }
 0x123   : > { %6222 = vmatprep.subr.mxu1 %v8717_v21  ;;  %6187 = vmatpush3.msra.mxu0 %v8906_v7  ;;  %v11702_v7 = vand.u32 4294901760, %v8489_v20  ;;  %v11708_v20 = vld [vmem:[#allocation51_spill] sm:$0xff] }
 0x124   : > { %1933 = vmatprep.mubr.f32.mxu0 %v11696_v33  ;;  %6223 = vmatpush3.msra.mxu1 %v11697_v48  ;;  %v11703_v48 = vand.u32 4294901760, %v8484_v55  ;;  %v11710_v55 = vld [vmem:[#allocation53_spill] sm:$0xff] }
 0x125   : > { %1936 = vmatmul.mubr.f32.vlgmr.msra.gmra.mxu0 %v8844_v8  ;;  %6224 = vmatprep.subr.mxu1 %v11698_v19 }
 0x126   : > { %6244 = vmatprep.subr.mxu0 %v11699_v38  ;;  %6225 = vmatpush3.msra.mxu1 %v11700_v31  ;;  %v11705_v38 = vand.u32 4294901760, %v8505_v47  ;;  %v11712_v47 = vand.u32 4294901760, %v8518_v25  ;;  %v11717_v25 = vand.u32 4294901760, %v8877_v17 }
 0x127   : > { %6245 = vmatpush3.msra.mxu0 %v11701_v53  ;;  %6226 = vmatprep.subr.mxu1 %v8775_v36  ;;  %v11707_v53 = vand.u32 4294901760, %v8502_v6  ;;  %v11714_v6 = vand.u32 4294901760, %v8555_v54  ;;  %v11718_v54 = vand.u32 4294901760, %v11670_v49  ;;  %v342_v49 = vld [vmem:[#allocation5 + $0x2f0] sm:$0xff] }
 0x128   : > { %6246 = vmatprep.subr.mxu0 %v11702_v7  ;;  %1942 = vmatprep.mubr.f32.mxu0 %v8877_v17  ;;  %v11709_v7 = vand.u32 4294901760, %v8539_v34  ;;  %v11715_v34 = vand.u32 4294901760, %v8550_v57  ;;  %v343_v57 = vld [vmem:[#allocation5 + $0x2f8] sm:$0xff]  ;;  %v11722_v17 = vand.u32 4294901760, %v11676_v28  ;;  %v341_v28 = vld [vmem:[#allocation5 + $0x2e8] sm:$0xff] }
 0x129   : > { %6227 = vmatpush3.msra.mxu1 %v8763_v27  ;;  %6247 = vmatpush3.msra.mxu0 %v11703_v48  ;;  %v11711_v48 = vand.u32 4294901760, %v11696_v33  ;;  %v11716_v33 = vand.u32 4294901760, %v11668_v42  ;;  %v327_v42 = vld [vmem:[#allocation5 + $0x278] sm:$0xff] }
 0x12a   : > { %1945 = vmatmul.mubr.f32.gmra.mxu0 %v8898_v22  ;;  %6228 = vmatprep.subr.mxu1 %v11704_v5 }
 0x12b   : > { %6248 = vmatprep.subr.mxu0 %v11705_v38  ;;  %6229 = vmatpush3.msra.mxu1 %v11706_v50  ;;  %v11713_v38 = vand.u32 4294901760, %v8844_v8  ;;  %v11721_v8 = vand.u32 4294901760, %v11674_v32  ;;  %v11727_v32 = vand.u32 4294901760, %v11680_v39  ;;  %v11733_v39 = vand.u32 4294901760, %v8975_v35 }
 0x12c   : > { %6249 = vmatpush3.msra.mxu0 %v11707_v53  ;;  %6230 = vmatprep.subr.mxu1 %v11708_v20  ;;  %v11188_v53 = vlaneseq }
 0x12d   : > { %6250 = vmatprep.subr.mxu0 %v11709_v7  ;;  %1951 = vmatprep.mubr.f32.mxu0 %v8929_v62  ;;  %v11736_v7 = vand.u32 4294901760, %v8985_v2 }
 0x12e   : > { %6231 = vmatpush3.msra.mxu1 %v11710_v55  ;;  %2067 = vmatprep.mubr.f32.mxu1 %v11711_v48 }
 0x12f   : > { %6251 = vmatpush3.msra.mxu0 %v11712_v47  ;;  %2071 = vmatmul.mubr.f32.vlgmr.msra.gmra.mxu1 %v11713_v38 }
 0x130   : > { %1954 = vmatmul.mubr.f32.gmra.mxu0 %v8953_v18  ;;  %6252 = vmatprep.subr.mxu0 %v11714_v6  ;;  %v324_v6 = vld [vmem:[#allocation5 + $0x260] sm:$0xff] }
 0x131   : > { %6288 = vmatprep.subr.mxu1 %v8444_v40  ;;  %6253 = vmatpush3.msra.mxu0 %v11715_v34  ;;  %v11719_v40 = vand.u32 4294901760, %v8898_v22  ;;  %v11723_v22 = vand.u32 4294901760, %v8929_v62  ;;  %v11729_v62 = vand.u32 4294901760, %v11682_v56  ;;  %v11735_v56 = vand.u32 4294901760, %v11685_v4 }
 0x132   : > { %6289 = vmatpush3.msra.mxu1 %v8446_v45  ;;  %6254 = vmatprep.subr.mxu0 %v11716_v33  ;;  %v11720_v45 = vand.u32 4294901760, %v11672_v14  ;;  %v326_v14 = vld [vmem:[#allocation5 + $0x270] sm:$0xff]  ;;  %v11738_v4 = vand.u32 4294901760, %v8726_v61  ;;  %v11741_v61 = vand.u32 4294901760, %v8730_v15  ;;  %v339_v15 = vld [vmem:[#allocation5 + $0x2d8] sm:$0xff] }
 0x133   : > { %6290 = vmatprep.subr.mxu1 %v11669_v41  ;;  %1960 = vmatprep.mubr.f32.mxu0 %v8975_v35  ;;  %v9128_v41 = vand.u32 4294901760, %v343_v57  ;;  %v340_v35 = vld [vmem:[#allocation5 + $0x2e0] sm:$0xff] }
 0x134   : > { %2078 = vmatprep.mubr.f32.mxu1 %v11717_v25  ;;  %6255 = vmatpush3.msra.mxu0 %v11718_v54  ;;  %v323_v54 = vld [vmem:[#allocation5 + $0x258] sm:$0xff] }
 0x135   : > { %6291 = vmatpush3.msra.mxu1 %v11671_v29  ;;  %1963 = vmatmul.mubr.f32.gmra.mxu0 %v8985_v2  ;;  %11724 = vst [vmem:[#allocation33_spill] sm:$0xff] %v9128_v41  ;;  %v11725_v29 = vand.u32 4294901760, %v11678_v16  ;;  %v11731_v16 = vand.u32 4294901760, %v8720_v44  ;;  %v11739_v2 = vand.u32 4294901760, %v8789_v9  ;;  %v11744_v9 = vand.u32 4294901760, %v8812_v0  ;;  %v11746_v0 = vld [vmem:[#allocation54_spill] sm:$0xff] }
 0x136   : > { %2082 = vmatmul.mubr.f32.gmra.mxu1 %v11719_v40  ;;  %6256 = vmatprep.subr.mxu0 %v11720_v45 }
 0x137   : > { %6292 = vmatprep.subr.mxu1 %v11673_v60  ;;  %6257 = vmatpush3.msra.mxu0 %v11721_v8  ;;  %v11726_v60 = vand.u32 4294901760, %v8953_v18  ;;  %v9147_v18 = vand.u32 4294901760, %v326_v14 }
 0x138   : > { %6293 = vmatpush3.msra.mxu1 %v11675_v52  ;;  %6258 = vmatprep.subr.mxu0 %v11722_v17  ;;  %v9137_v52 = vand.u32 4294901760, %v327_v42  ;;  %v11749_v17 = vld [vmem:[#allocation35_spill] sm:$0xff] }
 0x139   : > { %6294 = vmatprep.subr.mxu1 %v11677_v11  ;;  %2089 = vmatprep.mubr.f32.mxu1 %v11723_v22  ;;  %v9142_v11 = vand.u32 4294901760, %v342_v49  ;;  %11732 = vst [vmem:[#allocation18_spill] sm:$0xff] %v9147_v18  ;;  %v338_v22 = vld [vmem:[#allocation5 + $0x2d0] sm:$0xff] }
 0x13a   : > { %6259 = vmatpush3.msra.mxu0 %v11725_v29  ;;  %6295 = vmatpush3.msra.mxu1 %v11679_v58  ;;  %11728 = vst [vmem:[#allocation38_spill] sm:$0xff] %v9137_v52  ;;  %v9150_v58 = vsub.f32 %v343_v57, %v9128_v41  ;;  %v9161_v44 = vsub.f32 %v327_v42, %v9137_v52  ;;  %v11750_v42 = vand.u32 4294901760, %v8808_v10  ;;  %v9233_v10 = vand.u32 4294901760, %v323_v54 }
 0x13b   : > { %2093 = vmatmul.mubr.f32.gmra.mxu1 %v11726_v60  ;;  %6260 = vmatprep.subr.mxu0 %v11727_v32  ;;  %11730 = vst [vmem:[#allocation14_spill] sm:$0xff] %v9142_v11  ;;  %v9168_v48 = vsub.f32 %v342_v49, %v9142_v11  ;;  %v11753_v60 = vand.u32 4294901760, %v8902_v51  ;;  %v9231_v32 = vand.u32 4294901760, %v339_v15 }
 0x13c   : > { %6296 = vmatprep.subr.mxu1 %v11681_v63  ;;  %6261 = vmatpush3.msra.mxu0 %v11729_v62  ;;  %v9155_v63 = vand.u32 4294901760, %v341_v28  ;;  %v11193_v47 = vand.u32 4294901760, %v9150_v58  ;;  %v11192_v34 = vand.u32 4294901760, %v9161_v44  ;;  %11755 = vst [vmem:[#allocation21_spill] sm:$0xff] %v9233_v10  ;;  %v337_v62 = vld [vmem:[#allocation5 + $0x2c8] sm:$0xff] }
 0x13d   : > { %6297 = vmatpush3.msra.mxu1 %v11683_v12  ;;  %6262 = vmatprep.subr.mxu0 %v11731_v16  ;;  %v325_v12 = vld [vmem:[#allocation5 + $0x268] sm:$0xff]  ;;  %v11191_v33 = vand.u32 4294901760, %v9168_v48  ;;  %11754 = vst [vmem:[#allocation13_spill] sm:$0xff] %v9231_v32  ;;  %v247_v16 = vld [vmem:[#allocation7] sm:$0x7] }
 0x13e   : > { %6298 = vmatprep.subr.mxu1 %v11684_v59  ;;  %2100 = vmatprep.mubr.f32.mxu1 %v11733_v39  ;;  %11734 = vst [vmem:[#allocation12_spill] sm:$0xff] %v9155_v63  ;;  %v11737_v59 = vand.u32 4294901760, %v8769_v1  ;;  %v9180_v1 = vand.u32 4294901760, %v325_v12  ;;  %v9183_v38 = vsub.f32 %v341_v28, %v9155_v63  ;;  %v9204_v25 = vsub.f32 %v9150_v58, %v11193_v47 }
 0x13f   : > { %6263 = vmatpush3.msra.mxu0 %v11735_v56  ;;  %6299 = vmatpush3.msra.mxu1 %v11686_v24  ;;  %v9174_v24 = vsub.f32 %v326_v14, %v9147_v18  ;;  %v11752_v14 = vld [vmem:[#allocation16_spill] sm:$0xff]  ;;  %v9238_v28 = vsub.f32 %v9168_v48, %v11191_v33  ;;  %v11756_v56 = vld [vmem:[#allocation17_spill] sm:$0xff] }
 0x140   : > { %2104 = vmatmul.mubr.f32.gmra.mxu1 %v11736_v7  ;;  %6264 = vmatprep.subr.mxu0 %v11737_v59  ;;  %11740 = vst [vmem:[#allocation19_spill] sm:$0xff] %v9180_v1  ;;  %v9211_v45 = vsub.f32 %v325_v12, %v9180_v1  ;;  %v11189_v57 = vand.u32 4294901760, %v9183_v38  ;;  %v11757_v12 = vld [vmem:[#allocation50_spill] sm:$0xff]  ;;  %v318_v33 = vld [vmem:[#allocation5 + $0x230] sm:$0xff] }
 0x141   : > { %6300 = vmatprep.subr.mxu1 %v11687_v46  ;;  %6265 = vmatpush3.msra.mxu0 %v11738_v4  ;;  %v9188_v46 = vand.u32 4294901760, %v340_v35  ;;  %v11190_v40 = vand.u32 4294901760, %v9174_v24  ;;  %v11758_v7 = vand.u32 4294901760, %v11757_v12  ;;  %v321_v4 = vld [vmem:[#allocation5 + $0x248] sm:$0xff]  ;;  %v11767_v12 = vld [vmem:[#allocation44_spill] sm:$0xff] }
 0x142   : > { %6301 = vmatpush3.msra.mxu1 %v11688_v23  ;;  %6266 = vmatprep.subr.mxu0 %v11739_v2  ;;  %v9192_v23 = vshrl.u32 %v11188_v53, 7  ;;  %v11772_v53 = vld [vmem:[#allocation45_spill] sm:$0xff] }
 0x143   : > { %6302 = vmatprep.subr.mxu1 %v11689_v43  ;;  %6267 = vmatpush3.msra.mxu0 %v11741_v61  ;;  %11742 = vst [vmem:[#allocation34_spill] sm:$0xff] %v9188_v46  ;;  %v11745_v43 = vand.u32 4294901760, %v8756_v37  ;;  %v322_v37 = vld [vmem:[#allocation5 + $0x250] sm:$0xff]  ;;  %v9225_v49 = vsub.f32 %v340_v35, %v9188_v46  ;;  %v9249_v35 = vsub.f32 %v9174_v24, %v11190_v40 }
 0x144   : > { %11743 = vst [vmem:[#allocation20_spill] sm:$0xff] %v9192_v23  ;;  %6303 = vmatpush3.msra.mxu1 %v11690_v30  ;;  %6268 = vmatprep.subr.mxu0 %v11744_v9  ;;  %v11747_v30 = vand.u32 4294901760, %v11746_v0  ;;  %v348_v29 = vsub.s32 0, %v9192_v23  ;;  %v9244_v59 = vand.u32 4294901760, %v322_v37  ;;  %v11760_v61 = vld [vmem:[#allocation39_spill] sm:$0xff]  ;;  %v11761_v9 = vand.u32 4294901760, %v8918_v3 }
 0x145   : > { %6304 = vmatprep.subr.mxu1 %v11691_v13  ;;  %6269 = vmatpush3.msra.mxu0 %v11745_v43  ;;  %v9213_v13 = vand.u32 4294901760, %v324_v6  ;;  %v5836_v8 = vpop.f32.mrf.mxu0  ;;  %11751 = vst [vmem:[#allocation22_spill] sm:$0xff] %v9225_v49  ;;  %v9257_v0 = vand.u32 4294901760, %v338_v22  ;;  %v11785_v23 = vld [vmem:[#allocation52_spill] sm:$0xff] }
 0x146   : > { %6305 = vmatpush3.msra.mxu1 %v11692_v26  ;;  %6270 = vmatprep.subr.mxu0 %v11747_v30  ;;  %v9222_v26 = vsub.f32 %v9161_v44, %v11192_v34  ;;  %11759 = vst [vmem:[#allocation40_spill] sm:$0xff] %v9244_v59  ;;  %v9262_v30 = vsub.f32 %v9183_v38, %v11189_v57  ;;  %v319_v57 = vld [vmem:[#allocation5 + $0x238] sm:$0xff] }
 0x147   : > { %11748 = vst [vmem:[#allocation15_spill] sm:$0xff] %v9213_v13  ;;  %6306 = vmatprep.subr.mxu1 %v11749_v17  ;;  %6271 = vmatpush3.msra.mxu0 %v11750_v42  ;;  %v5837_v39 = vpop.f32.mrf.mxu0  ;;  %v9255_v43 = vsub.f32 %v324_v6, %v9213_v13  ;;  %11763 = vst [vmem:[#allocation32_spill] sm:$0xff] %v9257_v0  ;;  %v11194_v17 = vand.u32 4294901760, %v9211_v45  ;;  %v336_v42 = vld [vmem:[#allocation5 + $0x2c0] sm:$0xff]  ;;  %v9269_v6 = vand.u32 4294901760, %v337_v62  ;;  %v9326_v3 = vand.u32 4294901760, %v319_v57 }
 0x148   : > { %6307 = vmatpush3.msra.mxu1 %v11752_v14  ;;  %6272 = vmatprep.subr.mxu0 %v11753_v60  ;;  %v5838_v2 = vadd.f32 %v5837_v39, %v5836_v8  ;;  %v320_v14 = vld [vmem:[#allocation5 + $0x240] sm:$0xff]  ;;  %v11764_v8 = vld [vmem:[#allocation56_spill] sm:$0xff]  ;;  %v11195_v39 = vand.u32 4294901760, %v9225_v49  ;;  %v9305_v40 = vsub.f32 %v338_v22, %v9257_v0 }
 0x149   : > { %6308 = vmatprep.subr.mxu1 %v11756_v56  ;;  %6273 = vmatpush3.msra.mxu0 %v11758_v7  ;;  %11762 = vst [vmem:[#allocation23_spill] sm:$0xff] %v9255_v43  ;;  %v11765_v60 = vand.u32 4294901760, %v11764_v8  ;;  %11766 = vst [vmem:[#allocation24_spill] sm:$0xff] %v9269_v6  ;;  %v9272_v56 = vrot.slane %v247_v16, %v348_v29  ;;  %v11768_v7 = vld [vmem:[#allocation42_spill] sm:$0xff]  ;;  %v335_v8 = vld [vmem:[#allocation5 + $0x2b8] sm:$0xff]  ;;  %v9288_v29 = vsub.f32 %v322_v37, %v9244_v59 }
 0x14a   : > { %6309 = vmatpush3.msra.mxu1 %v11760_v61  ;;  %6274 = vmatprep.subr.mxu0 %v11761_v9  ;;  %v9277_v61 = vsub.f32 %v323_v54, %v9233_v10  ;;  %v9280_v9 = vand.u32 4294901760, %v321_v4  ;;  %v9293_v54 = vand.u32 4294901760, %v320_v14  ;;  %11776 = vst [vmem:[#allocation36_spill] sm:$0xff] %v9305_v40  ;;  %v9314_v47 = vand.u32 4294901760, %v335_v8  ;;  %v11779_v16 = vld [vmem:[#allocation49_spill] sm:$0xff]  ;;  %11781 = vst [vmem:[#allocation43_spill] sm:$0xff] %v9326_v3 }
 0x14b   : > { %6310 = vmatprep.subr.mxu1 %v8717_v21  ;;  %6275 = vmatpush3.msra.mxu0 %v11765_v60  ;;  %v9283_v60 = vsub.f32 %v339_v15, %v9231_v32  ;;  %11773 = vst [vmem:[#allocation29_spill] sm:$0xff] %v9288_v29  ;;  %v9317_v15 = vsub.f32 %v337_v62, %v9269_v6 }
 0x14c   : > { %2270 = vmatprep.mubr.f32.mxu0 %v11767_v12  ;;  %6311 = vmatpush3.msra.mxu1 %v11768_v7  ;;  %11769 = vst [vmem:[#allocation26_spill] sm:$0xff] %v9277_v61  ;;  %11770 = vst [vmem:[#allocation41_spill] sm:$0xff] %v9280_v9  ;;  %v9291_v7 = vand.u32 4294901760, %v336_v42  ;;  %v472_v22 = vadd.f32 %v5838_v2, %v9272_v56  ;;  %v9323_v21 = vsub.f32 %v321_v4, %v9280_v9 }
 0x14d   : > { %11771 = vst [vmem:[#allocation25_spill] sm:$0xff] %v9283_v60  ;;  %2272 = vmatmul.mubr.f32.vlgmr.msra.gmra.mxu0 %v11772_v53  ;;  %6312 = vmatprep.subr.mxu1 %v11698_v19  ;;  %11775 = vst [vmem:[#allocation37_spill] sm:$0xff] %v9293_v54  ;;  %v9301_v19 = vsub.f32 %v9211_v45, %v11194_v17  ;;  %v5880_v34 = vpop.f32.mrf.mxu1  ;;  %v334_v17 = vld [vmem:[#allocation5 + $0x2b0] sm:$0xff]  ;;  %v9332_v62 = vsub.f32 %v320_v14, %v9293_v54  ;;  %v9334_v2 = vand.u32 4294901760, %v318_v33  ;;  %v333_v14 = vld [vmem:[#allocation5 + $0x2a8] sm:$0xff] }
 0x14e   : > { %11774 = vst [vmem:[#allocation28_spill] sm:$0xff] %v9291_v7  ;;  %6332 = vmatprep.subr.mxu0 %v9128_v41  ;;  %6313 = vmatpush3.msra.mxu1 %v11700_v31  ;;  %v9312_v31 = vsub.f32 %v9225_v49, %v11195_v39  ;;  %11777 = vst [vmem:[#allocation30_spill] sm:$0xff] %v9314_v47  ;;  %v9337_v37 = vsub.f32 %v336_v42, %v9291_v7  ;;  %v11787_v42 = vand.u32 4294901760, %v9255_v43 }
 0x14f   : > { %6333 = vmatpush3.msra.mxu0 %v9137_v52  ;;  %6314 = vmatprep.subr.mxu1 %v8775_v36  ;;  %11778 = vst [vmem:[#allocation27_spill] sm:$0xff] %v9317_v15  ;;  %11780 = vst [vmem:[#allocation48_spill] sm:$0xff] %v9323_v21  ;;  %v5881_v51 = vpop.f32.mrf.mxu1  ;;  %v9342_v36 = vand.u32 4294901760, %v334_v17  ;;  %v9355_v39 = vsub.f32 %v335_v8, %v9314_v47 }
 0x150   : > { %6334 = vmatprep.subr.mxu0 %v9142_v11  ;;  %2277 = vmatprep.mubr.f32.mxu0 %v11779_v16  ;;  %11782 = vst [vmem:[#allocation31_spill] sm:$0xff] %v9332_v62  ;;  %11783 = vst [vmem:[#allocation46_spill] sm:$0xff] %v9334_v2  ;;  %v5882_v4 = vadd.f32 %v5881_v51, %v5880_v34  ;;  %v9351_v34 = vsub.f32 %v9255_v43, %v11787_v42  ;;  %v317_v51 = vld [vmem:[#allocation5 + $0x228] sm:$0xff] }
 0x151   : > { %6315 = vmatpush3.msra.mxu1 %v8763_v27  ;;  %6335 = vmatpush3.msra.mxu0 %v9147_v18  ;;  %11784 = vst [vmem:[#allocation47_spill] sm:$0xff] %v9337_v37  ;;  %11786 = vst [vmem:[#allocation51_spill] sm:$0xff] %v9342_v36  ;;  %v11789_v18 = vand.u32 4294901760, %v9283_v60  ;;  %v9367_v42 = vsub.f32 %v319_v57, %v9326_v3 }
 0x152   : > { %2279 = vmatmul.mubr.f32.gmra.mxu0 %v11785_v23  ;;  %6316 = vmatprep.subr.mxu1 %v11704_v5  ;;  %11788 = vst [vmem:[#allocation53_spill] sm:$0xff] %v9355_v39  ;;  %v9357_v11 = vadd.f32 %v5882_v4, %v472_v22  ;;  %v11791_v5 = vand.u32 4294901760, %v9277_v61  ;;  %v11792_v22 = vld [vmem:[#allocation55_spill] sm:$0xff]  ;;  %v9380_v4 = vand.u32 4294901760, %v333_v14 }
 0x153   : > { %6336 = vmatprep.subr.mxu0 %v9155_v63  ;;  %6317 = vmatpush3.msra.mxu1 %v11706_v50  ;;  %v9364_v50 = vsub.f32 %v9283_v60, %v11789_v18  ;;  %11790 = vst [vmem:[#allocation54_spill] sm:$0xff] %v9367_v42  ;;  %v9399_v18 = vsub.f32 %v334_v17, %v9342_v36  ;;  %v11800_v63 = vld [vmem:[#allocation57_spill] sm:$0xff]  ;;  %v11823_v60 = vand.u32 4294901760, %v9301_v19 }
 0x154   : > { %6337 = vmatpush3.msra.mxu0 %v9180_v1  ;;  %6318 = vmatprep.subr.mxu1 %v11708_v20  ;;  %v9372_v27 = vsub.f32 %v9277_v61, %v11791_v5  ;;  %v9378_v20 = vsub.f32 %v318_v33, %v9334_v2  ;;  %11794 = vst [vmem:[#allocation16_spill] sm:$0xff] %v9380_v4  ;;  %v11795_v5 = vand.u32 4294901760, %v9305_v40  ;;  %v9396_v1 = vand.u32 4294901760, %v317_v51 }
 0x155   : > { %6338 = vmatprep.subr.mxu0 %v9188_v46  ;;  %2284 = vmatprep.mubr.f32.mxu0 %v11792_v22  ;;  %v11796_v46 = vand.u32 4294901760, %v9288_v29  ;;  %11798 = vst [vmem:[#allocation50_spill] sm:$0xff] %v9399_v18 }
 0x156   : > { %11793 = vst [vmem:[#allocation35_spill] sm:$0xff] %v9378_v20  ;;  %6319 = vmatpush3.msra.mxu1 %v11710_v55  ;;  %2395 = vmatprep.mubr.f32.mxu1 %v11767_v12  ;;  %v9389_v8 = vsub.f32 %v9305_v40, %v11795_v5  ;;  %11797 = vst [vmem:[#allocation17_spill] sm:$0xff] %v9396_v1  ;;  %v11799_v5 = vand.u32 4294901760, %v9317_v15  ;;  %v11801_v55 = vand.u32 4294901760, %v9323_v21  ;;  %v314_v40 = vld [vmem:[#allocation5 + $0x210] sm:$0xff]  ;;  %v11818_v61 = vand.u32 4294901760, %v9378_v20 }
 0x157   : > { %v9394_v33 = vsub.f32 %v9288_v29, %v11796_v46  ;;  %6339 = vmatpush3.msra.mxu0 %v9213_v13  ;;  %2397 = vmatmul.mubr.f32.vlgmr.msra.gmra.mxu1 %v11772_v53  ;;  %v332_v13 = vld [vmem:[#allocation5 + $0x2a0] sm:$0xff]  ;;  %v11802_v46 = vand.u32 4294901760, %v9204_v25  ;;  %v11804_v53 = vand.u32 4294901760, %v9332_v62  ;;  %v224_v25 = vld [vmem:[%s7792_s6 + $0x28] sm:$0xff]  ;;  %v9504_v43 = vand.u32 4294901760, %v314_v40 }
 0x158   : > { %v9408_v57 = vsub.f32 %v9317_v15, %v11799_v5  ;;  %2286 = vmatmul.mubr.f32.gmra.mxu0 %v11800_v63  ;;  %6340 = vmatprep.subr.mxu0 %v9231_v32  ;;  %v9418_v12 = vsub.f32 %v9323_v21, %v11801_v55  ;;  %v316_v29 = vld [vmem:[#allocation5 + $0x220] sm:$0xff]  ;;  %v11803_v32 = vand.u32 4294901760, %v9337_v37  ;;  %v315_v55 = vld [vmem:[#allocation5 + $0x218] sm:$0xff]  ;;  %v9436_v5 = vsub.f32 %v333_v14, %v9380_v4 }
 0x159   : > { %6376 = vmatprep.subr.mxu1 %v11802_v46  ;;  %6341 = vmatpush3.msra.mxu0 %v9233_v10  ;;  %v9432_v15 = vsub.f32 %v9332_v62, %v11804_v53  ;;  %v11806_v46 = vand.u32 4294901760, %v9222_v26  ;;  %v11808_v21 = vand.u32 4294901760, %v9238_v28  ;;  %v11809_v14 = vld [vmem:[#allocation58_spill] sm:$0xff]  ;;  %v9452_v26 = vand.u32 4294901760, %v332_v13 }
 0x15a   : > { %v9427_v17 = vsub.f32 %v9337_v37, %v11803_v32  ;;  %11805 = vst [vmem:[#allocation39_spill] sm:$0xff] %v9436_v5  ;;  %6342 = vmatprep.subr.mxu0 %v9257_v0  ;;  %v9445_v37 = vsub.f32 %v317_v51, %v9396_v1  ;;  %2291 = vmatprep.mubr.f32.mxu0 %v11809_v14  ;;  %v331_v0 = vld [vmem:[#allocation5 + $0x298] sm:$0xff]  ;;  %v11812_v32 = vand.u32 4294901760, %v9355_v39  ;;  %v5839_v51 = vpop.f32.mrf.mxu0  ;;  %v11814_v62 = vand.u32 4294901760, %v9367_v42  ;;  %v9493_v28 = vld [vmem:[#allocation5 + $0x288] sm:$0xff] }
 0x15b   : > { %6377 = vmatpush3.msra.mxu1 %v11806_v46  ;;  %11810 = vst [vmem:[#allocation44_spill] sm:$0xff] %v9452_v26  ;;  %v9454_v46 = vand.u32 4294901760, %v316_v29  ;;  %2402 = vmatprep.mubr.f32.mxu1 %v11779_v16  ;;  %v9471_v52 = vand.u32 4294901760, %v224_v25  ;;  %v9481_v41 = vsub.f32 %v9378_v20, %v11818_v61  ;;  %v223_v61 = vld [vmem:[%s7792_s6 + $0x20] sm:$0xff]  ;;  %v9526_v19 = vand.u32 4294901760, %v9493_v28 }
 0x15c   : > { %11807 = vst [vmem:[#allocation56_spill] sm:$0xff] %v9445_v37  ;;  %6378 = vmatprep.subr.mxu1 %v11808_v21  ;;  %v9459_v10 = vsub.f32 %v9355_v39, %v11812_v32  ;;  %6343 = vmatpush3.msra.mxu0 %v9244_v59  ;;  %v9464_v21 = vand.u32 4294901760, %v315_v55  ;;  %v9469_v53 = vsub.f32 %v9367_v42, %v11814_v62  ;;  %v11816_v32 = vand.u32 4294901760, %v9249_v35  ;;  %v11817_v39 = vld [vmem:[#allocation59_spill] sm:$0xff]  ;;  %v5840_v42 = vpop.f32.mrf.mxu0 }
 0x15d   : > { %11811 = vst [vmem:[#allocation42_spill] sm:$0xff] %v9454_v46  ;;  %11815 = vst [vmem:[#allocation49_spill] sm:$0xff] %v9471_v52  ;;  %2293 = vmatmul.mubr.f32.gmra.mxu0 %v11817_v39  ;;  %v330_v59 = vld [vmem:[#allocation5 + $0x290] sm:$0xff]  ;;  %2404 = vmatmul.mubr.f32.gmra.mxu1 %v11785_v23  ;;  %v9486_v35 = vand.u32 4294901760, %v331_v0  ;;  %v5841_v20 = vadd.f32 %v5840_v42, %v5839_v51  ;;  %v11821_v62 = vand.u32 4294901760, %v9262_v30 }
 0x15e   : > { %11813 = vst [vmem:[#allocation45_spill] sm:$0xff] %v9464_v21  ;;  %6379 = vmatpush3.msra.mxu1 %v11816_v32  ;;  %6344 = vmatprep.subr.mxu0 %v9269_v6  ;;  %v11820_v32 = vand.u32 4294901760, %v9399_v18  ;;  %v9501_v23 = vsub.f32 %v316_v29, %v9454_v46  ;;  %v9513_v30 = vsub.f32 %v315_v55, %v9464_v21  ;;  %v9516_v42 = vand.u32 4294901760, %v330_v59  ;;  %v9533_v6 = vld [vmem:[#allocation5 + $0x280] sm:$0xff] }
 0x15f   : > { %11819 = vst [vmem:[#allocation52_spill] sm:$0xff] %v9486_v35  ;;  %6380 = vmatprep.subr.mxu1 %v11821_v62  ;;  %6345 = vmatpush3.msra.mxu0 %v9280_v9  ;;  %v9519_v51 = vsub.f32 %v224_v25, %v9471_v52  ;;  %v5842_v62 = vpop.f32.mrf.mxu0  ;;  %v11826_v55 = vand.u32 4294901760, %v9436_v5  ;;  %v312_v25 = vld [vmem:[#allocation5 + $0x200] sm:$0xff]  ;;  %v11829_v9 = vand.u32 4294901760, %v9445_v37 }
 0x160   : > { %v9491_v16 = vsub.f32 %v9399_v18, %v11820_v32  ;;  %v313_v32 = vld [vmem:[#allocation5 + $0x208] sm:$0xff]  ;;  %v9507_v18 = vsub.f32 %v332_v13, %v9452_v26  ;;  %6381 = vmatpush3.msra.mxu1 %v11823_v60  ;;  %6346 = vmatprep.subr.mxu0 %v9291_v7  ;;  %v11825_v13 = vand.u32 4294901760, %v9312_v31  ;;  %v9535_v7 = vand.u32 4294901760, %v223_v61  ;;  %v231_v31 = vld [vmem:[%s7792_s6 + $0x60] sm:$0xff] }
 0x161   : > { %11824 = vst [vmem:[#allocation57_spill] sm:$0xff] %v9519_v51  ;;  %2409 = vmatprep.mubr.f32.mxu1 %v11792_v22  ;;  %v9531_v29 = vsub.f32 %v9436_v5, %v11826_v55  ;;  %6347 = vmatpush3.msra.mxu0 %v9293_v54  ;;  %v11828_v22 = vand.u32 4294901760, %v9351_v34  ;;  %v9542_v60 = vand.u32 4294901760, %v313_v32  ;;  %v9547_v55 = vsub.f32 %v9445_v37, %v11829_v9  ;;  %v5843_v52 = vpop.f32.mrf.mxu0  ;;  %v230_v54 = vld [vmem:[%s7792_s6 + $0x58] sm:$0xff] }
 0x162   : > { %11822 = vst [vmem:[#allocation55_spill] sm:$0xff] %v9507_v18  ;;  %6382 = vmatprep.subr.mxu1 %v11825_v13  ;;  %11827 = vst [vmem:[#allocation58_spill] sm:$0xff] %v9535_v7  ;;  %v9550_v5 = vsub.f32 %v331_v0, %v9486_v35  ;;  %2411 = vmatmul.mubr.f32.gmra.mxu1 %v11800_v63  ;;  %v9555_v34 = vsub.f32 %v314_v40, %v9504_v43  ;;  %v11831_v9 = vand.u32 4294901760, %v9364_v50 }
 0x163   : > { %6383 = vmatpush3.msra.mxu1 %v11828_v22  ;;  %6348 = vmatprep.subr.mxu0 %v9314_v47  ;;  %v5844_v49 = vadd.f32 %v5843_v52, %v5842_v62  ;;  %v9564_v0 = vand.u32 4294901760, %v9533_v6  ;;  %v9566_v63 = vand.u32 4294901760, %v312_v25  ;;  %v9569_v47 = vand.u32 4294901760, %v231_v31  ;;  %v5883_v22 = vpop.f32.mrf.mxu1 }
 0x164   : > { %11830 = vst [vmem:[#allocation59_spill] sm:$0xff] %v9555_v34  ;;  %6384 = vmatprep.subr.mxu1 %v11831_v9  ;;  %6349 = vmatpush3.msra.mxu0 %v9326_v3  ;;  %v11834_v37 = vand.u32 4294901760, %v9372_v27  ;;  %v9576_v50 = vsub.f32 %v223_v61, %v9535_v7  ;;  %v9579_v62 = vsub.f32 %v330_v59, %v9516_v42  ;;  %v238_v9 = vld [vmem:[%s7792_s6 + $0x98] sm:$0xff]  ;;  %v11837_v40 = vand.u32 4294901760, %v9389_v8 }
 0x165   : > { %11832 = vst [vmem:[#allocation60_spill] sm:$0xff] %v9566_v63  ;;  %11833 = vst [vmem:[#allocation61_spill] sm:$0xff] %v9569_v47  ;;  %6350 = vmatprep.subr.mxu0 %v9342_v36  ;;  %v487_v13 = vadd.f32 %v5841_v20, %v9272_v56  ;;  %2416 = vmatprep.mubr.f32.mxu1 %v11809_v14  ;;  %v9591_v61 = vand.u32 4294901760, %v230_v54  ;;  %v5845_v36 = vpop.f32.mrf.mxu0  ;;  %v5884_v59 = vpop.f32.mrf.mxu1  ;;  %v11840_v20 = vand.u32 4294901760, %v9394_v33  ;;  %v11841_v8 = vand.u32 4294901760, %v9507_v18 }
 0x166   : > { %6385 = vmatpush3.msra.mxu1 %v11834_v37  ;;  %11835 = vst [vmem:[#allocation62_spill] sm:$0xff] %v9576_v50  ;;  %11836 = vst [vmem:[#allocation63_spill] sm:$0xff] %v9579_v62  ;;  %v9587_v37 = vsub.f32 %v313_v32, %v9542_v60  ;;  %6351 = vmatpush3.msra.mxu0 %v9334_v2  ;;  %v11842_v32 = vand.u32 4294901760, %v9501_v23  ;;  %v5885_v52 = vadd.f32 %v5884_v59, %v5883_v22  ;;  %v237_v59 = vld [vmem:[%s7792_s6 + $0x90] sm:$0xff] }
 0x167   : > { %6386 = vmatprep.subr.mxu1 %v11837_v40  ;;  %11839 = vst [vmem:[#allocation65_spill] sm:$0xff] %v9591_v61  ;;  %v9599_v14 = vsub.f32 %v9507_v18, %v11841_v8  ;;  %2418 = vmatmul.mubr.f32.gmra.mxu1 %v11817_v39  ;;  %v9610_v33 = vsub.f32 %v312_v25, %v9566_v63  ;;  %v5846_v3 = vpop.f32.mrf.mxu0  ;;  %v11846_v22 = vand.u32 4294901760, %v9408_v57  ;;  %v11284_v25 = vand.u32 4294901760, %v9579_v62 }
 0x168   : > { %11838 = vst [vmem:[#allocation64_spill] sm:$0xff] %v9587_v37  ;;  %6387 = vmatpush3.msra.mxu1 %v11840_v20  ;;  %v9604_v40 = vsub.f32 %v9501_v23, %v11842_v32  ;;  %6352 = vmatprep.subr.mxu0 %v9380_v4  ;;  %v11844_v20 = vand.u32 4294901760, %v9519_v51  ;;  %v9618_v2 = vsub.f32 %v231_v31, %v9569_v47  ;;  %v9620_v32 = vand.u32 4294901760, %v238_v9 }
 0x169   : > { %11843 = vst [vmem:[#allocation66_spill] sm:$0xff] %v9610_v33  ;;  %6388 = vmatprep.subr.mxu1 %v11846_v22  ;;  %6353 = vmatpush3.msra.mxu0 %v9396_v1  ;;  %v9628_v27 = vadd.f32 %v5885_v52, %v487_v13  ;;  %v11848_v31 = vand.u32 4294901760, %v9550_v5  ;;  %v9640_v39 = vsub.f32 %v230_v54, %v9591_v61  ;;  %v11850_v52 = vand.u32 4294901760, %v9513_v30 }
 0x16a   : > { %v9615_v8 = vsub.f32 %v9519_v51, %v11844_v20  ;;  %11845 = vst [vmem:[#allocation67_spill] sm:$0xff] %v9620_v32  ;;  %v5847_v20 = vadd.f32 %v5846_v3, %v5845_v36  ;;  %v11847_v51 = vand.u32 4294901760, %v9418_v12  ;;  %6354 = vmatprep.subr.mxu0 %v9452_v26  ;;  %v9644_v13 = vsub.f32 %v9493_v28, %v9526_v19  ;;  %v5886_v3 = vpop.f32.mrf.mxu1 }
 0x16b   : > { %v9636_v57 = vsub.f32 %v9550_v5, %v11848_v31  ;;  %v11849_v36 = vand.u32 4294901760, %v9427_v17  ;;  %6355 = vmatpush3.msra.mxu0 %v9454_v46  ;;  %v2774_v12 = vand.u32 4294901760, %v9599_v14  ;;  %v9654_v31 = vsub.f32 %v9513_v30, %v11850_v52  ;;  %v245_v52 = vld [vmem:[%s7792_s6 + $0xd0] sm:$0xff]  ;;  %v5924_v22 = vpop.f32.mrf.mxu0 }
 0x16c   : > { %6389 = vmatpush3.msra.mxu1 %v11847_v51  ;;  %v2662_v51 = vand.u32 4294901760, %v9604_v40  ;;  %v502_v54 = vadd.f32 %v5844_v49, %v9272_v56  ;;  %v11851_v28 = vand.u32 4294901760, %v9432_v15  ;;  %6356 = vmatprep.subr.mxu0 %v9486_v35  ;;  %v9666_v14 = vsub.f32 %v238_v9, %v9620_v32  ;;  %v5887_v49 = vpop.f32.mrf.mxu1 }
 0x16d   : > { %6390 = vmatprep.subr.mxu1 %v11849_v36  ;;  %v9663_v36 = vsub.f32 %v9533_v6, %v9564_v0  ;;  %v9668_v40 = vand.u32 4294901760, %v237_v59  ;;  %v11854_v15 = vand.u32 4294901760, %v9459_v10  ;;  %6357 = vmatpush3.msra.mxu0 %v9464_v21  ;;  %v11855_v17 = vand.u32 4294901760, %v9576_v50  ;;  %v5925_v26 = vpop.f32.mrf.mxu0 }
 0x16e   : > { %6391 = vmatpush3.msra.mxu1 %v11851_v28  ;;  %v2523_v28 = vand.u32 4294901760, %v9615_v8  ;;  %v2787_v9 = vsub.f32 %v9579_v62, %v11284_v25  ;;  %v5888_v35 = vadd.f32 %v5887_v49, %v5886_v3  ;;  %v11856_v46 = vand.u32 4294901760, %v9469_v53  ;;  %6358 = vmatprep.subr.mxu0 %v9516_v42 }
 0x16f   : > { %11852 = vst [vmem:[#allocation68_spill] sm:$0xff] %v9663_v36  ;;  %11853 = vst [vmem:[#allocation69_spill] sm:$0xff] %v9668_v40  ;;  %6392 = vmatprep.subr.mxu1 %v11854_v15  ;;  %v2528_v6 = vsub.f32 %v9576_v50, %v11855_v17  ;;  %v2781_v10 = vand.u32 4294901760, %v9636_v57  ;;  %v11857_v15 = vand.u32 4294901760, %v9555_v34  ;;  %v244_v50 = vld [vmem:[%s7792_s6 + $0xc8] sm:$0xff]  ;;  %v11858_v3 = vand.u32 4294901760, %v9491_v16  ;;  %6359 = vmatpush3.msra.mxu0 %v9504_v43  ;;  %v5889_v21 = vpop.f32.mrf.mxu1 }
 0x170   : > { %6393 = vmatpush3.msra.mxu1 %v11856_v46  ;;  %v9697_v46 = vand.u32 4294901760, %v245_v52  ;;  %v9699_v57 = vadd.f32 %v5888_v35, %v502_v54  ;;  %v5926_v49 = vadd.f32 %v5925_v26, %v5924_v22  ;;  %6360 = vmatprep.subr.mxu0 %v9526_v19  ;;  %v11861_v25 = vand.u32 4294901760, %v9618_v2 }
 0x171   : > { %v9688_v8 = vsub.f32 %v9555_v34, %v11857_v15  ;;  %6394 = vmatprep.subr.mxu1 %v11858_v3  ;;  %v11860_v15 = vand.u32 4294901760, %v9481_v41  ;;  %v11287_v16 = vand.u32 4294901760, %v9663_v36  ;;  %v9710_v53 = vsub.f32 %v237_v59, %v9668_v40  ;;  %6361 = vmatpush3.msra.mxu0 %v9542_v60 }
 0x172   : > { %11859 = vst [vmem:[#allocation70_spill] sm:$0xff] %v9697_v46  ;;  %v2537_v17 = vsub.f32 %v9618_v2, %v11861_v25  ;;  %v11862_v35 = vand.u32 4294901760, %v9531_v29  ;;  %v2529_v41 = vand.u32 4294901760, %v2528_v6  ;;  %v9715_v26 = vand.u32 4294901760, %v244_v50  ;;  %6362 = vmatprep.subr.mxu0 %v9564_v0  ;;  %2524 = vmatprep.mubr.f32.mxu0 %v2523_v28 }
 0x173   : > { %6395 = vmatpush3.msra.mxu1 %v11860_v15  ;;  %v517_v22 = vadd.f32 %v5847_v20, %v9272_v56  ;;  %v908_v25 = vadd.f32 %v5926_v49, %v9357_v11  ;;  %v11864_v54 = vand.u32 4294901760, %v9547_v55  ;;  %v2669_v59 = vand.u32 4294901760, %v9654_v31  ;;  %v5927_v56 = vpop.f32.mrf.mxu0  ;;  %v5890_v20 = vpop.f32.mrf.mxu1  ;;  %6363 = vmatpush3.msra.mxu0 %v9566_v63 }
 0x174   : > { %6396 = vmatprep.subr.mxu1 %v11862_v35  ;;  %11863 = vst [vmem:[#allocation71_spill] sm:$0xff] %v9715_v26  ;;  %v11865_v15 = vand.u32 4294901760, %v9640_v39  ;;  %v11866_v35 = vand.u32 4294901760, %v9644_v13  ;;  %v2788_v11 = vand.u32 4294901760, %v2787_v9  ;;  %v11867_v55 = vand.u32 4294901760, %v9587_v37  ;;  %2530 = vmatmul.mubr.f32.vlgmr.msra.gmra.mxu0 %v2529_v41 }
 0x175   : > { %6397 = vmatpush3.msra.mxu1 %v11864_v54  ;;  %v9735_v49 = vsub.f32 %v245_v52, %v9697_v46  ;;  %v5891_v54 = vadd.f32 %v5890_v20, %v5889_v21  ;;  %v11290_v9 = vand.u32 4294901760, %v9710_v53  ;;  %v5928_v63 = vpop.f32.mrf.mxu0  ;;  %v2676_v52 = vand.u32 4294901760, %v9688_v8  ;;  %6420 = vmatprep.subr.mxu0 %v9150_v58 }
 0x176   : > { %v2543_v29 = vsub.f32 %v9640_v39, %v11865_v15  ;;  %v2794_v6 = vsub.f32 %v9644_v13, %v11866_v35  ;;  %6398 = vmatprep.subr.mxu1 %v2774_v12  ;;  %v2682_v31 = vsub.f32 %v9587_v37, %v11867_v55  ;;  %v2538_v15 = vand.u32 4294901760, %v2537_v17  ;;  %6421 = vmatpush3.msra.mxu0 %v9161_v44  ;;  %v5968_v41 = vpop.f32.mrf.mxu1 }
 0x177   : > { %6399 = vmatpush3.msra.mxu1 %v2662_v51  ;;  %v2801_v35 = vsub.f32 %v9663_v36, %v11287_v16  ;;  %v11868_v12 = vand.u32 4294901760, %v9666_v14  ;;  %v9746_v21 = vsub.f32 %v244_v50, %v9715_v26  ;;  %v770_v51 = vadd.f32 %v5891_v54, %v517_v22  ;;  %6422 = vmatprep.subr.mxu0 %v9168_v48  ;;  %v11878_v16 = vld [vmem:[#allocation14_spill] sm:$0xff] }
 0x178   : > { %6400 = vmatprep.subr.mxu1 %v2781_v10  ;;  %v5929_v28 = vadd.f32 %v5928_v63, %v5927_v56  ;;  %v2544_v17 = vand.u32 4294901760, %v2543_v29  ;;  %v2795_v20 = vand.u32 4294901760, %v2794_v6  ;;  %v11869_v55 = vand.u32 4294901760, %v9610_v33  ;;  %2539 = vmatprep.mubr.f32.mxu0 %v2538_v15  ;;  %v5969_v56 = vpop.f32.mrf.mxu1 }
 0x179   : > { %v2552_v3 = vsub.f32 %v9666_v14, %v11868_v12  ;;  %6401 = vmatpush3.msra.mxu1 %v2669_v59  ;;  %v2683_v10 = vand.u32 4294901760, %v2682_v31  ;;  %v11289_v8 = vand.u32 4294901760, %v9735_v49  ;;  %v2802_v63 = vand.u32 4294901760, %v2801_v35  ;;  %v5930_v59 = vpop.f32.mrf.mxu0  ;;  %6423 = vmatpush3.msra.mxu0 %v9174_v24 }
 0x17a   : > { %v2689_v12 = vsub.f32 %v9610_v33, %v11869_v55  ;;  %6402 = vmatprep.subr.mxu1 %v2788_v11  ;;  %v917_v50 = vadd.f32 %v5929_v28, %v9628_v27  ;;  %v2558_v22 = vsub.f32 %v9710_v53, %v11290_v9  ;;  %v11288_v6 = vand.u32 4294901760, %v9746_v21  ;;  %2545 = vmatmul.mubr.f32.gmra.mxu0 %v2544_v17  ;;  %v11871_v55 = vld [vmem:[#allocation49_spill] sm:$0xff]  ;;  %v11888_v9 = vld [vmem:[#allocation15_spill] sm:$0xff] }
 0x17b   : > { %6403 = vmatpush3.msra.mxu1 %v2676_v52  ;;  %v2553_v29 = vand.u32 4294901760, %v2552_v3  ;;  %v5931_v11 = vpop.f32.mrf.mxu0  ;;  %v5970_v31 = vadd.f32 %v5969_v56, %v5968_v41  ;;  %6424 = vmatprep.subr.mxu0 %v9183_v38  ;;  %v2567_v54 = vsub.f32 %v9735_v49, %v11289_v8  ;;  %v11870_v52 = vld [vmem:[#allocation22_spill] sm:$0xff] }
 0x17c   : > { %6404 = vmatprep.subr.mxu1 %v2795_v20  ;;  %v2690_v27 = vand.u32 4294901760, %v2689_v12  ;;  %v5932_v15 = vadd.f32 %v5931_v11, %v5930_v59  ;;  %6425 = vmatpush3.msra.mxu0 %v9211_v45  ;;  %v2559_v3 = vand.u32 4294901760, %v2558_v22  ;;  %v2573_v28 = vsub.f32 %v9746_v21, %v11288_v6  ;;  %v11875_v56 = vld [vmem:[#allocation26_spill] sm:$0xff] }
 0x17d   : > { %6405 = vmatpush3.msra.mxu1 %v2683_v10  ;;  %v9766_v35 = vadd.f32 %v5970_v31, %v908_v25  ;;  %6426 = vmatprep.subr.mxu0 %v11870_v52  ;;  %v5933_v20 = vpop.f32.mrf.mxu0  ;;  %v5971_v12 = vpop.f32.mrf.mxu1  ;;  %v11872_v10 = vld [vmem:[#allocation23_spill] sm:$0xff]  ;;  %v2568_v25 = vand.u32 4294901760, %v2567_v54  ;;  %v11876_v11 = vld [vmem:[#allocation38_spill] sm:$0xff]  ;;  %v11877_v31 = vld [vmem:[#allocation36_spill] sm:$0xff] }
 0x17e   : > { %6406 = vmatprep.subr.mxu1 %v2802_v63  ;;  %2554 = vmatprep.mubr.f32.mxu0 %v2553_v29  ;;  %v926_v17 = vadd.f32 %v5932_v15, %v9699_v57  ;;  %v11873_v63 = vld [vmem:[#allocation25_spill] sm:$0xff]  ;;  %v2574_v57 = vand.u32 4294901760, %v2573_v28  ;;  %v11886_v8 = vld [vmem:[#allocation34_spill] sm:$0xff] }
 0x17f   : > { %6407 = vmatpush3.msra.mxu1 %v2690_v27  ;;  %2805 = vmatprep.mubr.f32.mxu1 %v11871_v55  ;;  %v5934_v41 = vpop.f32.mrf.mxu0  ;;  %v5972_v59 = vpop.f32.mrf.mxu1  ;;  %v11874_v29 = vld [vmem:[#allocation33_spill] sm:$0xff] }
 0x180   : > { %6427 = vmatpush3.msra.mxu0 %v11872_v10  ;;  %2807 = vmatmul.mubr.f32.vlgmr.msra.gmra.mxu1 %v9535_v7  ;;  %v5935_v22 = vadd.f32 %v5934_v41, %v5933_v20  ;;  %v5973_v27 = vadd.f32 %v5972_v59, %v5971_v12  ;;  %v11879_v20 = vld [vmem:[#allocation29_spill] sm:$0xff]  ;;  %v11880_v41 = vld [vmem:[#allocation18_spill] sm:$0xff]  ;;  %v11881_v12 = vld [vmem:[#allocation27_spill] sm:$0xff] }
 0x181   : > { %2560 = vmatmul.mubr.f32.gmra.mxu0 %v2559_v3  ;;  %6428 = vmatprep.subr.mxu0 %v11873_v63  ;;  %v11891_v7 = vld [vmem:[#allocation54_spill] sm:$0xff] }
 0x182   : > { %6464 = vmatprep.subr.mxu1 %v11874_v29  ;;  %6429 = vmatpush3.msra.mxu0 %v11875_v56  ;;  %v935_v15 = vadd.f32 %v5935_v22, %v770_v51  ;;  %v9782_v54 = vadd.f32 %v5973_v27, %v917_v50  ;;  %v5974_v3 = vpop.f32.mrf.mxu1  ;;  %v11882_v51 = vld [vmem:[#allocation12_spill] sm:$0xff]  ;;  %v11884_v50 = vld [vmem:[#allocation19_spill] sm:$0xff] }
 0x183   : > { %6465 = vmatpush3.msra.mxu1 %v11876_v11  ;;  %6430 = vmatprep.subr.mxu0 %v11877_v31  ;;  %v11883_v22 = vld [vmem:[#allocation48_spill] sm:$0xff] }
 0x184   : > { %6466 = vmatprep.subr.mxu1 %v11878_v16  ;;  %2569 = vmatprep.mubr.f32.mxu0 %v2568_v25  ;;  %v5975_v28 = vpop.f32.mrf.mxu1  ;;  %v11885_v25 = vld [vmem:[#allocation47_spill] sm:$0xff] }
 0x185   : > { %2812 = vmatprep.mubr.f32.mxu1 %v9569_v47  ;;  %6431 = vmatpush3.msra.mxu0 %v11879_v20  ;;  %v5976_v59 = vadd.f32 %v5975_v28, %v5974_v3  ;;  %v11889_v28 = vld [vmem:[#allocation53_spill] sm:$0xff] }
 0x186   : > { %6467 = vmatpush3.msra.mxu1 %v11880_v41  ;;  %2575 = vmatmul.mubr.f32.gmra.mxu0 %v2574_v57  ;;  %v11887_v57 = vld [vmem:[#allocation31_spill] sm:$0xff]  ;;  %v11890_v47 = vld [vmem:[#allocation13_spill] sm:$0xff] }
 0x187   : > { %2814 = vmatmul.mubr.f32.gmra.mxu1 %v9591_v61  ;;  %6432 = vmatprep.subr.mxu0 %v11881_v12  ;;  %v9793_v27 = vadd.f32 %v5976_v59, %v926_v17  ;;  %v5977_v6 = vpop.f32.mrf.mxu1  ;;  %v11892_v17 = vld [vmem:[#allocation21_spill] sm:$0xff]  ;;  %v11893_v59 = vld [vmem:[#allocation50_spill] sm:$0xff] }
 0x188   : > { %6468 = vmatprep.subr.mxu1 %v11882_v51  ;;  %6433 = vmatpush3.msra.mxu0 %v11883_v22 }
 0x189   : > { %6469 = vmatpush3.msra.mxu1 %v11884_v50  ;;  %6434 = vmatprep.subr.mxu0 %v11885_v25  ;;  %v5978_v3 = vpop.f32.mrf.mxu1 }
 0x18a   : > { %6470 = vmatprep.subr.mxu1 %v11886_v8  ;;  %2819 = vmatprep.mubr.f32.mxu1 %v9620_v32  ;;  %v5979_v61 = vadd.f32 %v5978_v3, %v5977_v6  ;;  %v11894_v32 = vld [vmem:[#allocation32_spill] sm:$0xff]  ;;  %v11897_v6 = vld [vmem:[#allocation39_spill] sm:$0xff] }
 0x18b   : > { %6435 = vmatpush3.msra.mxu0 %v11887_v57  ;;  %6471 = vmatpush3.msra.mxu1 %v11888_v9  ;;  %v11895_v9 = vld [vmem:[#allocation35_spill] sm:$0xff]  ;;  %v11898_v3 = vld [vmem:[#allocation24_spill] sm:$0xff] }
 0x18c   : > { %2821 = vmatmul.mubr.f32.gmra.mxu1 %v9668_v40  ;;  %6436 = vmatprep.subr.mxu0 %v11889_v28  ;;  %v9805_v55 = vadd.f32 %v5979_v61, %v935_v15  ;;  %v11896_v40 = vld [vmem:[#allocation40_spill] sm:$0xff]  ;;  %v11902_v15 = vld [vmem:[#allocation37_spill] sm:$0xff] }
 0x18d   : > { %6472 = vmatprep.subr.mxu1 %v11890_v47  ;;  %6437 = vmatpush3.msra.mxu0 %v11891_v7  ;;  %v11899_v7 = vld [vmem:[#allocation56_spill] sm:$0xff] }
 0x18e   : > { %6473 = vmatpush3.msra.mxu1 %v11892_v17  ;;  %6438 = vmatprep.subr.mxu0 %v11893_v59  ;;  %v11900_v17 = vld [vmem:[#allocation41_spill] sm:$0xff]  ;;  %v11901_v61 = vld [vmem:[#allocation28_spill] sm:$0xff] }
 0x18f   : > { %6474 = vmatprep.subr.mxu1 %v11894_v32  ;;  %2826 = vmatprep.mubr.f32.mxu1 %v9697_v46  ;;  %v11903_v46 = vld [vmem:[#allocation30_spill] sm:$0xff] }
 0x190   : > { %6439 = vmatpush3.msra.mxu0 %v11895_v9  ;;  %6475 = vmatpush3.msra.mxu1 %v11896_v40 }
 0x191   : > { %2828 = vmatmul.mubr.f32.gmra.mxu1 %v9715_v26  ;;  %6440 = vmatprep.subr.mxu0 %v11897_v6 }
 0x192   : > { %6476 = vmatprep.subr.mxu1 %v11898_v3  ;;  %6441 = vmatpush3.msra.mxu0 %v11899_v7  ;;  %v11904_v3 = vld [vmem:[#allocation43_spill] sm:$0xff] }
 0x193   : > { %6477 = vmatpush3.msra.mxu1 %v11900_v17  ;;  %6442 = vmatprep.subr.mxu0 %v9507_v18  ;;  %v11905_v17 = vld [vmem:[#allocation51_spill] sm:$0xff]  ;;  %v11906_v18 = vld [vmem:[#allocation46_spill] sm:$0xff] }
 0x194   : > { %6478 = vmatprep.subr.mxu1 %v11901_v61  ;;  %6443 = vmatpush3.msra.mxu0 %v9501_v23  ;;  %v6012_v26 = vpop.f32.mrf.mxu0 }
 0x195   : > { %6479 = vmatpush3.msra.mxu1 %v11902_v15  ;;  %6444 = vmatprep.subr.mxu0 %v9550_v5 }
 0x196   : > { %6480 = vmatprep.subr.mxu1 %v11903_v46  ;;  %6445 = vmatpush3.msra.mxu0 %v9513_v30  ;;  %v6013_v61 = vpop.f32.mrf.mxu0 }
 0x197   : > { %6481 = vmatpush3.msra.mxu1 %v11904_v3  ;;  %6446 = vmatprep.subr.mxu0 %v9579_v62  ;;  %v6014_v15 = vadd.f32 %v6013_v61, %v6012_v26  ;;  %v11910_v61 = vld [vmem:[#allocation62_spill] sm:$0xff] }
 0x198   : > { %6482 = vmatprep.subr.mxu1 %v11905_v17  ;;  %6447 = vmatpush3.msra.mxu0 %v9555_v34  ;;  %v11907_v17 = vld [vmem:[#allocation44_spill] sm:$0xff]  ;;  %v11908_v34 = vld [vmem:[#allocation57_spill] sm:$0xff] }
 0x199   : > { %6483 = vmatpush3.msra.mxu1 %v11906_v18  ;;  %6448 = vmatprep.subr.mxu0 %v9644_v13  ;;  %v1244_v62 = vadd.f32 %v6014_v15, %v9766_v35  ;;  %v6015_v3 = vpop.f32.mrf.mxu0  ;;  %v11909_v18 = vld [vmem:[#allocation42_spill] sm:$0xff]  ;;  %v11914_v35 = vand.u32 4294901760, %v9161_v44 }
 0x19a   : > { %6484 = vmatprep.subr.mxu1 %v9380_v4  ;;  %6449 = vmatpush3.msra.mxu0 %v9587_v37  ;;  %v11911_v4 = vld [vmem:[#allocation52_spill] sm:$0xff] }
 0x19b   : > { %6485 = vmatpush3.msra.mxu1 %v9396_v1  ;;  %6450 = vmatprep.subr.mxu0 %v9663_v36  ;;  %v6016_v26 = vpop.f32.mrf.mxu0  ;;  %v11912_v1 = vand.u32 4294901760, %v9150_v58  ;;  %v11913_v36 = vld [vmem:[#allocation45_spill] sm:$0xff]  ;;  %v11916_v58 = vand.u32 4294901760, %v9174_v24 }
 0x19c   : > { %6486 = vmatprep.subr.mxu1 %v11907_v17  ;;  %6451 = vmatpush3.msra.mxu0 %v9610_v33  ;;  %v6017_v37 = vadd.f32 %v6016_v26, %v6015_v3 }
 0x19d   : > { %2963 = vmatprep.mubr.f32.mxu0 %v11908_v34  ;;  %6487 = vmatpush3.msra.mxu1 %v11909_v18  ;;  %v11915_v18 = vand.u32 4294901760, %v9168_v48 }
 0x19e   : > { %2966 = vmatmul.mubr.f32.vlgmr.msra.gmra.mxu0 %v11910_v61  ;;  %6488 = vmatprep.subr.mxu1 %v11911_v4  ;;  %v1251_v15 = vadd.f32 %v6017_v37, %v9782_v54  ;;  %v6056_v33 = vpop.f32.mrf.mxu1  ;;  %v11917_v37 = vand.u32 4294901760, %v9183_v38  ;;  %v11919_v54 = vand.u32 4294901760, %v11870_v52  ;;  %v11920_v38 = vld [vmem:[#allocation60_spill] sm:$0xff]  ;;  %v11924_v52 = vand.u32 4294901760, %v11873_v63 }
 0x19f   : > { %6508 = vmatprep.subr.mxu0 %v11912_v1  ;;  %6489 = vmatpush3.msra.mxu1 %v11913_v36  ;;  %v6018_v4 = vpop.f32.mrf.mxu0 }
 0x1a0   : > { %6509 = vmatpush3.msra.mxu0 %v11914_v35  ;;  %6490 = vmatprep.subr.mxu1 %v9516_v42  ;;  %v6057_v1 = vpop.f32.mrf.mxu1  ;;  %v11921_v35 = vand.u32 4294901760, %v11908_v34  ;;  %v11925_v34 = vand.u32 4294901760, %v11875_v56  ;;  %v11928_v56 = vand.u32 4294901760, %v11879_v20  ;;  %v11932_v20 = vand.u32 4294901760, %v11885_v25 }
 0x1a1   : > { %6510 = vmatprep.subr.mxu0 %v11915_v18  ;;  %2972 = vmatprep.mubr.f32.mxu0 %v9618_v2  ;;  %v6019_v44 = vpop.f32.mrf.mxu0  ;;  %v6058_v3 = vadd.f32 %v6057_v1, %v6056_v33  ;;  %v11918_v18 = vand.u32 4294901760, %v9211_v45  ;;  %v11922_v45 = vand.u32 4294901760, %v11872_v10  ;;  %v11926_v10 = vand.u32 4294901760, %v11877_v31 }
 0x1a2   : > { %6491 = vmatpush3.msra.mxu1 %v9504_v43  ;;  %6511 = vmatpush3.msra.mxu0 %v11916_v58  ;;  %v6020_v48 = vadd.f32 %v6019_v44, %v6018_v4  ;;  %v11937_v25 = vand.u32 4294901760, %v11889_v28  ;;  %v11943_v28 = vand.u32 4294901760, %v11895_v9  ;;  %v344_v9 = vld [vmem:[#allocation5 + $0x300] sm:$0xff] }
 0x1a3   : > { %2975 = vmatmul.mubr.f32.gmra.mxu0 %v9640_v39  ;;  %6492 = vmatprep.subr.mxu1 %v9526_v19  ;;  %v9861_v24 = vadd.f32 %v6058_v3, %v1244_v62  ;;  %v11923_v62 = vand.u32 4294901760, %v11910_v61 }
 0x1a4   : > { %6512 = vmatprep.subr.mxu0 %v11917_v37  ;;  %6493 = vmatpush3.msra.mxu1 %v9542_v60  ;;  %v1258_v33 = vadd.f32 %v6020_v48, %v9793_v27  ;;  %v6021_v26 = vpop.f32.mrf.mxu0 }
 0x1a5   : > { %6513 = vmatpush3.msra.mxu0 %v11918_v18  ;;  %6494 = vmatprep.subr.mxu1 %v9564_v0  ;;  %v6059_v4 = vpop.f32.mrf.mxu1 }
 0x1a6   : > { %6514 = vmatprep.subr.mxu0 %v11919_v54  ;;  %2981 = vmatprep.mubr.f32.mxu0 %v9666_v14  ;;  %v6022_v58 = vpop.f32.mrf.mxu0  ;;  %v225_v54 = vld [vmem:[%s7792_s6 + $0x30] sm:$0xff] }
 0x1a7   : > { %6495 = vmatpush3.msra.mxu1 %v11920_v38  ;;  %3097 = vmatprep.mubr.f32.mxu1 %v11921_v35  ;;  %v6023_v27 = vadd.f32 %v6022_v58, %v6021_v26  ;;  %v6060_v1 = vpop.f32.mrf.mxu1  ;;  %v11948_v26 = vld [vmem:[#allocation41_spill] sm:$0xff]  ;;  %v11949_v35 = vld [vmem:[#allocation55_spill] sm:$0xff] }
 0x1a8   : > { %6515 = vmatpush3.msra.mxu0 %v11922_v45  ;;  %3101 = vmatmul.mubr.f32.vlgmr.msra.gmra.mxu1 %v11923_v62  ;;  %v6061_v44 = vadd.f32 %v6060_v1, %v6059_v4  ;;  %v11951_v45 = vld [vmem:[#allocation28_spill] sm:$0xff]  ;;  %v232_v62 = vld [vmem:[%s7792_s6 + $0x68] sm:$0xff]  ;;  %v11953_v58 = vld [vmem:[#allocation37_spill] sm:$0xff]  ;;  %v11955_v1 = vand.u32 4294901760, %v9513_v30 }
 0x1a9   : > { %2984 = vmatmul.mubr.f32.gmra.mxu0 %v9710_v53  ;;  %6516 = vmatprep.subr.mxu0 %v11924_v52  ;;  %v1265_v61 = vadd.f32 %v6023_v27, %v9805_v55  ;;  %v6062_v3 = vpop.f32.mrf.mxu1  ;;  %v11929_v55 = vand.u32 4294901760, %v9640_v39  ;;  %v11933_v39 = vand.u32 4294901760, %v9666_v14  ;;  %v11940_v14 = vld [vmem:[#allocation21_spill] sm:$0xff]  ;;  %v9951_v52 = vand.u32 4294901760, %v344_v9 }
 0x1aa   : > { %6552 = vmatprep.subr.mxu1 %v11874_v29  ;;  %6517 = vmatpush3.msra.mxu0 %v11925_v34  ;;  %v9886_v63 = vadd.f32 %v6061_v44, %v1251_v15  ;;  %v11927_v29 = vand.u32 4294901760, %v9618_v2  ;;  %v11931_v2 = vand.u32 4294901760, %v11883_v22  ;;  %v239_v27 = vld [vmem:[%s7792_s6 + $0xa0] sm:$0xff] }
 0x1ab   : > { %6553 = vmatpush3.msra.mxu1 %v11876_v11  ;;  %6518 = vmatprep.subr.mxu0 %v11926_v10  ;;  %v6063_v11 = vpop.f32.mrf.mxu1  ;;  %v11957_v10 = vld [vmem:[#allocation63_spill] sm:$0xff]  ;;  %v358_v30 = vsel %vm350_vm0, %v239_v27, 0 }
 0x1ac   : > { %6554 = vmatprep.subr.mxu1 %v11878_v16  ;;  %2990 = vmatprep.mubr.f32.mxu0 %v9735_v49  ;;  %v11930_v16 = vand.u32 4294901760, %v11881_v12  ;;  %v6064_v31 = vadd.f32 %v6063_v11, %v6062_v3  ;;  %v11934_v12 = vand.u32 4294901760, %v11887_v57  ;;  %v11941_v57 = vand.u32 4294901760, %v11893_v59  ;;  %v246_v11 = vld [vmem:[%s7792_s6 + $0xd8] sm:$0xff] }
 0x1ad   : > { %3108 = vmatprep.mubr.f32.mxu1 %v11927_v29  ;;  %6519 = vmatpush3.msra.mxu0 %v11928_v56  ;;  %v11945_v59 = vand.u32 4294901760, %v11897_v6  ;;  %v11952_v6 = vand.u32 4294901760, %v9501_v23  ;;  %v11956_v23 = vld [vmem:[#allocation43_spill] sm:$0xff] }
 0x1ae   : > { %6555 = vmatpush3.msra.mxu1 %v11880_v41  ;;  %2993 = vmatmul.mubr.f32.gmra.mxu0 %v9746_v21  ;;  %v9904_v41 = vadd.f32 %v6064_v31, %v1258_v33  ;;  %v6065_v15 = vpop.f32.mrf.mxu1  ;;  %v11944_v33 = vand.u32 4294901760, %v9746_v21  ;;  %v352_v21 = vsel %vm350_vm0, %v225_v54, 0  ;;  %v11959_v29 = vld [vmem:[#allocation51_spill] sm:$0xff]  ;;  %v11963_v31 = vand.u32 4294901760, %v9644_v13  ;;  %v11973_v54 = vld [vmem:[#allocation42_spill] sm:$0xff] }
 0x1af   : > { %3112 = vmatmul.mubr.f32.gmra.mxu1 %v11929_v55  ;;  %6520 = vmatprep.subr.mxu0 %v11930_v16  ;;  %v9957_v34 = vand.u32 4294901760, %v352_v21  ;;  %v11960_v56 = vld [vmem:[#allocation59_spill] sm:$0xff]  ;;  %v11962_v16 = vld [vmem:[#allocation46_spill] sm:$0xff] }
 0x1b0   : > { %6556 = vmatprep.subr.mxu1 %v11882_v51  ;;  %6521 = vmatpush3.msra.mxu0 %v11931_v2  ;;  %v11935_v51 = vld [vmem:[#allocation15_spill] sm:$0xff]  ;;  %v6066_v22 = vpop.f32.mrf.mxu1  ;;  %v9975_v2 = vsub.f32 %v344_v9, %v9951_v52 }
 0x1b1   : > { %6557 = vmatpush3.msra.mxu1 %v11884_v50  ;;  %6522 = vmatprep.subr.mxu0 %v11932_v20  ;;  %v11936_v50 = vand.u32 4294901760, %v9710_v53  ;;  %v6067_v37 = vadd.f32 %v6066_v22, %v6065_v15  ;;  %v11942_v53 = vand.u32 4294901760, %v9735_v49  ;;  %v11947_v49 = vand.u32 4294901760, %v11899_v7  ;;  %v11964_v15 = vld [vmem:[#allocation16_spill] sm:$0xff] }
 0x1b2   : > { %6558 = vmatprep.subr.mxu1 %v11886_v8  ;;  %3119 = vmatprep.mubr.f32.mxu1 %v11933_v39  ;;  %v11938_v8 = vld [vmem:[#allocation54_spill] sm:$0xff]  ;;  %v11954_v7 = vand.u32 4294901760, %v9550_v5  ;;  %v355_v5 = vsel %vm350_vm0, %v232_v62, 0  ;;  %v11965_v39 = vld [vmem:[#allocation64_spill] sm:$0xff] }
 0x1b3   : > { %6523 = vmatpush3.msra.mxu0 %v11934_v12  ;;  %6559 = vmatpush3.msra.mxu1 %v11935_v51  ;;  %v11939_v48 = vand.u32 4294901760, %v11938_v8  ;;  %v9922_v18 = vadd.f32 %v6067_v37, %v1265_v61  ;;  %v11958_v61 = vand.u32 4294901760, %v11957_v10  ;;  %v11966_v12 = vand.u32 4294901760, %v11965_v39 }
 0x1b4   : > { %3123 = vmatmul.mubr.f32.gmra.mxu1 %v11936_v50  ;;  %6524 = vmatprep.subr.mxu0 %v11937_v25  ;;  %v9981_v51 = vsub.f32 %v352_v21, %v9957_v34  ;;  %v9983_v22 = vand.u32 4294901760, %v355_v5  ;;  %v11967_v50 = vld [vmem:[#allocation17_spill] sm:$0xff]  ;;  %v11968_v25 = vld [vmem:[#allocation68_spill] sm:$0xff]  ;;  %v9991_v8 = vand.u32 4294901760, %v358_v30 }
 0x1b5   : > { %6560 = vmatprep.subr.mxu1 %v11890_v47  ;;  %6525 = vmatpush3.msra.mxu0 %v11939_v48  ;;  %v345_v47 = vld [vmem:[#allocation5 + $0x308] sm:$0xff]  ;;  %v11969_v37 = vand.u32 4294901760, %v11968_v25  ;;  %v361_v48 = vsel %vm350_vm0, %v246_v11, 0 }
 0x1b6   : > { %6561 = vmatpush3.msra.mxu1 %v11940_v14  ;;  %6526 = vmatprep.subr.mxu0 %v11941_v57  ;;  %v9941_v4 = vand.u32 4294901760, %v345_v47  ;;  %v10008_v9 = vand.u32 4294901760, %v361_v48  ;;  %v10016_v21 = vsub.f32 %v358_v30, %v9991_v8 }
 0x1b7   : > { %6562 = vmatprep.subr.mxu1 %v11894_v32  ;;  %3130 = vmatprep.mubr.f32.mxu1 %v11942_v53  ;;  %v11946_v32 = vld [vmem:[#allocation24_spill] sm:$0xff]  ;;  %v11970_v53 = vld [vmem:[#allocation66_spill] sm:$0xff] }
 0x1b8   : > { %6527 = vmatpush3.msra.mxu0 %v11943_v28  ;;  %6563 = vmatpush3.msra.mxu1 %v11896_v40  ;;  %v11950_v40 = vand.u32 4294901760, %v11949_v35  ;;  %v9963_v3 = vsub.f32 %v345_v47, %v9941_v4  ;;  %v11971_v28 = vand.u32 4294901760, %v11970_v53  ;;  %v11972_v47 = vld [vmem:[#allocation49_spill] sm:$0xff] }
 0x1b9   : > { %3134 = vmatmul.mubr.f32.gmra.mxu1 %v11944_v33  ;;  %6528 = vmatprep.subr.mxu0 %v11945_v59  ;;  %v10001_v33 = vand.u32 4294901760, %v9975_v2 }
 0x1ba   : > { %6564 = vmatprep.subr.mxu1 %v11946_v32  ;;  %6529 = vmatpush3.msra.mxu0 %v11947_v49  ;;  %v9989_v13 = vand.u32 4294901760, %v9963_v3  ;;  %v11974_v32 = vld [vmem:[#allocation58_spill] sm:$0xff]  ;;  %v11975_v49 = vld [vmem:[#allocation52_spill] sm:$0xff] }
 0x1bb   : > { %6565 = vmatpush3.msra.mxu1 %v11948_v26  ;;  %6530 = vmatprep.subr.mxu0 %v11950_v40  ;;  %v11976_v26 = vld [vmem:[#allocation61_spill] sm:$0xff]  ;;  %v3522_v40 = vand.u32 4294901760, %v9981_v51 }
 0x1bc   : > { %6566 = vmatprep.subr.mxu1 %v11951_v45  ;;  %6531 = vmatpush3.msra.mxu0 %v11952_v6  ;;  %v3592_v35 = vsub.f32 %v9963_v3, %v9989_v13 }
 0x1bd   : > { %6567 = vmatpush3.msra.mxu1 %v11953_v58  ;;  %6532 = vmatprep.subr.mxu0 %v11954_v7  ;;  %v6100_v44 = vpop.f32.mrf.mxu0  ;;  %v11977_v58 = vld [vmem:[#allocation65_spill] sm:$0xff] }
 0x1be   : > { %6568 = vmatprep.subr.mxu1 %v11903_v46  ;;  %6533 = vmatpush3.msra.mxu0 %v11955_v1  ;;  %v11961_v46 = vand.u32 4294901760, %v11960_v56  ;;  %v3523_v1 = vsub.f32 %v9981_v51, %v3522_v40 }
 0x1bf   : > { %6569 = vmatpush3.msra.mxu1 %v11956_v23  ;;  %6534 = vmatprep.subr.mxu0 %v11958_v61  ;;  %v6101_v55 = vpop.f32.mrf.mxu0 }
 0x1c0   : > { %6570 = vmatprep.subr.mxu1 %v11959_v29  ;;  %6535 = vmatpush3.msra.mxu0 %v11961_v46  ;;  %v6102_v20 = vadd.f32 %v6101_v55, %v6100_v44  ;;  %v3542_v44 = vand.u32 4294901760, %v10016_v21  ;;  %v3524_v30 = vand.u32 4294901760, %v3523_v1  ;;  %v4058_v1 = vld [vmem:[#allocation5 + $0x378] sm:$0xff] }
 0x1c1   : > { %6571 = vmatpush3.msra.mxu1 %v11962_v16  ;;  %6536 = vmatprep.subr.mxu0 %v11963_v31 }
 0x1c2   : > { %6572 = vmatprep.subr.mxu1 %v11964_v15  ;;  %6537 = vmatpush3.msra.mxu0 %v11966_v12  ;;  %v1502_v14 = vadd.f32 %v6102_v20, %v9861_v24  ;;  %v10006_v24 = vsub.f32 %v355_v5, %v9983_v22  ;;  %v11979_v5 = vld [vmem:[#allocation69_spill] sm:$0xff]  ;;  %v3543_v11 = vsub.f32 %v10016_v21, %v3542_v44 }
 0x1c3   : > { %6573 = vmatpush3.msra.mxu1 %v11967_v50  ;;  %6538 = vmatprep.subr.mxu0 %v11969_v37  ;;  %v6103_v57 = vpop.f32.mrf.mxu0 }
 0x1c4   : > { %6574 = vmatprep.subr.mxu1 %v11907_v17  ;;  %6539 = vmatpush3.msra.mxu0 %v11971_v28  ;;  %v3532_v7 = vand.u32 4294901760, %v10006_v24  ;;  %v3544_v50 = vand.u32 4294901760, %v3543_v11 }
 0x1c5   : > { %3300 = vmatprep.mubr.f32.mxu0 %v11972_v47  ;;  %6575 = vmatpush3.msra.mxu1 %v11973_v54  ;;  %v6104_v59 = vpop.f32.mrf.mxu0 }
 0x1c6   : > { %3302 = vmatmul.mubr.f32.vlgmr.msra.gmra.mxu0 %v11974_v32  ;;  %6576 = vmatprep.subr.mxu1 %v11975_v49  ;;  %v6105_v17 = vadd.f32 %v6104_v59, %v6103_v57  ;;  %v3533_v29 = vsub.f32 %v10006_v24, %v3532_v7 }
 0x1c7   : > { %6577 = vmatpush3.msra.mxu1 %v11913_v36  ;;  %3307 = vmatprep.mubr.f32.mxu0 %v11976_v26  ;;  %v6144_v6 = vpop.f32.mrf.mxu1  ;;  %v3599_v36 = vsub.f32 %v9975_v2, %v10001_v33 }
 0x1c8   : > { %6578 = vmatprep.subr.mxu1 %v9516_v42  ;;  %6872 = vmatprep.subr.mxu0 %v9941_v4  ;;  %v1517_v45 = vadd.f32 %v6105_v17, %v9886_v63  ;;  %v6106_v62 = vpop.f32.mrf.mxu0  ;;  %v10029_v42 = vsub.f32 %v361_v48, %v10008_v9  ;;  %v11978_v63 = vld [vmem:[#allocation67_spill] sm:$0xff]  ;;  %v3534_v15 = vand.u32 4294901760, %v3533_v29 }
 0x1c9   : > { %6579 = vmatpush3.msra.mxu1 %v9504_v43  ;;  %3425 = vmatprep.mubr.f32.mxu1 %v11972_v47  ;;  %v6145_v27 = vpop.f32.mrf.mxu1  ;;  %v3593_v43 = vand.u32 4294901760, %v3592_v35 }
 0x1ca   : > { %3309 = vmatmul.mubr.f32.gmra.mxu0 %v11977_v58  ;;  %6580 = vmatprep.subr.mxu1 %v9526_v19  ;;  %v6107_v23 = vpop.f32.mrf.mxu0  ;;  %v6146_v10 = vadd.f32 %v6145_v27, %v6144_v6 }
 0x1cb   : > { %6581 = vmatpush3.msra.mxu1 %v9542_v60  ;;  %3314 = vmatprep.mubr.f32.mxu0 %v11978_v63  ;;  %v6108_v19 = vadd.f32 %v6107_v23, %v6106_v62  ;;  %v3600_v60 = vand.u32 4294901760, %v3599_v36 }
 0x1cc   : > { %6582 = vmatprep.subr.mxu1 %v9564_v0  ;;  %6873 = vmatpush3.msra.mxu0 %v9941_v4  ;;  %v10041_v61 = vadd.f32 %v6146_v10, %v1502_v14  ;;  %v3552_v0 = vand.u32 4294901760, %v10029_v42  ;;  %v10130_v10 = vand.u32 4294901760, %v4058_v1 }
 0x1cd   : > { %6583 = vmatpush3.msra.mxu1 %v11920_v38  ;;  %6874 = vmatprep.subr.mxu0 %v9951_v52  ;;  %v1532_v56 = vadd.f32 %v6108_v19, %v9904_v41  ;;  %v6109_v46 = vpop.f32.mrf.mxu0  ;;  %v11980_v38 = vld [vmem:[#allocation70_spill] sm:$0xff]  ;;  %v11981_v41 = vld [vmem:[#allocation71_spill] sm:$0xff] }
 0x1ce   : > { %3316 = vmatmul.mubr.f32.gmra.mxu0 %v11979_v5  ;;  %3427 = vmatmul.mubr.f32.vlgmr.msra.gmra.mxu1 %v11974_v32  ;;  %v6147_v55 = vpop.f32.mrf.mxu1  ;;  %v3553_v39 = vsub.f32 %v10029_v42, %v3552_v0  ;;  %11987 = vst [vmem:[#allocation38_spill] sm:$0xff] %v10130_v10  ;;  %v4057_v19 = vld [vmem:[#allocation5 + $0x370] sm:$0xff] }
 0x1cf   : > { %6882 = vmatprep.subr.mxu1 %v3593_v43  ;;  %3321 = vmatprep.mubr.f32.mxu0 %v11980_v38  ;;  %v6110_v16 = vpop.f32.mrf.mxu0  ;;  %v10143_v29 = vand.u32 4294901760, %v4057_v19 }
 0x1d0   : > { %6883 = vmatpush3.msra.mxu1 %v3593_v43  ;;  %3432 = vmatprep.mubr.f32.mxu1 %v11976_v26  ;;  %v6111_v31 = vadd.f32 %v6110_v16, %v6109_v46  ;;  %v6148_v20 = vpop.f32.mrf.mxu1  ;;  %v3554_v14 = vand.u32 4294901760, %v3553_v39  ;;  %v4054_v39 = vld [vmem:[#allocation5 + $0x358] sm:$0xff] }
 0x1d1   : > { %6875 = vmatpush3.msra.mxu0 %v9951_v52  ;;  %6884 = vmatprep.subr.mxu1 %v3600_v60  ;;  %v6149_v12 = vadd.f32 %v6148_v20, %v6147_v55  ;;  %11990 = vst [vmem:[#allocation29_spill] sm:$0xff] %v10143_v29  ;;  %v10154_v11 = vsub.f32 %v4057_v19, %v10143_v29  ;;  %v4055_v55 = vld [vmem:[#allocation5 + $0x360] sm:$0xff] }
 0x1d2   : > { %3323 = vmatmul.mubr.f32.gmra.mxu0 %v11981_v41  ;;  %3434 = vmatmul.mubr.f32.gmra.mxu1 %v11977_v58  ;;  %v1547_v25 = vadd.f32 %v6111_v31, %v9922_v18 }
 0x1d3   : > { %3439 = vmatprep.mubr.f32.mxu1 %v11978_v63  ;;  %6876 = vmatprep.mubr.f32.mxu0 %v3524_v30  ;;  %v1786_v37 = vadd.f32 %v6149_v12, %v1517_v45  ;;  %v6150_v48 = vpop.f32.mrf.mxu1  ;;  %11993 = vst [vmem:[#allocation12_spill] sm:$0xff] %v10154_v11 }
 0x1d4   : > { %6885 = vmatpush3.msra.mxu1 %v3600_v60  ;;  %6892 = vmatprep.subr.mxu0 %v9963_v3 }
 0x1d5   : > { %6902 = vmatprep.subr.mxu1 %v9941_v4  ;;  %v6151_v57 = vpop.f32.mrf.mxu1 }
 0x1d6   : > { %3441 = vmatmul.mubr.f32.gmra.mxu1 %v11979_v5  ;;  %6877 = vmatmul.mubr.f32.vlgmr.msra.gmra.mxu0 %v3534_v15  ;;  %v6152_v53 = vadd.f32 %v6151_v57, %v6150_v48  ;;  %v10140_v5 = vsub.f32 %v4058_v1, %v10130_v10  ;;  %v10166_v15 = vand.u32 4294901760, %v10154_v11  ;;  %v4048_v1 = vld [vmem:[#allocation5 + $0x328] sm:$0xff] }
 0x1d7   : > { %3446 = vmatprep.mubr.f32.mxu1 %v11980_v38  ;;  %6879 = vmatprep.mubr.f32.mxu0 %v3544_v50 }
 0x1d8   : > { %6893 = vmatpush3.msra.mxu0 %v9963_v3  ;;  %v1793_v18 = vadd.f32 %v6152_v53, %v1532_v56  ;;  %v6153_v28 = vpop.f32.mrf.mxu1  ;;  %11989 = vst [vmem:[#allocation14_spill] sm:$0xff] %v10140_v5  ;;  %v10149_v38 = vand.u32 4294901760, %v10140_v5  ;;  %11996 = vst [vmem:[#allocation47_spill] sm:$0xff] %v10166_v15  ;;  %v4211_v48 = vsub.f32 %v10154_v11, %v10166_v15 }
 0x1d9   : > { %6894 = vmatprep.subr.mxu0 %v9975_v2 }
 0x1da   : > { %3448 = vmatmul.mubr.f32.gmra.mxu1 %v11981_v41  ;;  %6880 = vmatmul.mubr.f32.gmra.mxu0 %v3554_v14  ;;  %v6154_v47 = vpop.f32.mrf.mxu1  ;;  %11991 = vst [vmem:[#allocation18_spill] sm:$0xff] %v10149_v38  ;;  %v4204_v31 = vsub.f32 %v10140_v5, %v10149_v38  ;;  %v10162_v41 = vand.u32 4294901760, %v4055_v55  ;;  %v4053_v14 = vld [vmem:[#allocation5 + $0x350] sm:$0xff] }
 0x1db   : > { %6886 = vmatprep.mubr.f32.mxu1 %v9957_v34  ;;  %6895 = vmatpush3.msra.mxu0 %v9975_v2  ;;  %v6155_v54 = vadd.f32 %v6154_v47, %v6153_v28  ;;  %v4212_v28 = vand.u32 4294901760, %v4211_v48  ;;  %v10190_v47 = vand.u32 4294901760, %v4053_v14 }
 0x1dc   : > { %6896 = vmatprep.mubr.f32.mxu0 %v9981_v51  ;;  %6912 = vmatprep.subr.mxu0 %v9989_v13  ;;  %11995 = vst [vmem:[#allocation19_spill] sm:$0xff] %v10162_v41  ;;  %v4205_v12 = vand.u32 4294901760, %v4204_v31 }
 0x1dd   : > { %v10076_v3 = vadd.f32 %v6155_v54, %v1547_v25  ;;  %v10173_v25 = vsub.f32 %v4055_v55, %v10162_v41  ;;  %12002 = vst [vmem:[#allocation32_spill] sm:$0xff] %v10190_v47  ;;  %v4052_v54 = vld [vmem:[#allocation5 + $0x348] sm:$0xff] }
 0x1de   : > { %6887 = vmatmul.mubr.f32.vlgmr.msra.gmra.mxu1 %v9983_v22  ;;  %6897 = vmatmul.mubr.f32.vlgmr.msra.gmra.mxu0 %v10006_v24 }
 0x1df   : > { %6903 = vmatpush3.msra.mxu1 %v9941_v4  ;;  %6889 = vmatprep.mubr.f32.mxu1 %v9991_v8  ;;  %11998 = vst [vmem:[#allocation31_spill] sm:$0xff] %v10173_v25  ;;  %v10184_v53 = vand.u32 4294901760, %v10173_v25 }
 0x1e0   : > { %6904 = vmatprep.subr.mxu1 %v9951_v52  ;;  %6899 = vmatprep.mubr.f32.mxu0 %v10016_v21 }
 0x1e1   : > { %6905 = vmatpush3.msra.mxu1 %v9951_v52  ;;  %6913 = vmatpush3.msra.mxu0 %v9989_v13  ;;  %12000 = vst [vmem:[#allocation13_spill] sm:$0xff] %v10184_v53 }
 0x1e2   : > { %6890 = vmatmul.mubr.f32.gmra.mxu1 %v10008_v9  ;;  %6900 = vmatmul.mubr.f32.gmra.mxu0 %v10029_v42  ;;  %v4060_v42 = vld [vmem:[#allocation5 + $0x388] sm:$0xff] }
 0x1e3   : > { %6906 = vmatprep.mubr.f32.mxu1 %v3522_v40  ;;  %6914 = vmatprep.subr.mxu0 %v10001_v33  ;;  %v10115_v27 = vand.u32 4294901760, %v4060_v42 }
 0x1e4   : > { %6922 = vmatprep.subr.mxu1 %v9941_v4  ;;  %6915 = vmatpush3.msra.mxu0 %v10001_v33 }
 0x1e5   : > { %6916 = vmatprep.mubr.f32.mxu0 %v9957_v34  ;;  %v6188_v2 = vpop.f32.mrf.mxu0  ;;  %11982 = vst [vmem:[#allocation22_spill] sm:$0xff] %v10115_v27  ;;  %v10118_v63 = vsub.f32 %v4060_v42, %v10115_v27  ;;  %6932 = vmatprep.subr.mxu0 %v10115_v27 }
 0x1e6   : > { %6907 = vmatmul.mubr.f32.vlgmr.msra.gmra.mxu1 %v3532_v7  ;;  %6917 = vmatmul.mubr.f32.vlgmr.msra.gmra.mxu0 %v9983_v22 }
 0x1e7   : > { %6923 = vmatpush3.msra.mxu1 %v9941_v4  ;;  %6909 = vmatprep.mubr.f32.mxu1 %v3542_v44  ;;  %v6189_v51 = vpop.f32.mrf.mxu0  ;;  %11983 = vst [vmem:[#allocation23_spill] sm:$0xff] %v10118_v63  ;;  %v10125_v44 = vand.u32 4294901760, %v10118_v63 }
 0x1e8   : > { %6924 = vmatprep.subr.mxu1 %v9951_v52  ;;  %6919 = vmatprep.mubr.f32.mxu0 %v9991_v8  ;;  %v6190_v13 = vadd.f32 %v6189_v51, %v6188_v2  ;;  %v4225_v51 = vsub.f32 %v10173_v25, %v10184_v53 }
 0x1e9   : > { %6925 = vmatpush3.msra.mxu1 %v9951_v52  ;;  %6933 = vmatpush3.msra.mxu0 %v10115_v27  ;;  %11985 = vst [vmem:[#allocation33_spill] sm:$0xff] %v10125_v44  ;;  %v4190_v60 = vsub.f32 %v10118_v63, %v10125_v44 }
 0x1ea   : > { %6910 = vmatmul.mubr.f32.gmra.mxu1 %v3552_v0  ;;  %6920 = vmatmul.mubr.f32.gmra.mxu0 %v10008_v9  ;;  %v1938_v4 = vadd.f32 %v6190_v13, %v10041_v61  ;;  %v6191_v33 = vpop.f32.mrf.mxu0  ;;  %v4056_v0 = vld [vmem:[#allocation5 + $0x368] sm:$0xff] }
 0x1eb   : > { %6926 = vmatprep.mubr.f32.mxu1 %v9957_v34  ;;  %v4191_v56 = vand.u32 4294901760, %v4190_v60  ;;  %v10151_v30 = vand.u32 4294901760, %v4056_v0 }
 0x1ec   : > { %v6192_v59 = vpop.f32.mrf.mxu0 }
 0x1ed   : > { %v6193_v32 = vadd.f32 %v6192_v59, %v6191_v33  ;;  %11992 = vst [vmem:[#allocation27_spill] sm:$0xff] %v10151_v30  ;;  %6970 = vmatprep.subr.mxu1 %v4191_v56  ;;  %v10160_v20 = vsub.f32 %v4056_v0, %v10151_v30  ;;  %v10202_v33 = vand.u32 4294901760, %v4052_v54  ;;  %v4051_v59 = vld [vmem:[#allocation5 + $0x340] sm:$0xff] }
 0x1ee   : > { %6927 = vmatmul.mubr.f32.vlgmr.msra.gmra.mxu1 %v9983_v22 }
 0x1ef   : > { %6929 = vmatprep.mubr.f32.mxu1 %v9991_v8  ;;  %v1947_v49 = vadd.f32 %v6193_v32, %v1786_v37  ;;  %v6232_v24 = vpop.f32.mrf.mxu1  ;;  %11994 = vst [vmem:[#allocation48_spill] sm:$0xff] %v10160_v20  ;;  %6971 = vmatpush3.msra.mxu1 %v4191_v56  ;;  %v10170_v50 = vand.u32 4294901760, %v10160_v20  ;;  %v10175_v37 = vand.u32 4294901760, %v4054_v39  ;;  %12005 = vst [vmem:[#allocation39_spill] sm:$0xff] %v10202_v33  ;;  %v4226_v32 = vand.u32 4294901760, %v4225_v51 }
 0x1f0   : > { %v6194_v52 = vpop.f32.mrf.mxu0  ;;  %v10249_v56 = vand.u32 4294901760, %v4048_v1 }
 0x1f1   : > { %v6233_v17 = vpop.f32.mrf.mxu1  ;;  %11997 = vst [vmem:[#allocation34_spill] sm:$0xff] %v10170_v50  ;;  %11999 = vst [vmem:[#allocation53_spill] sm:$0xff] %v10175_v37  ;;  %v4218_v57 = vsub.f32 %v10160_v20, %v10170_v50 }
 0x1f2   : > { %6930 = vmatmul.mubr.f32.gmra.mxu1 %v10008_v9  ;;  %v6195_v26 = vpop.f32.mrf.mxu0  ;;  %v6234_v35 = vadd.f32 %v6233_v17, %v6232_v24  ;;  %v4059_v9 = vld [vmem:[#allocation5 + $0x380] sm:$0xff]  ;;  %v10207_v24 = vand.u32 4294901760, %v4051_v59  ;;  %v10214_v17 = vsub.f32 %v4052_v54, %v10202_v33  ;;  %12017 = vst [vmem:[#allocation41_spill] sm:$0xff] %v10249_v56  ;;  %v10262_v48 = vsub.f32 %v4048_v1, %v10249_v56 }
 0x1f3   : > { %v6196_v40 = vadd.f32 %v6195_v26, %v6194_v52  ;;  %v10120_v43 = vand.u32 4294901760, %v4059_v9  ;;  %v4219_v2 = vand.u32 4294901760, %v4218_v57  ;;  %v4050_v26 = vld [vmem:[#allocation5 + $0x338] sm:$0xff] }
 0x1f4   : > { %v10109_v21 = vadd.f32 %v6234_v35, %v1938_v4  ;;  %v10200_v4 = vsub.f32 %v4053_v14, %v10190_v47  ;;  %12006 = vst [vmem:[#allocation56_spill] sm:$0xff] %v10207_v24  ;;  %12008 = vst [vmem:[#allocation44_spill] sm:$0xff] %v10214_v17  ;;  %v4046_v57 = vld [vmem:[#allocation5 + $0x318] sm:$0xff] }
 0x1f5   : > { %v1956_v34 = vadd.f32 %v6196_v40, %v1793_v18  ;;  %11984 = vst [vmem:[#allocation25_spill] sm:$0xff] %v10120_v43  ;;  %v10128_v23 = vsub.f32 %v4059_v9, %v10120_v43  ;;  %6934 = vmatprep.subr.mxu0 %v10120_v43  ;;  %v10187_v18 = vsub.f32 %v4054_v39, %v10175_v37  ;;  %12019 = vst [vmem:[#allocation28_spill] sm:$0xff] %v10262_v48 }
 0x1f6   : > { %v6235_v45 = vpop.f32.mrf.mxu1  ;;  %6935 = vmatpush3.msra.mxu0 %v10120_v43  ;;  %12004 = vst [vmem:[#allocation40_spill] sm:$0xff] %v10200_v4  ;;  %v10211_v52 = vand.u32 4294901760, %v10200_v4  ;;  %v10218_v40 = vsub.f32 %v4051_v59, %v10207_v24  ;;  %v10275_v59 = vand.u32 4294901760, %v10262_v48 }
 0x1f7   : > { %11986 = vst [vmem:[#allocation26_spill] sm:$0xff] %v10128_v23  ;;  %v10137_v61 = vand.u32 4294901760, %v10128_v23  ;;  %6936 = vmatprep.subr.mxu0 %v10130_v10  ;;  %12001 = vst [vmem:[#allocation50_spill] sm:$0xff] %v10187_v18  ;;  %v10196_v13 = vand.u32 4294901760, %v10187_v18 }
 0x1f8   : > { %v6236_v6 = vpop.f32.mrf.mxu1  ;;  %6937 = vmatpush3.msra.mxu0 %v10130_v10  ;;  %12007 = vst [vmem:[#allocation30_spill] sm:$0xff] %v10211_v52  ;;  %12009 = vst [vmem:[#allocation57_spill] sm:$0xff] %v10218_v40 }
 0x1f9   : > { %v6237_v36 = vadd.f32 %v6236_v6, %v6235_v45  ;;  %11988 = vst [vmem:[#allocation36_spill] sm:$0xff] %v10137_v61  ;;  %v4197_v46 = vsub.f32 %v10128_v23, %v10137_v61  ;;  %6938 = vmatprep.subr.mxu0 %v10143_v29  ;;  %12003 = vst [vmem:[#allocation35_spill] sm:$0xff] %v10196_v13  ;;  %v4239_v45 = vsub.f32 %v10200_v4, %v10211_v52 }
 0x1fa   : > { %6939 = vmatpush3.msra.mxu0 %v10143_v29  ;;  %v10226_v6 = vand.u32 4294901760, %v10214_v17  ;;  %12022 = vst [vmem:[#allocation63_spill] sm:$0xff] %v10275_v59 }
 0x1fb   : > { %v10111_v62 = vadd.f32 %v6237_v36, %v1947_v49  ;;  %v6238_v22 = vpop.f32.mrf.mxu1  ;;  %v4198_v16 = vand.u32 4294901760, %v4197_v46  ;;  %6940 = vmatprep.subr.mxu0 %v10151_v30  ;;  %v4232_v49 = vsub.f32 %v10187_v18, %v10196_v13  ;;  %v4049_v36 = vld [vmem:[#allocation5 + $0x330] sm:$0xff]  ;;  %v4240_v42 = vand.u32 4294901760, %v4239_v45  ;;  %v10252_v46 = vpop.f32.mrf.mxu0 }
 0x1fc   : > { %6941 = vmatpush3.msra.mxu0 %v10151_v30  ;;  %12011 = vst [vmem:[#allocation45_spill] sm:$0xff] %v10226_v6  ;;  %v4246_v9 = vsub.f32 %v10214_v17, %v10226_v6 }
 0x1fd   : > { %v6239_v58 = vpop.f32.mrf.mxu1  ;;  %6972 = vmatprep.subr.mxu1 %v4198_v16  ;;  %6942 = vmatprep.subr.mxu0 %v10162_v41  ;;  %v4233_v35 = vand.u32 4294901760, %v4232_v49  ;;  %v10272_v51 = vpop.f32.mrf.mxu0  ;;  %v4045_v49 = vld [vmem:[#allocation5 + $0x310] sm:$0xff] }
 0x1fe   : > { %v6240_v8 = vadd.f32 %v6239_v58, %v6238_v22  ;;  %6973 = vmatpush3.msra.mxu1 %v4198_v16  ;;  %6943 = vmatpush3.msra.mxu0 %v10162_v41  ;;  %v10230_v22 = vand.u32 4294901760, %v10218_v40  ;;  %v4247_v55 = vand.u32 4294901760, %v4246_v9  ;;  %v4047_v16 = vld [vmem:[#allocation5 + $0x320] sm:$0xff]  ;;  %v10284_v45 = vand.u32 4294901760, %v4045_v49 }
 0x1ff   : > { %6974 = vmatprep.subr.mxu1 %v4205_v12  ;;  %6944 = vmatprep.subr.mxu0 %v10175_v37  ;;  %v10264_v14 = vand.u32 4294901760, %v4047_v16  ;;  %v6199_v23 = vadd.f32 %v10272_v51, %v10252_v46 }
 0x200   : > { %v10113_v7 = vadd.f32 %v6240_v8, %v1956_v34  ;;  %6975 = vmatpush3.msra.mxu1 %v4205_v12  ;;  %6945 = vmatpush3.msra.mxu0 %v10175_v37  ;;  %v10220_v34 = vand.u32 4294901760, %v4050_v26  ;;  %12012 = vst [vmem:[#allocation60_spill] sm:$0xff] %v10230_v22  ;;  %v10235_v8 = vand.u32 4294901760, %v4049_v36  ;;  %v4253_v19 = vsub.f32 %v10218_v40, %v10230_v22 }
 0x201   : > { %6976 = vmatprep.subr.mxu1 %v4212_v28  ;;  %6946 = vmatprep.subr.mxu0 %v10190_v47  ;;  %12020 = vst [vmem:[#allocation37_spill] sm:$0xff] %v10264_v14  ;;  %12025 = vst [vmem:[#allocation46_spill] sm:$0xff] %v10284_v45 }
 0x202   : > { %6977 = vmatpush3.msra.mxu1 %v4212_v28  ;;  %6947 = vmatpush3.msra.mxu0 %v10190_v47  ;;  %12010 = vst [vmem:[#allocation62_spill] sm:$0xff] %v10220_v34  ;;  %v10233_v58 = vsub.f32 %v4050_v26, %v10220_v34  ;;  %12014 = vst [vmem:[#allocation54_spill] sm:$0xff] %v10235_v8  ;;  %v10247_v0 = vsub.f32 %v4049_v36, %v10235_v8  ;;  %v4254_v31 = vand.u32 4294901760, %v4253_v19 }
 0x203   : > { %6978 = vmatprep.subr.mxu1 %v4219_v2  ;;  %6948 = vmatprep.subr.mxu0 %v10202_v33  ;;  %v10299_v19 = vsub.f32 %v4045_v49, %v10284_v45 }
 0x204   : > { %6979 = vmatpush3.msra.mxu1 %v4219_v2  ;;  %6949 = vmatpush3.msra.mxu0 %v10202_v33  ;;  %12013 = vst [vmem:[#allocation15_spill] sm:$0xff] %v10233_v58  ;;  %v10244_v60 = vand.u32 4294901760, %v10233_v58  ;;  %12016 = vst [vmem:[#allocation24_spill] sm:$0xff] %v10247_v0  ;;  %v10258_v12 = vand.u32 4294901760, %v10247_v0  ;;  %v10269_v2 = vand.u32 4294901760, %v4046_v57 }
 0x205   : > { %6980 = vmatprep.subr.mxu1 %v4226_v32  ;;  %6950 = vmatprep.subr.mxu0 %v10207_v24  ;;  %12028 = vst [vmem:[#allocation17_spill] sm:$0xff] %v10299_v19 }
 0x206   : > { %6981 = vmatpush3.msra.mxu1 %v4226_v32  ;;  %6951 = vmatpush3.msra.mxu0 %v10207_v24  ;;  %12015 = vst [vmem:[#allocation21_spill] sm:$0xff] %v10244_v60  ;;  %v4260_v39 = vsub.f32 %v10233_v58, %v10244_v60  ;;  %12018 = vst [vmem:[#allocation55_spill] sm:$0xff] %v10258_v12  ;;  %v4267_v54 = vsub.f32 %v10247_v0, %v10258_v12 }
 0x207   : > { %6982 = vmatprep.subr.mxu1 %v4233_v35  ;;  %6952 = vmatprep.subr.mxu0 %v10220_v34  ;;  %12021 = vst [vmem:[#allocation43_spill] sm:$0xff] %v10269_v2  ;;  %v10278_v32 = vsub.f32 %v4047_v16, %v10264_v14 }
 0x208   : > { %6983 = vmatpush3.msra.mxu1 %v4233_v35  ;;  %6953 = vmatpush3.msra.mxu0 %v10220_v34  ;;  %v4261_v28 = vand.u32 4294901760, %v4260_v39  ;;  %v4268_v26 = vand.u32 4294901760, %v4267_v54  ;;  %v10282_v35 = vsub.f32 %v4046_v57, %v10269_v2  ;;  %v10310_v57 = vand.u32 4294901760, %v10299_v19 }
 0x209   : > { %6984 = vmatprep.subr.mxu1 %v4240_v42  ;;  %6954 = vmatprep.subr.mxu0 %v10235_v8  ;;  %12023 = vst [vmem:[#allocation51_spill] sm:$0xff] %v10278_v32  ;;  %v10292_v9 = vand.u32 4294901760, %v10278_v32 }
 0x20a   : > { %6985 = vmatpush3.msra.mxu1 %v4240_v42  ;;  %6955 = vmatpush3.msra.mxu0 %v10235_v8  ;;  %12024 = vst [vmem:[#allocation59_spill] sm:$0xff] %v10282_v35  ;;  %v4274_v42 = vsub.f32 %v10262_v48, %v10275_v59  ;;  %v10296_v1 = vand.u32 4294901760, %v10282_v35  ;;  %12029 = vst [vmem:[#allocation68_spill] sm:$0xff] %v10310_v57 }
 0x20b   : > { %6986 = vmatprep.subr.mxu1 %v4247_v55  ;;  %6956 = vmatprep.subr.mxu0 %v10249_v56  ;;  %12026 = vst [vmem:[#allocation16_spill] sm:$0xff] %v10292_v9 }
 0x20c   : > { %6987 = vmatpush3.msra.mxu1 %v4247_v55  ;;  %6957 = vmatpush3.msra.mxu0 %v10249_v56  ;;  %12027 = vst [vmem:[#allocation64_spill] sm:$0xff] %v10296_v1  ;;  %v10302_v55 = vpop.f32.mrf.mxu1  ;;  %v4275_v16 = vand.u32 4294901760, %v4274_v42  ;;  %v4288_v39 = vsub.f32 %v10282_v35, %v10296_v1  ;;  %v4295_v42 = vsub.f32 %v10299_v19, %v10310_v57 }
 0x20d   : > { %6988 = vmatprep.subr.mxu1 %v4254_v31  ;;  %6958 = vmatprep.subr.mxu0 %v10264_v14  ;;  %v10287_v36 = vpop.f32.mrf.mxu0 }
 0x20e   : > { %6989 = vmatpush3.msra.mxu1 %v4254_v31  ;;  %6959 = vmatpush3.msra.mxu0 %v10264_v14  ;;  %v4281_v31 = vsub.f32 %v10278_v32, %v10292_v9  ;;  %v4289_v49 = vand.u32 4294901760, %v4288_v39  ;;  %v4296_v1 = vand.u32 4294901760, %v4295_v42 }
 0x20f   : > { %6990 = vmatprep.subr.mxu1 %v4261_v28  ;;  %6960 = vmatprep.subr.mxu0 %v10269_v2 }
 0x210   : > { %6991 = vmatpush3.msra.mxu1 %v4261_v28  ;;  %6961 = vmatpush3.msra.mxu0 %v10269_v2  ;;  %v10313_v28 = vpop.f32.mrf.mxu0  ;;  %v4282_v54 = vand.u32 4294901760, %v4281_v31 }
 0x211   : > { %6992 = vmatprep.subr.mxu1 %v4268_v26  ;;  %6962 = vmatprep.subr.mxu0 %v10284_v45 }
 0x212   : > { %6993 = vmatpush3.msra.mxu1 %v4268_v26  ;;  %6963 = vmatpush3.msra.mxu0 %v10284_v45  ;;  %v6242_v26 = vpop.f32.mrf.mxu1  ;;  %v6279_v9 = vpop.f32.mrf.mxu0 }
 0x213   : > { %6994 = vmatprep.subr.mxu1 %v4275_v16  ;;  %7008 = vmatprep.subr.mxu0 %v10118_v63  ;;  %v6243_v30 = vadd.f32 %v6242_v26, %v10302_v55 }
 0x214   : > { %6995 = vmatpush3.msra.mxu1 %v4275_v16  ;;  %v6280_v12 = vpop.f32.mrf.mxu0 }
 0x215   : > { %6996 = vmatprep.subr.mxu1 %v4282_v54  ;;  %v6281_v29 = vadd.f32 %v6280_v12, %v6279_v9 }
 0x216   : > { %6997 = vmatpush3.msra.mxu1 %v4282_v54 }
 0x217   : > { %v10318_v59 = vpop.f32.mrf.mxu1  ;;  %6998 = vmatprep.subr.mxu1 %v4289_v49  ;;  %v2281_v46 = vadd.f32 %v6281_v29, %v10111_v62 }
 0x218   : > { %6999 = vmatpush3.msra.mxu1 %v4289_v49  ;;  %v6282_v16 = vpop.f32.mrf.mxu0 }
 0x219   : > { %7000 = vmatprep.subr.mxu1 %v4296_v1  ;;  %v6321_v31 = vpop.f32.mrf.mxu1 }
 0x21a   : > { %7001 = vmatpush3.msra.mxu1 %v4296_v1  ;;  %v6283_v60 = vpop.f32.mrf.mxu0  ;;  %v6322_v12 = vadd.f32 %v6321_v31, %v10318_v59 }
 0x21b   : > { %7046 = vmatprep.subr.mxu1 %v10115_v27  ;;  %v1965_v27 = vadd.f32 %v6199_v23, %v10076_v3  ;;  %v6284_v55 = vadd.f32 %v6283_v60, %v6282_v16 }
 0x21d   : > { %v6323_v39 = vpop.f32.mrf.mxu1  ;;  %v6285_v57 = vpop.f32.mrf.mxu0 }
 0x21f   : > { %v6324_v22 = vpop.f32.mrf.mxu1  ;;  %v6286_v54 = vpop.f32.mrf.mxu0 }
 0x222   : > { %v10321_v6 = vpop.f32.mrf.mxu1 }
 0x224   : > { %v6327_v42 = vpop.f32.mrf.mxu1 }
 0x227   : > { %v6329_v13 = vpop.f32.mrf.mxu1 }
 0x229   : > { %v6330_v50 = vpop.f32.mrf.mxu1 }
 0x22a   : > { %v6331_v51 = vadd.f32 %v6330_v50, %v6329_v13  ;;  %v2288_v13 = vadd.f32 %v6284_v55, %v10113_v7 }
 0x234   : > { %v6364_v52 = vpop.f32.mrf.mxu0 }
 0x236   : > { %v6365_v53 = vpop.f32.mrf.mxu0 }
 0x23a   : > { %v6367_v49 = vpop.f32.mrf.mxu0 }
 0x23c   : > { %v6368_v1 = vpop.f32.mrf.mxu0 }
 0x240   : > { %v10323_v15 = vpop.f32.mrf.mxu1 }
 0x241   : > { %v6370_v61 = vpop.f32.mrf.mxu0 }
 0x242   : > { %v10325_v38 = vpop.f32.mrf.mxu1 }
 0x243   : > { %v6371_v19 = vpop.f32.mrf.mxu0 }
 0x244   : > { %v6372_v59 = vadd.f32 %v6371_v19, %v6370_v61 }
 0x246   : > { %v6373_v32 = vpop.f32.mrf.mxu0 }
 0x247   : > { %v6411_v44 = vpop.f32.mrf.mxu1 }
 0x248   : > { %v6374_v45 = vpop.f32.mrf.mxu0 }
 0x249   : > { %v6412_v35 = vpop.f32.mrf.mxu1 }
 0x24c   : > { %v10327_v48 = vpop.f32.mrf.mxu1 }
 0x24e   : > { %v10329_v0 = vpop.f32.mrf.mxu1 }
 0x251   : > { %v6417_v58 = vpop.f32.mrf.mxu1 }
 0x253   : > { %v6418_v40 = vpop.f32.mrf.mxu1 }
 0x254   : > { %v6419_v29 = vadd.f32 %v6418_v40, %v6417_v58 }
 0x25e   : > { %v10331_v2 = vpop.f32.mrf.mxu0 }
 0x260   : > { %v10333_v14 = vpop.f32.mrf.mxu0 }
 0x261   : > { %v6454_v40 = vadd.f32 %v10333_v14, %v10331_v2 }
 0x263   : > { %v6455_v56 = vpop.f32.mrf.mxu0 }
 0x265   : > { %v6456_v8 = vpop.f32.mrf.mxu0 }
 0x266   : > { %v6457_v50 = vadd.f32 %v6456_v8, %v6455_v56 }
 0x268   : > { %v10335_v17 = vpop.f32.mrf.mxu1 }
 0x269   : > { %12030 = vst [vmem:[#allocation66_spill] sm:$0xff] %v10335_v17  ;;  %v10339_v34 = vpop.f32.mrf.mxu0 }
 0x26a   : > { %v10337_v4 = vpop.f32.mrf.mxu1 }
 0x26b   : > { %12031 = vst [vmem:[#allocation49_spill] sm:$0xff] %v10337_v4  ;;  %v10341_v24 = vpop.f32.mrf.mxu0  ;;  %v6325_v4 = vadd.f32 %v6324_v22, %v6323_v39  ;;  %v6375_v22 = vadd.f32 %v6374_v45, %v6373_v32  ;;  %v6366_v39 = vadd.f32 %v6365_v53, %v6364_v52 }
 0x26c   : > { %12032 = vst [vmem:[#allocation42_spill] sm:$0xff] %v10341_v24  ;;  %v6369_v24 = vadd.f32 %v6368_v1, %v6367_v49 }
 0x26d   : > { %v2406_v23 = vadd.f32 %v6325_v4, %v2281_v46 }
 0x26e   : > { %v6461_v33 = vpop.f32.mrf.mxu0 }
 0x26f   : > { %v6499_v18 = vpop.f32.mrf.mxu1  ;;  %v2547_v62 = vadd.f32 %v6369_v24, %v2406_v23  ;;  %v6416_v24 = vadd.f32 %v10329_v0, %v10327_v48 }
 0x270   : > { %v6462_v47 = vpop.f32.mrf.mxu0 }
 0x271   : > { %v6500_v25 = vpop.f32.mrf.mxu1 }
 0x274   : > { %v10343_v20 = vpop.f32.mrf.mxu1 }
 0x275   : > { %12033 = vst [vmem:[#allocation58_spill] sm:$0xff] %v10343_v20  ;;  %v6287_v20 = vadd.f32 %v6286_v54, %v6285_v57  ;;  %v6413_v57 = vadd.f32 %v6412_v35, %v6411_v44  ;;  %v12037_v35 = vld [vmem:[#allocation42_spill] sm:$0xff] }
 0x276   : > { %v10345_v11 = vpop.f32.mrf.mxu1 }
 0x277   : > { %12034 = vst [vmem:[#allocation52_spill] sm:$0xff] %v10345_v11  ;;  %v6278_v11 = vadd.f32 %v10313_v28, %v10287_v36  ;;  %v6328_v28 = vadd.f32 %v6327_v42, %v10321_v6  ;;  %v6501_v6 = vadd.f32 %v6500_v25, %v6499_v18  ;;  %v12038_v25 = vld [vmem:[#allocation66_spill] sm:$0xff]  ;;  %v12039_v18 = vld [vmem:[#allocation49_spill] sm:$0xff] }
 0x279   : > { %v6505_v5 = vpop.f32.mrf.mxu1  ;;  %v2274_v36 = vadd.f32 %v6278_v11, %v10109_v21  ;;  %v2816_v21 = vadd.f32 %v6413_v57, %v2547_v62  ;;  %v6463_v11 = vadd.f32 %v6462_v47, %v6461_v33  ;;  %v2413_v53 = vadd.f32 %v6328_v28, %v2288_v13 }
 0x27a   : > { %v6460_v47 = vadd.f32 %v12037_v35, %v10339_v34  ;;  %v6498_v33 = vadd.f32 %v12039_v18, %v12038_v25 }
 0x27b   : > { %v6506_v10 = vpop.f32.mrf.mxu1  ;;  %v2399_v60 = vadd.f32 %v6322_v12, %v2274_v36  ;;  %v2977_v8 = vadd.f32 %v6457_v50, %v2816_v21 }
 0x27c   : > { %v6507_v56 = vadd.f32 %v6506_v10, %v6505_v5  ;;  %v12040_v10 = vld [vmem:[#allocation58_spill] sm:$0xff] }
 0x27d   : > { %v2532_v52 = vadd.f32 %v6366_v39, %v2399_v60  ;;  %v3114_v48 = vadd.f32 %v6501_v6, %v2977_v8 }
 0x286   : > { %v10347_v37 = vpop.f32.mrf.mxu0 }
 0x287   : > { %12035 = vst [vmem:[#allocation61_spill] sm:$0xff] %v10347_v37 }
 0x288   : > { %v10349_v41 = vpop.f32.mrf.mxu0 }
 0x289   : > { %12036 = vst [vmem:[#allocation65_spill] sm:$0xff] %v10349_v41  ;;  %v2106_v41 = vadd.f32 %v6243_v30, %v1965_v27 }
 0x28a   : > { %v6543_v63 = vpop.f32.mrf.mxu0 }
 0x28b   : > { %v2295_v3 = vadd.f32 %v6287_v20, %v2106_v41  ;;  %v6410_v20 = vadd.f32 %v10325_v38, %v10323_v15  ;;  %v2562_v15 = vadd.f32 %v6372_v59, %v2413_v53 }
 0x28c   : > { %v6544_v43 = vpop.f32.mrf.mxu0 }
 0x28d   : > { %v2420_v30 = vadd.f32 %v6331_v51, %v2295_v3  ;;  %v6545_v38 = vadd.f32 %v6544_v43, %v6543_v63  ;;  %v2809_v32 = vadd.f32 %v6410_v20, %v2532_v52  ;;  %v2823_v2 = vadd.f32 %v6416_v24, %v2562_v15  ;;  %v12041_v63 = vld [vmem:[#allocation52_spill] sm:$0xff] }
 0x28e   : > { %v10357_v37 = vpop.f32.mrf.mxu0  ;;  %v10359_v17 = vpop.f32.mrf.mxu1  ;;  %v6504_v43 = vadd.f32 %v12041_v63, %v12040_v10  ;;  %v12042_v1 = vld [vmem:[#allocation61_spill] sm:$0xff] }
 0x28f   : > { %v2577_v4 = vadd.f32 %v6375_v22, %v2420_v30  ;;  %v2968_v16 = vadd.f32 %v6454_v40, %v2809_v32  ;;  %v3311_v51 = vadd.f32 %v6545_v38, %v3114_v48  ;;  %v2986_v55 = vadd.f32 %v6460_v47, %v2823_v2 }
 0x290   : > { %v6547_v9 = vpop.f32.mrf.mxu0  ;;  %v6585_v26 = vpop.f32.mrf.mxu1  ;;  %v12043_v46 = vld [vmem:[#allocation65_spill] sm:$0xff] }
 0x291   : > { %v2830_v61 = vadd.f32 %v6419_v29, %v2577_v4  ;;  %v6542_v34 = vadd.f32 %v12043_v46, %v12042_v1  ;;  %v3103_v12 = vadd.f32 %v6498_v33, %v2968_v16  ;;  %v6548_v3 = vadd.f32 %v6547_v9, %v10357_v37 }
 0x292   : > { %v6549_v54 = vpop.f32.mrf.mxu0  ;;  %v6587_v27 = vpop.f32.mrf.mxu1  ;;  %v6586_v57 = vadd.f32 %v6585_v26, %v10359_v17  ;;  %v3125_v30 = vadd.f32 %v6504_v43, %v2986_v55 }
 0x293   : > { %v2995_v0 = vadd.f32 %v6463_v11, %v2830_v61  ;;  %v3304_v62 = vadd.f32 %v6542_v34, %v3103_v12 }
 0x294   : > { %v6550_v41 = vpop.f32.mrf.mxu0  ;;  %v6588_v44 = vpop.f32.mrf.mxu1  ;;  %v3318_v59 = vadd.f32 %v6548_v3, %v3125_v30  ;;  %v12045_v30 = vld [vmem:[#allocation25_spill] sm:$0xff] }
 0x295   : > { %v6551_v31 = vadd.f32 %v6550_v41, %v6549_v54  ;;  %v6589_v14 = vadd.f32 %v6588_v44, %v6587_v27  ;;  %v3136_v5 = vadd.f32 %v6507_v56, %v2995_v0  ;;  %v3429_v41 = vadd.f32 %v6586_v57, %v3304_v62 }
 0x296   : > { %v6590_v7 = vpop.f32.mrf.mxu1  ;;  %v6878_v58 = vpop.f32.mrf.mxu0 }
 0x297   : > { %v3325_v36 = vadd.f32 %v6551_v31, %v3136_v5  ;;  %v3436_v28 = vadd.f32 %v6589_v14, %v3311_v51 }
 0x298   : > { %v6591_v45 = vpop.f32.mrf.mxu1  ;;  %v3526_v19 = vpop.f32.mrf.mxu0 }
 0x299   : > { %v6592_v29 = vadd.f32 %v6591_v45, %v6590_v7  ;;  %v3537_v20 = vadd.f32 %v6878_v58, %v3436_v28  ;;  %v3527_v9 = vadd.f32 %v3526_v19, %v3429_v41  ;;  %v12047_v41 = vld [vmem:[#allocation29_spill] sm:$0xff] }
 0x29a   : > { %v6593_v42 = vpop.f32.mrf.mxu1  ;;  %v6881_v49 = vpop.f32.mrf.mxu0 }
 0x29b   : > { %v3443_v4 = vadd.f32 %v6592_v29, %v3318_v59 }
 0x29c   : > { %v6594_v23 = vpop.f32.mrf.mxu1  ;;  %v3546_v22 = vpop.f32.mrf.mxu0 }
 0x29d   : > { %v6595_v39 = vadd.f32 %v6594_v23, %v6593_v42  ;;  %v3547_v24 = vadd.f32 %v3546_v22, %v3443_v4  ;;  %v12049_v4 = vld [vmem:[#allocation23_spill] sm:$0xff] }
 0x29e   : > { %v6888_v54 = vpop.f32.mrf.mxu1  ;;  %v6898_v27 = vpop.f32.mrf.mxu0 }
 0x29f   : > { %v3450_v50 = vadd.f32 %v6595_v39, %v3325_v36  ;;  %v3644_v21 = vadd.f32 %v6888_v54, %v3537_v20  ;;  %v12044_v39 = vld [vmem:[#allocation22_spill] sm:$0xff] }
 0x2a0   : > { %v3637_v13 = vpop.f32.mrf.mxu1  ;;  %v3731_v60 = vpop.f32.mrf.mxu0 }
 0x2a1   : > { %v3557_v17 = vadd.f32 %v6881_v49, %v3450_v50  ;;  %v3638_v6 = vadd.f32 %v3637_v13, %v3527_v9  ;;  %v3739_v40 = vadd.f32 %v6898_v27, %v3644_v21  ;;  %v12046_v13 = vld [vmem:[#allocation38_spill] sm:$0xff]  ;;  %v12048_v9 = vld [vmem:[#allocation27_spill] sm:$0xff] }
 0x2a2   : > { %v6891_v44 = vpop.f32.mrf.mxu1  ;;  %v6901_v37 = vpop.f32.mrf.mxu0 }
 0x2a3   : > { %v3656_v7 = vadd.f32 %v6891_v44, %v3557_v17  ;;  %v3732_v56 = vadd.f32 %v3731_v60, %v3638_v6  ;;  %v12050_v17 = vld [vmem:[#allocation26_spill] sm:$0xff] }
 0x2a4   : > { %v3649_v26 = vpop.f32.mrf.mxu1  ;;  %v3745_v11 = vpop.f32.mrf.mxu0  ;;  %v12052_v6 = vld [vmem:[#allocation14_spill] sm:$0xff] }
 0x2a5   : > { %v3650_v38 = vadd.f32 %v3649_v26, %v3547_v24  ;;  %v3753_v32 = vadd.f32 %v6901_v37, %v3656_v7  ;;  %v12051_v26 = vld [vmem:[#allocation19_spill] sm:$0xff]  ;;  %v12055_v24 = vld [vmem:[#allocation32_spill] sm:$0xff] }
 0x2a6   : > { %v6908_v53 = vpop.f32.mrf.mxu1  ;;  %v6918_v52 = vpop.f32.mrf.mxu0  ;;  %v12057_v7 = vld [vmem:[#allocation39_spill] sm:$0xff] }
 0x2a7   : > { %v3836_v58 = vadd.f32 %v6908_v53, %v3739_v40  ;;  %v3746_v18 = vadd.f32 %v3745_v11, %v3650_v38  ;;  %v12053_v53 = vld [vmem:[#allocation53_spill] sm:$0xff]  ;;  %v12056_v40 = vld [vmem:[#allocation48_spill] sm:$0xff]  ;;  %v12061_v38 = vld [vmem:[#allocation62_spill] sm:$0xff] }
 0x2a8   : > { %v3827_v61 = vpop.f32.mrf.mxu1  ;;  %v3928_v8 = vpop.f32.mrf.mxu0 }
 0x2a9   : > { %v3828_v35 = vadd.f32 %v3827_v61, %v3732_v56  ;;  %v3935_v33 = vadd.f32 %v6918_v52, %v3836_v58  ;;  %v12054_v52 = vld [vmem:[#allocation12_spill] sm:$0xff]  ;;  %v12058_v61 = vld [vmem:[#allocation31_spill] sm:$0xff]  ;;  %v12060_v56 = vld [vmem:[#allocation50_spill] sm:$0xff] }
 0x2aa   : > { %v6911_v15 = vpop.f32.mrf.mxu1  ;;  %v6921_v25 = vpop.f32.mrf.mxu0  ;;  %v12062_v58 = vld [vmem:[#allocation40_spill] sm:$0xff] }
 0x2ab   : > { %v3852_v45 = vadd.f32 %v6911_v15, %v3753_v32  ;;  %v3929_v0 = vadd.f32 %v3928_v8, %v3828_v35  ;;  %v12059_v8 = vld [vmem:[#allocation56_spill] sm:$0xff]  ;;  %v12063_v15 = vld [vmem:[#allocation54_spill] sm:$0xff]  ;;  %v12065_v35 = vld [vmem:[#allocation41_spill] sm:$0xff] }
 0x2ac   : > { %v3843_v47 = vpop.f32.mrf.mxu1  ;;  %v3940_v14 = vpop.f32.mrf.mxu0  ;;  %v12064_v32 = vld [vmem:[#allocation44_spill] sm:$0xff] }
 0x2ad   : > { %v3844_v48 = vadd.f32 %v3843_v47, %v3746_v18  ;;  %v3947_v16 = vadd.f32 %v6921_v25, %v3852_v45  ;;  %v12066_v47 = vld [vmem:[#allocation57_spill] sm:$0xff]  ;;  %v12068_v18 = vld [vmem:[#allocation15_spill] sm:$0xff]  ;;  %v12070_v45 = vld [vmem:[#allocation24_spill] sm:$0xff] }
 0x2ae   : > { %v6928_v19 = vpop.f32.mrf.mxu1  ;;  %v12067_v25 = vld [vmem:[#allocation37_spill] sm:$0xff] }
 0x2af   : > { %v4026_v31 = vadd.f32 %v6928_v19, %v3935_v33  ;;  %v3941_v63 = vadd.f32 %v3940_v14, %v3844_v48  ;;  %v12069_v33 = vld [vmem:[#allocation43_spill] sm:$0xff]  ;;  %v12071_v19 = vld [vmem:[#allocation46_spill] sm:$0xff]  ;;  %v12075_v14 = vld [vmem:[#allocation17_spill] sm:$0xff] }
 0x2b0   : > { %v4019_v2 = vpop.f32.mrf.mxu1  ;;  %v12073_v48 = vld [vmem:[#allocation51_spill] sm:$0xff] }
 0x2b1   : > { %v4042_v42 = vmax.f32 %v4026_v31, 0.0  ;;  %v4020_v49 = vadd.f32 %v4019_v2, %v3929_v0  ;;  %v12072_v0 = vld [vmem:[#allocation28_spill] sm:$0xff]  ;;  %v12074_v31 = vld [vmem:[#allocation59_spill] sm:$0xff]  ;;  %v12076_v2 = vld [vmem:[#allocation33_spill] sm:$0xff] }
 0x2b2   : > { %v6931_v10 = vpop.f32.mrf.mxu1 }
 0x2b3   : > { %v10382_v43 = vand.u32 4294901760, %v4042_v42  ;;  %v4041_v5 = vmax.f32 %v4020_v49, 0.0  ;;  %v4038_v1 = vadd.f32 %v6931_v10, %v3947_v16  ;;  %v12077_v16 = vld [vmem:[#allocation36_spill] sm:$0xff]  ;;  %v12079_v49 = vld [vmem:[#allocation47_spill] sm:$0xff]  ;;  %v12080_v10 = vld [vmem:[#allocation34_spill] sm:$0xff] }
 0x2b4   : > { %v4031_v46 = vpop.f32.mrf.mxu1 }
 0x2b5   : > { %v10385_v34 = vsub.f32 %v4042_v42, %v10382_v43  ;;  %v10387_v51 = vand.u32 4294901760, %v4041_v5  ;;  %v4044_v55 = vmax.f32 %v4038_v1, 0.0  ;;  %v4032_v12 = vadd.f32 %v4031_v46, %v3941_v63  ;;  %v12078_v42 = vld [vmem:[#allocation18_spill] sm:$0xff]  ;;  %v12081_v63 = vld [vmem:[#allocation13_spill] sm:$0xff] }
 0x2b6   : > { %v12083_v1 = vld [vmem:[#allocation30_spill] sm:$0xff]  ;;  %v12084_v46 = vld [vmem:[#allocation45_spill] sm:$0xff] }
 0x2b7   : > { %v4158_v3 = vand.u32 4294901760, %v10385_v34  ;;  %v4147_v23 = vsub.f32 %v4041_v5, %v10387_v51  ;;  %v10391_v22 = vand.u32 4294901760, %v4044_v55  ;;  %v4043_v57 = vmax.f32 %v4032_v12, 0.0  ;;  %7002 = vmatprep.mubr.f32.mxu1 %v10387_v51  ;;  %v12082_v5 = vld [vmem:[#allocation35_spill] sm:$0xff] }
 0x2b8   : > { %7003 = vmatmul.mubr.f32.vlgmr.msra.gmra.mxu1 %v10382_v43  ;;  %v12088_v12 = vld [vmem:[#allocation63_spill] sm:$0xff] }
 0x2b9   : > { %v10396_v36 = vsub.f32 %v4044_v55, %v10391_v22  ;;  %v10398_v28 = vand.u32 4294901760, %v4043_v57  ;;  %7047 = vmatpush3.msra.mxu1 %v12044_v39  ;;  %v4148_v54 = vand.u32 4294901760, %v4147_v23  ;;  %v4159_v27 = vsub.f32 %v10385_v34, %v4158_v3  ;;  %v12087_v55 = vld [vmem:[#allocation55_spill] sm:$0xff] }
 0x2ba   : > { %7048 = vmatprep.subr.mxu1 %v12045_v30 }
 0x2bb   : > { %v10406_v62 = vsub.f32 %v4043_v57, %v10398_v28  ;;  %7049 = vmatpush3.msra.mxu1 %v12045_v30  ;;  %7005 = vmatprep.mubr.f32.mxu1 %v10398_v28  ;;  %v4149_v29 = vsub.f32 %v4147_v23, %v4148_v54  ;;  %v4178_v50 = vand.u32 4294901760, %v10396_v36  ;;  %v4160_v20 = vand.u32 4294901760, %v4159_v27  ;;  %v12091_v57 = vld [vmem:[#allocation68_spill] sm:$0xff] }
 0x2bc   : > { %7050 = vmatprep.subr.mxu1 %v12046_v13  ;;  %7006 = vmatmul.mubr.f32.gmra.mxu1 %v10391_v22 }
 0x2bd   : > { %7051 = vmatpush3.msra.mxu1 %v12046_v13  ;;  %7078 = vmatprep.mubr.f32.mxu1 %v4148_v54  ;;  %v4150_v60 = vand.u32 4294901760, %v4149_v29  ;;  %v4168_v59 = vand.u32 4294901760, %v10406_v62  ;;  %v4179_v37 = vsub.f32 %v10396_v36, %v4178_v50  ;;  %v4853_v54 = vld [vmem:[#allocation5 + $0x400] sm:$0xff]  ;;  %v4851_v29 = vld [vmem:[#allocation5 + $0x3f0] sm:$0xff] }
 0x2be   : > { %7052 = vmatprep.subr.mxu1 %v12047_v41 }
 0x2bf   : > { %7053 = vmatpush3.msra.mxu1 %v12047_v41  ;;  %6964 = vmatprep.mubr.f32.mxu0 %v4150_v60  ;;  %v4169_v44 = vsub.f32 %v10406_v62, %v4168_v59  ;;  %v4180_v11 = vand.u32 4294901760, %v4179_v37  ;;  %v10577_v60 = vand.u32 4294901760, %v4851_v29 }
 0x2c0   : > { %7054 = vmatprep.subr.mxu1 %v12048_v9  ;;  %6965 = vmatmul.mubr.f32.vlgmr.msra.gmra.mxu0 %v4160_v20 }
 0x2c1   : > { %7009 = vmatpush3.msra.mxu0 %v12049_v4  ;;  %7055 = vmatpush3.msra.mxu1 %v12048_v9  ;;  %v4170_v21 = vand.u32 4294901760, %v4169_v44 }
 0x2c2   : > { %7010 = vmatprep.subr.mxu0 %v12050_v17  ;;  %7056 = vmatprep.subr.mxu1 %v12051_v26 }
 0x2c3   : > { %7011 = vmatpush3.msra.mxu0 %v12050_v17  ;;  %7057 = vmatpush3.msra.mxu1 %v12051_v26 }
 0x2c4   : > { %6967 = vmatprep.mubr.f32.mxu0 %v4170_v21  ;;  %7012 = vmatprep.subr.mxu0 %v12052_v6  ;;  %v10596_v21 = vsub.f32 %v4851_v29, %v10577_v60 }
 0x2c5   : > { %7058 = vmatprep.subr.mxu1 %v12053_v53  ;;  %6968 = vmatmul.mubr.f32.gmra.mxu0 %v4180_v11 }
 0x2c6   : > { %7013 = vmatpush3.msra.mxu0 %v12052_v6  ;;  %7059 = vmatpush3.msra.mxu1 %v12053_v53 }
 0x2c7   : > { %7014 = vmatprep.subr.mxu0 %v12054_v52  ;;  %7040 = vmatprep.mubr.f32.mxu0 %v4147_v23  ;;  %v12090_v23 = vld [vmem:[#allocation64_spill] sm:$0xff] }
 0x2c8   : > { %7060 = vmatprep.subr.mxu1 %v12055_v24  ;;  %7015 = vmatpush3.msra.mxu0 %v12054_v52 }
 0x2c9   : > { %7061 = vmatpush3.msra.mxu1 %v12055_v24  ;;  %7016 = vmatprep.subr.mxu0 %v12056_v40 }
 0x2ca   : > { %7062 = vmatprep.subr.mxu1 %v12057_v7  ;;  %7017 = vmatpush3.msra.mxu0 %v12056_v40 }
 0x2cb   : > { %7063 = vmatpush3.msra.mxu1 %v12057_v7  ;;  %7018 = vmatprep.subr.mxu0 %v12058_v61 }
 0x2cc   : > { %7064 = vmatprep.subr.mxu1 %v12059_v8  ;;  %7019 = vmatpush3.msra.mxu0 %v12058_v61 }
 0x2cd   : > { %7065 = vmatpush3.msra.mxu1 %v12059_v8  ;;  %7020 = vmatprep.subr.mxu0 %v12060_v56 }
 0x2ce   : > { %7066 = vmatprep.subr.mxu1 %v12061_v38  ;;  %7021 = vmatpush3.msra.mxu0 %v12060_v56 }
 0x2cf   : > { %7067 = vmatpush3.msra.mxu1 %v12061_v38  ;;  %7022 = vmatprep.subr.mxu0 %v12062_v58 }
 0x2d0   : > { %7068 = vmatprep.subr.mxu1 %v12063_v15  ;;  %7023 = vmatpush3.msra.mxu0 %v12062_v58 }
 0x2d1   : > { %7069 = vmatpush3.msra.mxu1 %v12063_v15  ;;  %7024 = vmatprep.subr.mxu0 %v12064_v32 }
 0x2d2   : > { %7070 = vmatprep.subr.mxu1 %v12065_v35  ;;  %7025 = vmatpush3.msra.mxu0 %v12064_v32 }
 0x2d3   : > { %7071 = vmatpush3.msra.mxu1 %v12065_v35  ;;  %7026 = vmatprep.subr.mxu0 %v12066_v47 }
 0x2d4   : > { %7072 = vmatprep.subr.mxu1 %v12067_v25  ;;  %7027 = vmatpush3.msra.mxu0 %v12066_v47  ;;  %v4847_v47 = vld [vmem:[#allocation5 + $0x3d0] sm:$0xff] }
 0x2d5   : > { %7073 = vmatpush3.msra.mxu1 %v12067_v25  ;;  %7028 = vmatprep.subr.mxu0 %v12068_v18 }
 0x2d6   : > { %7074 = vmatprep.subr.mxu1 %v12069_v33  ;;  %7029 = vmatpush3.msra.mxu0 %v12068_v18 }
 0x2d7   : > { %7075 = vmatpush3.msra.mxu1 %v12069_v33  ;;  %7030 = vmatprep.subr.mxu0 %v12070_v45 }
 0x2d8   : > { %7076 = vmatprep.subr.mxu1 %v12071_v19  ;;  %7031 = vmatpush3.msra.mxu0 %v12070_v45  ;;  %v4846_v45 = vld [vmem:[#allocation5 + $0x3c8] sm:$0xff] }
 0x2d9   : > { %7077 = vmatpush3.msra.mxu1 %v12071_v19  ;;  %7032 = vmatprep.subr.mxu0 %v12072_v0 }
 0x2da   : > { %7079 = vmatmul.mubr.f32.vlgmr.msra.gmra.mxu1 %v4158_v3  ;;  %7122 = vmatprep.subr.mxu1 %v12044_v39  ;;  %v12089_v3 = vld [vmem:[#allocation16_spill] sm:$0xff] }
 0x2db   : > { %7033 = vmatpush3.msra.mxu0 %v12072_v0  ;;  %7081 = vmatprep.mubr.f32.mxu1 %v4168_v59 }
 0x2dc   : > { %7123 = vmatpush3.msra.mxu1 %v12044_v39  ;;  %7034 = vmatprep.subr.mxu0 %v12073_v48 }
 0x2dd   : > { %7124 = vmatprep.subr.mxu1 %v12045_v30  ;;  %7035 = vmatpush3.msra.mxu0 %v12073_v48  ;;  %v10648_v48 = vand.u32 4294901760, %v4846_v45 }
 0x2de   : > { %7125 = vmatpush3.msra.mxu1 %v12045_v30  ;;  %7036 = vmatprep.subr.mxu0 %v12074_v31  ;;  %v10564_v30 = vand.u32 4294901760, %v4853_v54 }
 0x2df   : > { %7082 = vmatmul.mubr.f32.gmra.mxu1 %v4178_v50  ;;  %7126 = vmatprep.subr.mxu1 %v12046_v13  ;;  %v4850_v50 = vld [vmem:[#allocation5 + $0x3e8] sm:$0xff] }
 0x2e0   : > { %7037 = vmatpush3.msra.mxu0 %v12074_v31  ;;  %7127 = vmatpush3.msra.mxu1 %v12046_v13  ;;  %v4849_v13 = vld [vmem:[#allocation5 + $0x3e0] sm:$0xff]  ;;  %v10579_v59 = vand.u32 4294901760, %v4850_v50 }
 0x2e1   : > { %7154 = vmatprep.mubr.f32.mxu1 %v10387_v51  ;;  %7038 = vmatprep.subr.mxu0 %v12075_v14  ;;  %v10581_v20 = vand.u32 4294901760, %v4849_v13  ;;  %v4845_v31 = vld [vmem:[#allocation5 + $0x3c0] sm:$0xff] }
 0x2e2   : > { %7128 = vmatprep.subr.mxu1 %v12047_v41  ;;  %7039 = vmatpush3.msra.mxu0 %v12075_v14  ;;  %v10599_v17 = vsub.f32 %v4850_v50, %v10579_v59  ;;  %v4841_v50 = vld [vmem:[#allocation5 + $0x3a0] sm:$0xff] }
 0x2e3   : > { %7129 = vmatpush3.msra.mxu1 %v12047_v41  ;;  %7041 = vmatmul.mubr.f32.vlgmr.msra.gmra.mxu0 %v10385_v34  ;;  %v12085_v34 = vld [vmem:[#allocation60_spill] sm:$0xff] }
 0x2e4   : > { %7084 = vmatprep.subr.mxu0 %v12076_v2  ;;  %7130 = vmatprep.subr.mxu1 %v12048_v9  ;;  %v4848_v41 = vld [vmem:[#allocation5 + $0x3d8] sm:$0xff]  ;;  %v10618_v40 = vand.u32 4294901760, %v10599_v17 }
 0x2e5   : > { %7043 = vmatprep.mubr.f32.mxu0 %v10406_v62  ;;  %7085 = vmatpush3.msra.mxu0 %v12076_v2  ;;  %v4852_v62 = vld [vmem:[#allocation5 + $0x3f8] sm:$0xff]  ;;  %v10593_v4 = vand.u32 4294901760, %v4848_v41 }
 0x2e6   : > { %7131 = vmatpush3.msra.mxu1 %v12048_v9  ;;  %7086 = vmatprep.subr.mxu0 %v12077_v16  ;;  %12096 = vst [vmem:[#allocation42_spill] sm:$0xff] %v10618_v40  ;;  %v5012_v58 = vsub.f32 %v10599_v17, %v10618_v40 }
 0x2e7   : > { %7132 = vmatprep.subr.mxu1 %v12051_v26  ;;  %7087 = vmatpush3.msra.mxu0 %v12077_v16  ;;  %v10611_v52 = vsub.f32 %v4848_v41, %v10593_v4  ;;  %v10656_v16 = vsub.f32 %v4846_v45, %v10648_v48 }
 0x2e8   : > { %7133 = vmatpush3.msra.mxu1 %v12051_v26  ;;  %7044 = vmatmul.mubr.f32.gmra.mxu0 %v10396_v36  ;;  %v4854_v36 = vld [vmem:[#allocation5 + $0x408] sm:$0xff]  ;;  %v10602_v26 = vsub.f32 %v4849_v13, %v10581_v20 }
 0x2e9   : > { %7088 = vmatprep.subr.mxu0 %v12078_v42  ;;  %7134 = vmatprep.subr.mxu1 %v12053_v53  ;;  %v10559_v39 = vand.u32 4294901760, %v4854_v36  ;;  %v10627_v56 = vand.u32 4294901760, %v10611_v52 }
 0x2ea   : > { %7089 = vmatpush3.msra.mxu0 %v12078_v42  ;;  %7116 = vmatprep.mubr.f32.mxu0 %v10387_v51  ;;  %v12086_v51 = vld [vmem:[#allocation21_spill] sm:$0xff]  ;;  %v10658_v42 = vand.u32 4294901760, %v4845_v31 }
 0x2eb   : > { %7135 = vmatpush3.msra.mxu1 %v12053_v53  ;;  %7090 = vmatprep.subr.mxu0 %v12079_v49  ;;  %v10562_v27 = vsub.f32 %v4854_v36, %v10559_v39  ;;  %12098 = vst [vmem:[#allocation49_spill] sm:$0xff] %v10627_v56  ;;  %v5026_v18 = vsub.f32 %v10611_v52, %v10627_v56 }
 0x2ec   : > { %7136 = vmatprep.subr.mxu1 %v12055_v24  ;;  %7091 = vmatpush3.msra.mxu0 %v12079_v49  ;;  %v4844_v49 = vld [vmem:[#allocation5 + $0x3b8] sm:$0xff] }
 0x2ed   : > { %7137 = vmatpush3.msra.mxu1 %v12055_v24  ;;  %7092 = vmatprep.subr.mxu0 %v12080_v10  ;;  %v10615_v24 = vand.u32 4294901760, %v10596_v21  ;;  %v5027_v14 = vand.u32 4294901760, %v5026_v18 }
 0x2ee   : > { %7138 = vmatprep.subr.mxu1 %v12057_v7  ;;  %7093 = vmatpush3.msra.mxu0 %v12080_v10 }
 0x2ef   : > { %7139 = vmatpush3.msra.mxu1 %v12057_v7  ;;  %7094 = vmatprep.subr.mxu0 %v12081_v63  ;;  %12095 = vst [vmem:[#allocation71_spill] sm:$0xff] %v10615_v24  ;;  %v10621_v7 = vand.u32 4294901760, %v10602_v26 }
 0x2f0   : > { %7140 = vmatprep.subr.mxu1 %v12059_v8  ;;  %7095 = vmatpush3.msra.mxu0 %v12081_v63  ;;  %v10665_v63 = vand.u32 4294901760, %v10656_v16 }
 0x2f1   : > { %7141 = vmatpush3.msra.mxu1 %v12059_v8  ;;  %7096 = vmatprep.subr.mxu0 %v12082_v5  ;;  %12097 = vst [vmem:[#allocation66_spill] sm:$0xff] %v10621_v7  ;;  %v5019_v32 = vsub.f32 %v10602_v26, %v10621_v7 }
 0x2f2   : > { %7142 = vmatprep.subr.mxu1 %v12061_v38  ;;  %7097 = vmatpush3.msra.mxu0 %v12082_v5  ;;  %12100 = vst [vmem:[#allocation52_spill] sm:$0xff] %v10665_v63  ;;  %v10668_v5 = vsub.f32 %v4845_v31, %v10658_v42 }
 0x2f3   : > { %7143 = vmatpush3.msra.mxu1 %v12061_v38  ;;  %7098 = vmatprep.subr.mxu0 %v12083_v1  ;;  %v5005_v38 = vsub.f32 %v10596_v21, %v10615_v24 }
 0x2f4   : > { %7144 = vmatprep.subr.mxu1 %v12063_v15  ;;  %7099 = vmatpush3.msra.mxu0 %v12083_v1  ;;  %v10670_v1 = vand.u32 4294901760, %v4844_v49 }
 0x2f5   : > { %7145 = vmatpush3.msra.mxu1 %v12063_v15  ;;  %7100 = vmatprep.subr.mxu0 %v12084_v46 }
 0x2f6   : > { %7146 = vmatprep.subr.mxu1 %v12065_v35  ;;  %7101 = vmatpush3.msra.mxu0 %v12084_v46  ;;  %v4843_v46 = vld [vmem:[#allocation5 + $0x3b0] sm:$0xff] }
 0x2f7   : > { %7147 = vmatpush3.msra.mxu1 %v12065_v35  ;;  %7102 = vmatprep.subr.mxu0 %v12085_v34  ;;  %v5006_v35 = vand.u32 4294901760, %v5005_v38 }
 0x2f8   : > { %7148 = vmatprep.subr.mxu1 %v12067_v25  ;;  %7103 = vmatpush3.msra.mxu0 %v12085_v34 }
 0x2f9   : > { %7149 = vmatpush3.msra.mxu1 %v12067_v25  ;;  %7104 = vmatprep.subr.mxu0 %v12086_v51  ;;  %v5013_v25 = vand.u32 4294901760, %v5012_v58 }
 0x2fa   : > { %7150 = vmatprep.subr.mxu1 %v12069_v33  ;;  %7105 = vmatpush3.msra.mxu0 %v12086_v51  ;;  %v5040_v51 = vsub.f32 %v10656_v16, %v10665_v63 }
 0x2fb   : > { %7151 = vmatpush3.msra.mxu1 %v12069_v33  ;;  %7106 = vmatprep.subr.mxu0 %v12087_v55  ;;  %v10641_v33 = vand.u32 4294901760, %v4847_v47 }
 0x2fc   : > { %7152 = vmatprep.subr.mxu1 %v12071_v19  ;;  %7107 = vmatpush3.msra.mxu0 %v12087_v55  ;;  %v10677_v55 = vand.u32 4294901760, %v10668_v5 }
 0x2fd   : > { %7153 = vmatpush3.msra.mxu1 %v12071_v19  ;;  %7108 = vmatprep.subr.mxu0 %v12088_v12  ;;  %v5020_v19 = vand.u32 4294901760, %v5019_v32  ;;  %v10646_v0 = vsub.f32 %v4847_v47, %v10641_v33 }
 0x2fe   : > { %7155 = vmatmul.mubr.f32.vlgmr.msra.gmra.mxu1 %v10382_v43  ;;  %7109 = vmatpush3.msra.mxu0 %v12088_v12  ;;  %12101 = vst [vmem:[#allocation61_spill] sm:$0xff] %v10677_v55  ;;  %v10680_v12 = vsub.f32 %v4844_v49, %v10670_v1  ;;  %v5047_v36 = vsub.f32 %v10668_v5, %v10677_v55 }
 0x2ff   : > { %7157 = vmatprep.mubr.f32.mxu1 %v10398_v28  ;;  %7110 = vmatprep.subr.mxu0 %v12089_v3  ;;  %v10653_v2 = vand.u32 4294901760, %v10646_v0 }
 0x300   : > { %7111 = vmatpush3.msra.mxu0 %v12089_v3  ;;  %v10683_v3 = vand.u32 4294901760, %v4843_v46  ;;  %v5048_v13 = vand.u32 4294901760, %v5047_v36 }
 0x301   : > { %7112 = vmatprep.subr.mxu0 %v12090_v23  ;;  %12099 = vst [vmem:[#allocation58_spill] sm:$0xff] %v10653_v2  ;;  %v5033_v10 = vsub.f32 %v10646_v0, %v10653_v2 }
 0x302   : > { %7158 = vmatmul.mubr.f32.gmra.mxu1 %v10391_v22  ;;  %7113 = vmatpush3.msra.mxu0 %v12090_v23  ;;  %v4842_v23 = vld [vmem:[#allocation5 + $0x3a8] sm:$0xff]  ;;  %v10694_v29 = vsub.f32 %v4843_v46, %v10683_v3 }
 0x303   : > { %7114 = vmatprep.subr.mxu0 %v12091_v57  ;;  %v5034_v34 = vand.u32 4294901760, %v5033_v10 }
 0x304   : > { %7115 = vmatpush3.msra.mxu0 %v12091_v57  ;;  %v5041_v57 = vand.u32 4294901760, %v5040_v51 }
 0x305   : > { %7117 = vmatmul.mubr.f32.vlgmr.msra.gmra.mxu0 %v10382_v43  ;;  %7160 = vmatprep.subr.mxu0 %v10559_v39  ;;  %v10569_v43 = vand.u32 4294901760, %v10562_v27 }
 0x306   : > { %7119 = vmatprep.mubr.f32.mxu0 %v10398_v28  ;;  %7161 = vmatpush3.msra.mxu0 %v10559_v39  ;;  %v10572_v28 = vsub.f32 %v4853_v54, %v10564_v30  ;;  %v10689_v54 = vand.u32 4294901760, %v10680_v12 }
 0x307   : > { %12092 = vst [vmem:[#allocation67_spill] sm:$0xff] %v10569_v43  ;;  %7162 = vmatprep.subr.mxu0 %v10564_v30  ;;  %v4984_v44 = vsub.f32 %v10562_v27, %v10569_v43 }
 0x308   : > { %7163 = vmatpush3.msra.mxu0 %v10564_v30  ;;  %v10587_v37 = vand.u32 4294901760, %v10572_v28  ;;  %12102 = vst [vmem:[#allocation65_spill] sm:$0xff] %v10689_v54  ;;  %v5054_v41 = vsub.f32 %v10680_v12, %v10689_v54 }
 0x309   : > { %7120 = vmatmul.mubr.f32.gmra.mxu0 %v10391_v22  ;;  %v10574_v22 = vand.u32 4294901760, %v4852_v62  ;;  %v4985_v11 = vand.u32 4294901760, %v4984_v44 }
 0x30a   : > { %12093 = vst [vmem:[#allocation69_spill] sm:$0xff] %v10587_v37  ;;  %v4991_v6 = vsub.f32 %v10572_v28, %v10587_v37 }
 0x30b   : > { %v10590_v9 = vsub.f32 %v4852_v62, %v10574_v22  ;;  %7164 = vmatprep.subr.mxu0 %v10574_v22  ;;  %7198 = vmatprep.subr.mxu1 %v4985_v11  ;;  %v10691_v62 = vand.u32 4294901760, %v4842_v23 }
 0x30c   : > { %7165 = vmatpush3.msra.mxu0 %v10574_v22  ;;  %v4992_v61 = vand.u32 4294901760, %v4991_v6  ;;  %7199 = vmatpush3.msra.mxu1 %v4985_v11  ;;  %v10702_v11 = vand.u32 4294901760, %v4841_v50  ;;  %v10706_v6 = vand.u32 4294901760, %v10694_v29 }
 0x30d   : > { %v10608_v53 = vand.u32 4294901760, %v10590_v9  ;;  %7166 = vmatprep.subr.mxu0 %v10577_v60  ;;  %v10700_v44 = vsub.f32 %v4842_v23, %v10691_v62 }
 0x30e   : > { %7167 = vmatpush3.msra.mxu0 %v10577_v60  ;;  %7200 = vmatprep.subr.mxu1 %v4992_v61  ;;  %12103 = vst [vmem:[#allocation22_spill] sm:$0xff] %v10706_v6  ;;  %v10713_v58 = vsub.f32 %v4841_v50, %v10702_v11  ;;  %v5061_v32 = vsub.f32 %v10694_v29, %v10706_v6 }
 0x30f   : > { %12094 = vst [vmem:[#allocation70_spill] sm:$0xff] %v10608_v53  ;;  %v4998_v8 = vsub.f32 %v10590_v9, %v10608_v53  ;;  %7168 = vmatprep.subr.mxu0 %v10579_v59  ;;  %7201 = vmatpush3.msra.mxu1 %v4992_v61  ;;  %v4840_v61 = vld [vmem:[#allocation5 + $0x398] sm:$0xff]  ;;  %v10710_v38 = vand.u32 4294901760, %v10700_v44 }
 0x310   : > { %7169 = vmatpush3.msra.mxu0 %v10579_v59  ;;  %12105 = vst [vmem:[#allocation38_spill] sm:$0xff] %v10713_v58 }
 0x311   : > { %v4999_v15 = vand.u32 4294901760, %v4998_v8  ;;  %7170 = vmatprep.subr.mxu0 %v10581_v20  ;;  %v5055_v8 = vand.u32 4294901760, %v5054_v41  ;;  %12104 = vst [vmem:[#allocation25_spill] sm:$0xff] %v10710_v38  ;;  %v5068_v47 = vsub.f32 %v10700_v44, %v10710_v38 }
 0x312   : > { %7171 = vmatpush3.msra.mxu0 %v10581_v20 }
 0x313   : > { %7202 = vmatprep.subr.mxu1 %v4999_v15  ;;  %7172 = vmatprep.subr.mxu0 %v10593_v4  ;;  %v5069_v31 = vand.u32 4294901760, %v5068_v47  ;;  %v12111_v47 = vld [vmem:[#allocation20_spill] sm:$0xff] }
 0x314   : > { %7203 = vmatpush3.msra.mxu1 %v4999_v15  ;;  %7173 = vmatpush3.msra.mxu0 %v10593_v4  ;;  %v10715_v15 = vand.u32 4294901760, %v4840_v61 }
 0x315   : > { %7204 = vmatprep.subr.mxu1 %v5006_v35  ;;  %7174 = vmatprep.subr.mxu0 %v10641_v33 }
 0x316   : > { %7205 = vmatpush3.msra.mxu1 %v5006_v35  ;;  %7175 = vmatpush3.msra.mxu0 %v10641_v33  ;;  %v4839_v35 = vld [vmem:[#allocation5 + $0x390] sm:$0xff]  ;;  %v10727_v18 = vsub.f32 %v4840_v61, %v10715_v15 }
 0x317   : > { %7206 = vmatprep.subr.mxu1 %v5013_v25  ;;  %7176 = vmatprep.subr.mxu0 %v10648_v48  ;;  %v10729_v45 = vand.u32 4294901760, %v4839_v35 }
 0x318   : > { %7207 = vmatpush3.msra.mxu1 %v5013_v25  ;;  %7177 = vmatpush3.msra.mxu0 %v10648_v48  ;;  %v10724_v25 = vand.u32 4294901760, %v10713_v58  ;;  %12107 = vst [vmem:[#allocation27_spill] sm:$0xff] %v10727_v18  ;;  %v10736_v49 = vand.u32 4294901760, %v10727_v18 }
 0x319   : > { %7208 = vmatprep.subr.mxu1 %v5020_v19  ;;  %7178 = vmatprep.subr.mxu0 %v10658_v42  ;;  %v10739_v10 = vsub.f32 %v4839_v35, %v10729_v45 }
 0x31a   : > { %7209 = vmatpush3.msra.mxu1 %v5020_v19  ;;  %7179 = vmatpush3.msra.mxu0 %v10658_v42  ;;  %12106 = vst [vmem:[#allocation29_spill] sm:$0xff] %v10724_v25  ;;  %v5062_v19 = vand.u32 4294901760, %v5061_v32  ;;  %12108 = vst [vmem:[#allocation23_spill] sm:$0xff] %v10736_v49 }
 0x31b   : > { %7210 = vmatprep.subr.mxu1 %v5027_v14  ;;  %7180 = vmatprep.subr.mxu0 %v10670_v1  ;;  %12109 = vst [vmem:[#allocation26_spill] sm:$0xff] %v10739_v10  ;;  %v10746_v51 = vand.u32 4294901760, %v10739_v10 }
 0x31c   : > { %7211 = vmatpush3.msra.mxu1 %v5027_v14  ;;  %7181 = vmatpush3.msra.mxu0 %v10670_v1  ;;  %v5075_v14 = vsub.f32 %v10713_v58, %v10724_v25 }
 0x31d   : > { %7212 = vmatprep.subr.mxu1 %v5034_v34  ;;  %7182 = vmatprep.subr.mxu0 %v10683_v3  ;;  %12110 = vst [vmem:[#allocation19_spill] sm:$0xff] %v10746_v51 }
 0x31e   : > { %7213 = vmatpush3.msra.mxu1 %v5034_v34  ;;  %7183 = vmatpush3.msra.mxu0 %v10683_v3  ;;  %v5076_v46 = vand.u32 4294901760, %v5075_v14  ;;  %v5082_v34 = vsub.f32 %v10727_v18, %v10736_v49 }
 0x31f   : > { %7214 = vmatprep.subr.mxu1 %v5041_v57  ;;  %7184 = vmatprep.subr.mxu0 %v10691_v62 }
 0x320   : > { %7215 = vmatpush3.msra.mxu1 %v5041_v57  ;;  %7185 = vmatpush3.msra.mxu0 %v10691_v62  ;;  %v5083_v23 = vand.u32 4294901760, %v5082_v34  ;;  %v5089_v57 = vsub.f32 %v10739_v10, %v10746_v51  ;;  %v10754_v34 = vld [vmem:[#allocation7] sm:$0x7] }
 0x321   : > { %7216 = vmatprep.subr.mxu1 %v5048_v13  ;;  %7186 = vmatprep.subr.mxu0 %v10702_v11  ;;  %12112 = vst [vmem:[#allocation14_spill] sm:$0xff] %v10754_v34 }
 0x322   : > { %7217 = vmatpush3.msra.mxu1 %v5048_v13  ;;  %7187 = vmatpush3.msra.mxu0 %v10702_v11  ;;  %v5090_v36 = vand.u32 4294901760, %v5089_v57 }
 0x323   : > { %7218 = vmatprep.subr.mxu1 %v5055_v8  ;;  %7188 = vmatprep.subr.mxu0 %v10715_v15 }
 0x324   : > { %7219 = vmatpush3.msra.mxu1 %v5055_v8  ;;  %7189 = vmatpush3.msra.mxu0 %v10715_v15 }
 0x325   : > { %7220 = vmatprep.subr.mxu1 %v5062_v19  ;;  %7190 = vmatprep.subr.mxu0 %v10729_v45 }
 0x326   : > { %7221 = vmatpush3.msra.mxu1 %v5062_v19  ;;  %7191 = vmatpush3.msra.mxu0 %v10729_v45  ;;  %v4063_v19 = vsub.s32 1, %v12111_v47 }
 0x327   : > { %7222 = vmatprep.subr.mxu1 %v5069_v31  ;;  %7236 = vmatprep.subr.mxu0 %v10562_v27 }
 0x328   : > { %7223 = vmatpush3.msra.mxu1 %v5069_v31 }
 0x329   : > { %7224 = vmatprep.subr.mxu1 %v5076_v46 }
 0x32a   : > { %7225 = vmatpush3.msra.mxu1 %v5076_v46  ;;  %v4064_v46 = vrot.slane %v10754_v34, %v4063_v19 }
 0x32b   : > { %7226 = vmatprep.subr.mxu1 %v5083_v23 }
 0x32c   : > { %7227 = vmatpush3.msra.mxu1 %v5083_v23 }
 0x32d   : > { %7228 = vmatprep.subr.mxu1 %v5090_v36 }
 0x32e   : > { %7229 = vmatpush3.msra.mxu1 %v5090_v36 }
 0x32f   : > { %7274 = vmatprep.subr.mxu1 %v10559_v39 }
 0x378   : > { %v7004_v50 = vpop.f32.mrf.mxu1 }
 0x37a   : > { %v4333_v13 = vpop.f32.mrf.mxu1 }
 0x37c   : > { %v7007_v61 = vpop.f32.mrf.mxu1 }
 0x37e   : > { %v4345_v32 = vpop.f32.mrf.mxu1 }
 0x380   : > { %v6966_v41 = vpop.f32.mrf.mxu0 }
 0x381   : > { %v4163_v36 = vadd.f32 %v6966_v41, %v4064_v46 }
 0x382   : > { %v4152_v8 = vpop.f32.mrf.mxu0 }
 0x383   : > { %v4153_v25 = vadd.f32 %v4152_v8, %v4064_v46  ;;  %v4340_v6 = vadd.f32 %v7004_v50, %v4163_v36 }
 0x385   : > { %v6969_v35 = vpop.f32.mrf.mxu0  ;;  %v4334_v56 = vadd.f32 %v4333_v13, %v4153_v25 }
 0x386   : > { %v4183_v38 = vadd.f32 %v6969_v35, %v4064_v46 }
 0x387   : > { %v4172_v14 = vpop.f32.mrf.mxu0 }
 0x388   : > { %v4173_v63 = vadd.f32 %v4172_v14, %v4064_v46  ;;  %v4352_v40 = vadd.f32 %v7007_v61, %v4183_v38 }
 0x38a   : > { %v4346_v37 = vadd.f32 %v4345_v32, %v4173_v63 }
 0x39a   : > { %v7080_v31 = vpop.f32.mrf.mxu1 }
 0x39c   : > { %v4565_v23 = vpop.f32.mrf.mxu1 }
 0x39f   : > { %v7083_v51 = vpop.f32.mrf.mxu1 }
 0x3a1   : > { %v4581_v54 = vpop.f32.mrf.mxu1 }
 0x3a3   : > { %v7042_v57 = vpop.f32.mrf.mxu0 }
 0x3a4   : > { %v4463_v2 = vadd.f32 %v7042_v57, %v4340_v6 }
 0x3a5   : > { %v4455_v49 = vpop.f32.mrf.mxu0 }
 0x3a6   : > { %v4456_v7 = vadd.f32 %v4455_v49, %v4334_v56  ;;  %v4574_v19 = vadd.f32 %v7080_v31, %v4463_v2 }
 0x3a8   : > { %v7045_v55 = vpop.f32.mrf.mxu0  ;;  %v4566_v18 = vadd.f32 %v4565_v23, %v4456_v7 }
 0x3a9   : > { %v4477_v53 = vadd.f32 %v7045_v55, %v4352_v40 }
 0x3aa   : > { %v4469_v24 = vpop.f32.mrf.mxu0 }
 0x3ab   : > { %v4470_v41 = vadd.f32 %v4469_v24, %v4346_v37  ;;  %v4590_v36 = vadd.f32 %v7083_v51, %v4477_v53 }
 0x3ad   : > { %v4582_v56 = vadd.f32 %v4581_v54, %v4470_v41 }
 0x3be   : > { %v7156_v47 = vpop.f32.mrf.mxu1 }
 0x3c0   : > { %v4813_v34 = vpop.f32.mrf.mxu1 }
 0x3c2   : > { %v7159_v58 = vpop.f32.mrf.mxu1 }
 0x3c4   : > { %v4825_v55 = vpop.f32.mrf.mxu1 }
 0x3c5   : > { %v7118_v43 = vpop.f32.mrf.mxu0 }
 0x3c6   : > { %v4715_v10 = vadd.f32 %v7118_v43, %v4574_v19 }
 0x3c7   : > { %v4708_v8 = vpop.f32.mrf.mxu0 }
 0x3c8   : > { %v4820_v35 = vadd.f32 %v7156_v47, %v4715_v10  ;;  %v4709_v50 = vadd.f32 %v4708_v8, %v4566_v18 }
 0x3c9   : > { %v7121_v14 = vpop.f32.mrf.mxu0 }
 0x3ca   : > { %v4836_v6 = vmax.f32 %v4820_v35, 0.0  ;;  %v4814_v25 = vadd.f32 %v4813_v34, %v4709_v50  ;;  %v4727_v13 = vadd.f32 %v7121_v14, %v4590_v36 }
 0x3cb   : > { %v4720_v38 = vpop.f32.mrf.mxu0 }
 0x3cc   : > { %v10757_v49 = vand.u32 4294901760, %v4836_v6  ;;  %v4835_v40 = vmax.f32 %v4814_v25, 0.0  ;;  %v4832_v2 = vadd.f32 %v7159_v58, %v4727_v13  ;;  %v4721_v63 = vadd.f32 %v4720_v38, %v4582_v56 }
 0x3ce   : > { %v10760_v43 = vsub.f32 %v4836_v6, %v10757_v49  ;;  %v10762_v37 = vand.u32 4294901760, %v4835_v40  ;;  %v4838_v24 = vmax.f32 %v4832_v2, 0.0  ;;  %v4826_v53 = vadd.f32 %v4825_v55, %v4721_v63  ;;  %v12133_v6 = vld [vmem:[#allocation14_spill] sm:$0xff] }
 0x3d0   : > { %v4952_v7 = vand.u32 4294901760, %v10760_v43  ;;  %v4941_v18 = vsub.f32 %v4835_v40, %v10762_v37  ;;  %v10766_v10 = vand.u32 4294901760, %v4838_v24  ;;  %v4837_v54 = vmax.f32 %v4826_v53, 0.0  ;;  %7230 = vmatprep.mubr.f32.mxu1 %v10762_v37 }
 0x3d1   : > { %7231 = vmatmul.mubr.f32.vlgmr.msra.gmra.mxu1 %v10757_v49 }
 0x3d2   : > { %v10771_v58 = vsub.f32 %v4838_v24, %v10766_v10  ;;  %v10773_v51 = vand.u32 4294901760, %v4837_v54  ;;  %7275 = vmatpush3.msra.mxu1 %v10559_v39  ;;  %v4942_v61 = vand.u32 4294901760, %v4941_v18  ;;  %v4953_v32 = vsub.f32 %v10760_v43, %v4952_v7 }
 0x3d3   : > { %7276 = vmatprep.subr.mxu1 %v10564_v30 }
 0x3d4   : > { %v10781_v47 = vsub.f32 %v4837_v54, %v10773_v51  ;;  %7277 = vmatpush3.msra.mxu1 %v10564_v30  ;;  %7233 = vmatprep.mubr.f32.mxu1 %v10773_v51  ;;  %v4943_v31 = vsub.f32 %v4941_v18, %v4942_v61  ;;  %v4972_v34 = vand.u32 4294901760, %v10771_v58  ;;  %v4954_v57 = vand.u32 4294901760, %v4953_v32 }
 0x3d5   : > { %7278 = vmatprep.subr.mxu1 %v10574_v22  ;;  %7234 = vmatmul.mubr.f32.gmra.mxu1 %v10766_v10 }
 0x3d6   : > { %7279 = vmatpush3.msra.mxu1 %v10574_v22  ;;  %7306 = vmatprep.mubr.f32.mxu1 %v4942_v61  ;;  %v4944_v46 = vand.u32 4294901760, %v4943_v31  ;;  %v4962_v23 = vand.u32 4294901760, %v10781_v47  ;;  %v4973_v41 = vsub.f32 %v10771_v58, %v4972_v34 }
 0x3d7   : > { %7280 = vmatprep.subr.mxu1 %v10577_v60 }
 0x3d8   : > { %7281 = vmatpush3.msra.mxu1 %v10577_v60  ;;  %7192 = vmatprep.mubr.f32.mxu0 %v4944_v46  ;;  %v4963_v19 = vsub.f32 %v10781_v47, %v4962_v23  ;;  %v4974_v35 = vand.u32 4294901760, %v4973_v41  ;;  %v12134_v46 = vlaneseq }
 0x3d9   : > { %7282 = vmatprep.subr.mxu1 %v10579_v59  ;;  %7193 = vmatmul.mubr.f32.vlgmr.msra.gmra.mxu0 %v4954_v57 }
 0x3da   : > { %7237 = vmatpush3.msra.mxu0 %v10562_v27  ;;  %7283 = vmatpush3.msra.mxu1 %v10579_v59  ;;  %v4964_v8 = vand.u32 4294901760, %v4963_v19  ;;  %v12113_v27 = vld [vmem:[#allocation38_spill] sm:$0xff] }
 0x3db   : > { %7238 = vmatprep.subr.mxu0 %v10572_v28  ;;  %7284 = vmatprep.subr.mxu1 %v10581_v20 }
 0x3dc   : > { %7239 = vmatpush3.msra.mxu0 %v10572_v28  ;;  %7285 = vmatpush3.msra.mxu1 %v10581_v20  ;;  %v12114_v28 = vld [vmem:[#allocation27_spill] sm:$0xff] }
 0x3dd   : > { %7195 = vmatprep.mubr.f32.mxu0 %v4964_v8  ;;  %7240 = vmatprep.subr.mxu0 %v10590_v9 }
 0x3de   : > { %7286 = vmatprep.subr.mxu1 %v10593_v4  ;;  %7196 = vmatmul.mubr.f32.gmra.mxu0 %v4974_v35 }
 0x3df   : > { %7241 = vmatpush3.msra.mxu0 %v10590_v9  ;;  %7287 = vmatpush3.msra.mxu1 %v10593_v4  ;;  %v12121_v9 = vld [vmem:[#allocation66_spill] sm:$0xff] }
 0x3e0   : > { %7242 = vmatprep.subr.mxu0 %v10596_v21  ;;  %7268 = vmatprep.mubr.f32.mxu0 %v4941_v18 }
 0x3e1   : > { %7288 = vmatprep.subr.mxu1 %v10641_v33  ;;  %7243 = vmatpush3.msra.mxu0 %v10596_v21  ;;  %v12123_v21 = vld [vmem:[#allocation58_spill] sm:$0xff] }
 0x3e2   : > { %7289 = vmatpush3.msra.mxu1 %v10641_v33  ;;  %7244 = vmatprep.subr.mxu0 %v10599_v17 }
 0x3e3   : > { %7290 = vmatprep.subr.mxu1 %v10648_v48  ;;  %7245 = vmatpush3.msra.mxu0 %v10599_v17  ;;  %v12124_v17 = vld [vmem:[#allocation52_spill] sm:$0xff] }
 0x3e4   : > { %7291 = vmatpush3.msra.mxu1 %v10648_v48  ;;  %7246 = vmatprep.subr.mxu0 %v10602_v26 }
 0x3e5   : > { %7292 = vmatprep.subr.mxu1 %v10658_v42  ;;  %7247 = vmatpush3.msra.mxu0 %v10602_v26  ;;  %v12125_v26 = vld [vmem:[#allocation61_spill] sm:$0xff] }
 0x3e6   : > { %7293 = vmatpush3.msra.mxu1 %v10658_v42  ;;  %7248 = vmatprep.subr.mxu0 %v10611_v52 }
 0x3e7   : > { %7294 = vmatprep.subr.mxu1 %v10670_v1  ;;  %7249 = vmatpush3.msra.mxu0 %v10611_v52  ;;  %v12126_v52 = vld [vmem:[#allocation65_spill] sm:$0xff] }
 0x3e8   : > { %7295 = vmatpush3.msra.mxu1 %v10670_v1  ;;  %7250 = vmatprep.subr.mxu0 %v10646_v0 }
 0x3e9   : > { %7296 = vmatprep.subr.mxu1 %v10683_v3  ;;  %7251 = vmatpush3.msra.mxu0 %v10646_v0  ;;  %v12128_v0 = vld [vmem:[#allocation25_spill] sm:$0xff] }
 0x3ea   : > { %7297 = vmatpush3.msra.mxu1 %v10683_v3  ;;  %7252 = vmatprep.subr.mxu0 %v10656_v16 }
 0x3eb   : > { %7298 = vmatprep.subr.mxu1 %v10691_v62  ;;  %7253 = vmatpush3.msra.mxu0 %v10656_v16  ;;  %v12130_v16 = vld [vmem:[#allocation23_spill] sm:$0xff] }
 0x3ec   : > { %7299 = vmatpush3.msra.mxu1 %v10691_v62  ;;  %7254 = vmatprep.subr.mxu0 %v10668_v5 }
 0x3ed   : > { %7300 = vmatprep.subr.mxu1 %v10702_v11  ;;  %7255 = vmatpush3.msra.mxu0 %v10668_v5 }
 0x3ee   : > { %7301 = vmatpush3.msra.mxu1 %v10702_v11  ;;  %7256 = vmatprep.subr.mxu0 %v10680_v12 }
 0x3ef   : > { %7302 = vmatprep.subr.mxu1 %v10715_v15  ;;  %7257 = vmatpush3.msra.mxu0 %v10680_v12 }
 0x3f0   : > { %7303 = vmatpush3.msra.mxu1 %v10715_v15  ;;  %7258 = vmatprep.subr.mxu0 %v10694_v29 }
 0x3f1   : > { %7304 = vmatprep.subr.mxu1 %v10729_v45  ;;  %7259 = vmatpush3.msra.mxu0 %v10694_v29 }
 0x3f2   : > { %7305 = vmatpush3.msra.mxu1 %v10729_v45  ;;  %7260 = vmatprep.subr.mxu0 %v10700_v44 }
 0x3f3   : > { %7307 = vmatmul.mubr.f32.vlgmr.msra.gmra.mxu1 %v4952_v7  ;;  %7350 = vmatprep.subr.mxu1 %v10559_v39 }
 0x3f4   : > { %7261 = vmatpush3.msra.mxu0 %v10700_v44  ;;  %7309 = vmatprep.mubr.f32.mxu1 %v4962_v23  ;;  %v5630_v23 = vand.u32 127, %v12134_v46 }
 0x3f5   : > { %7351 = vmatpush3.msra.mxu1 %v10559_v39  ;;  %7262 = vmatprep.subr.mxu0 %v12113_v27  ;;  %v12115_v39 = vld [vmem:[#allocation26_spill] sm:$0xff] }
 0x3f6   : > { %7352 = vmatprep.subr.mxu1 %v10564_v30  ;;  %7263 = vmatpush3.msra.mxu0 %v12113_v27  ;;  %vm5631_vm1 = vcmp.lt.s32.totalorder %v5630_v23, 10 }
 0x3f7   : > { %7353 = vmatpush3.msra.mxu1 %v10564_v30  ;;  %7264 = vmatprep.subr.mxu0 %v12114_v28  ;;  %v12116_v30 = vld [vmem:[#allocation67_spill] sm:$0xff] }
 0x3f8   : > { %7310 = vmatmul.mubr.f32.gmra.mxu1 %v4972_v34  ;;  %7354 = vmatprep.subr.mxu1 %v10574_v22 }
 0x3f9   : > { %7265 = vmatpush3.msra.mxu0 %v12114_v28  ;;  %7355 = vmatpush3.msra.mxu1 %v10574_v22  ;;  %v12117_v22 = vld [vmem:[#allocation69_spill] sm:$0xff] }
 0x3fa   : > { %7382 = vmatprep.mubr.f32.mxu1 %v10762_v37  ;;  %7266 = vmatprep.subr.mxu0 %v12115_v39 }
 0x3fb   : > { %7356 = vmatprep.subr.mxu1 %v10577_v60  ;;  %7267 = vmatpush3.msra.mxu0 %v12115_v39 }
 0x3fc   : > { %7357 = vmatpush3.msra.mxu1 %v10577_v60  ;;  %7269 = vmatmul.mubr.f32.vlgmr.msra.gmra.mxu0 %v10760_v43  ;;  %v12118_v60 = vld [vmem:[#allocation70_spill] sm:$0xff] }
 0x3fd   : > { %7312 = vmatprep.subr.mxu0 %v12116_v30  ;;  %7358 = vmatprep.subr.mxu1 %v10579_v59 }
 0x3fe   : > { %7271 = vmatprep.mubr.f32.mxu0 %v10781_v47  ;;  %7313 = vmatpush3.msra.mxu0 %v12116_v30 }
 0x3ff   : > { %7359 = vmatpush3.msra.mxu1 %v10579_v59  ;;  %7314 = vmatprep.subr.mxu0 %v12117_v22  ;;  %v12119_v59 = vld [vmem:[#allocation71_spill] sm:$0xff] }
 0x400   : > { %7360 = vmatprep.subr.mxu1 %v10581_v20  ;;  %7315 = vmatpush3.msra.mxu0 %v12117_v22 }
 0x401   : > { %7361 = vmatpush3.msra.mxu1 %v10581_v20  ;;  %7272 = vmatmul.mubr.f32.gmra.mxu0 %v10771_v58  ;;  %v12120_v20 = vld [vmem:[#allocation42_spill] sm:$0xff] }
 0x402   : > { %7316 = vmatprep.subr.mxu0 %v12118_v60  ;;  %7362 = vmatprep.subr.mxu1 %v10593_v4 }
 0x403   : > { %7317 = vmatpush3.msra.mxu0 %v12118_v60  ;;  %7344 = vmatprep.mubr.f32.mxu0 %v10762_v37 }
 0x404   : > { %7363 = vmatpush3.msra.mxu1 %v10593_v4  ;;  %7318 = vmatprep.subr.mxu0 %v12119_v59  ;;  %v12122_v4 = vld [vmem:[#allocation49_spill] sm:$0xff] }
 0x405   : > { %7364 = vmatprep.subr.mxu1 %v10641_v33  ;;  %7319 = vmatpush3.msra.mxu0 %v12119_v59 }
 0x406   : > { %7365 = vmatpush3.msra.mxu1 %v10641_v33  ;;  %7320 = vmatprep.subr.mxu0 %v12120_v20  ;;  %v12127_v33 = vld [vmem:[#allocation22_spill] sm:$0xff] }
 0x407   : > { %7366 = vmatprep.subr.mxu1 %v10648_v48  ;;  %7321 = vmatpush3.msra.mxu0 %v12120_v20 }
 0x408   : > { %7367 = vmatpush3.msra.mxu1 %v10648_v48  ;;  %7322 = vmatprep.subr.mxu0 %v12121_v9  ;;  %v12129_v48 = vld [vmem:[#allocation29_spill] sm:$0xff] }
 0x409   : > { %7368 = vmatprep.subr.mxu1 %v10658_v42  ;;  %7323 = vmatpush3.msra.mxu0 %v12121_v9 }
 0x40a   : > { %7369 = vmatpush3.msra.mxu1 %v10658_v42  ;;  %7324 = vmatprep.subr.mxu0 %v12122_v4  ;;  %v12131_v42 = vld [vmem:[#allocation19_spill] sm:$0xff] }
 0x40b   : > { %7370 = vmatprep.subr.mxu1 %v10670_v1  ;;  %7325 = vmatpush3.msra.mxu0 %v12122_v4 }
 0x40c   : > { %7371 = vmatpush3.msra.mxu1 %v10670_v1  ;;  %7326 = vmatprep.subr.mxu0 %v12123_v21 }
 0x40d   : > { %7372 = vmatprep.subr.mxu1 %v10683_v3  ;;  %7327 = vmatpush3.msra.mxu0 %v12123_v21 }
 0x40e   : > { %7373 = vmatpush3.msra.mxu1 %v10683_v3  ;;  %7328 = vmatprep.subr.mxu0 %v12124_v17 }
 0x40f   : > { %7374 = vmatprep.subr.mxu1 %v10691_v62  ;;  %7329 = vmatpush3.msra.mxu0 %v12124_v17 }
 0x410   : > { %7375 = vmatpush3.msra.mxu1 %v10691_v62  ;;  %7330 = vmatprep.subr.mxu0 %v12125_v26 }
 0x411   : > { %7376 = vmatprep.subr.mxu1 %v10702_v11  ;;  %7331 = vmatpush3.msra.mxu0 %v12125_v26 }
 0x412   : > { %7377 = vmatpush3.msra.mxu1 %v10702_v11  ;;  %7332 = vmatprep.subr.mxu0 %v12126_v52 }
 0x413   : > { %7378 = vmatprep.subr.mxu1 %v10715_v15  ;;  %7333 = vmatpush3.msra.mxu0 %v12126_v52 }
 0x414   : > { %7379 = vmatpush3.msra.mxu1 %v10715_v15  ;;  %7334 = vmatprep.subr.mxu0 %v12127_v33  ;;  %v12132_v15 = vld [vmem:[#allocation20_spill] sm:$0xff] }
 0x415   : > { %7380 = vmatprep.subr.mxu1 %v10729_v45  ;;  %7335 = vmatpush3.msra.mxu0 %v12127_v33 }
 0x416   : > { %7381 = vmatpush3.msra.mxu1 %v10729_v45  ;;  %7336 = vmatprep.subr.mxu0 %v12128_v0  ;;  %v4857_v45 = vsub.s32 2, %v12132_v15 }
 0x417   : > { %7383 = vmatmul.mubr.f32.vlgmr.msra.gmra.mxu1 %v10757_v49  ;;  %7337 = vmatpush3.msra.mxu0 %v12128_v0 }
 0x418   : > { %7385 = vmatprep.mubr.f32.mxu1 %v10773_v51  ;;  %7338 = vmatprep.subr.mxu0 %v12129_v48  ;;  %v4858_v25 = vrot.slane %v12133_v6, %v4857_v45 }
 0x419   : > { %7339 = vmatpush3.msra.mxu0 %v12129_v48 }
 0x41a   : > { %7340 = vmatprep.subr.mxu0 %v12130_v16 }
 0x41b   : > { %7386 = vmatmul.mubr.f32.gmra.mxu1 %v10766_v10  ;;  %7341 = vmatpush3.msra.mxu0 %v12130_v16 }
 0x41c   : > { %7342 = vmatprep.subr.mxu0 %v12131_v42 }
 0x41d   : > { %7343 = vmatpush3.msra.mxu0 %v12131_v42 }
 0x41e   : > { %7345 = vmatmul.mubr.f32.vlgmr.msra.gmra.mxu0 %v10757_v49 }
 0x41f   : > { %7347 = vmatprep.mubr.f32.mxu0 %v10773_v51 }
 0x422   : > { %7348 = vmatmul.mubr.f32.gmra.mxu0 %v10766_v10 }
 0x491   : > { %v7232_v5 = vpop.f32.mrf.mxu1 }
 0x493   : > { %v5127_v1 = vpop.f32.mrf.mxu1 }
 0x495   : > { %v7235_v3 = vpop.f32.mrf.mxu1 }
 0x497   : > { %v5139_v29 = vpop.f32.mrf.mxu1 }
 0x499   : > { %v7194_v12 = vpop.f32.mrf.mxu0 }
 0x49a   : > { %v4957_v38 = vadd.f32 %v7194_v12, %v4858_v25 }
 0x49b   : > { %v4946_v62 = vpop.f32.mrf.mxu0 }
 0x49c   : > { %v4947_v49 = vadd.f32 %v4946_v62, %v4858_v25  ;;  %v5134_v43 = vadd.f32 %v7232_v5, %v4957_v38 }
 0x49e   : > { %v7197_v44 = vpop.f32.mrf.mxu0  ;;  %v5128_v37 = vadd.f32 %v5127_v1, %v4947_v49 }
 0x49f   : > { %v4977_v63 = vadd.f32 %v7197_v44, %v4858_v25 }
 0x4a0   : > { %v4966_v50 = vpop.f32.mrf.mxu0 }
 0x4a1   : > { %v4967_v55 = vadd.f32 %v4966_v50, %v4858_v25  ;;  %v5146_v10 = vadd.f32 %v7235_v3, %v4977_v63 }
 0x4a3   : > { %v5140_v54 = vadd.f32 %v5139_v29, %v4967_v55 }
 0x4b3   : > { %v7308_v11 = vpop.f32.mrf.mxu1 }
 0x4b5   : > { %v5359_v36 = vpop.f32.mrf.mxu1 }
 0x4b8   : > { %v7311_v13 = vpop.f32.mrf.mxu1 }
 0x4ba   : > { %v5375_v40 = vpop.f32.mrf.mxu1 }
 0x4bc   : > { %v7270_v14 = vpop.f32.mrf.mxu0 }
 0x4bd   : > { %v5257_v53 = vadd.f32 %v7270_v14, %v5134_v43 }
 0x4be   : > { %v5249_v56 = vpop.f32.mrf.mxu0 }
 0x4bf   : > { %v5250_v7 = vadd.f32 %v5249_v56, %v5128_v37  ;;  %v5368_v47 = vadd.f32 %v7308_v11, %v5257_v53 }
 0x4c1   : > { %v7273_v2 = vpop.f32.mrf.mxu0  ;;  %v5360_v31 = vadd.f32 %v5359_v36, %v5250_v7 }
 0x4c2   : > { %v5271_v61 = vadd.f32 %v7273_v2, %v5146_v10 }
 0x4c3   : > { %v5263_v18 = vpop.f32.mrf.mxu0 }
 0x4c4   : > { %v5264_v32 = vadd.f32 %v5263_v18, %v5140_v54  ;;  %v5384_v35 = vadd.f32 %v7311_v13, %v5271_v61 }
 0x4c6   : > { %v5376_v27 = vadd.f32 %v5375_v40, %v5264_v32 }
 0x4d7   : > { %v7384_v24 = vpop.f32.mrf.mxu1 }
 0x4d9   : > { %v5607_v58 = vpop.f32.mrf.mxu1 }
 0x4db   : > { %v7387_v41 = vpop.f32.mrf.mxu1 }
 0x4dd   : > { %v5619_v20 = vpop.f32.mrf.mxu1 }
 0x4de   : > { %v7346_v51 = vpop.f32.mrf.mxu0 }
 0x4df   : > { %v5509_v57 = vadd.f32 %v7346_v51, %v5368_v47 }
 0x4e0   : > { %v5502_v34 = vpop.f32.mrf.mxu0 }
 0x4e1   : > { %v5503_v19 = vadd.f32 %v5502_v34, %v5360_v31  ;;  %v5614_v59 = vadd.f32 %v7384_v24, %v5509_v57 }
 0x4e2   : > { %v7349_v8 = vpop.f32.mrf.mxu0 }
 0x4e3   : > { %v5608_v28 = vadd.f32 %v5607_v58, %v5503_v19  ;;  %v5521_v30 = vadd.f32 %v7349_v8, %v5384_v35  ;;  %v5633_v21 = vsel %vm5631_vm1, %v5614_v59, -1e+30 }
 0x4e4   : > { %v5514_v39 = vpop.f32.mrf.mxu0 }
 0x4e5   : > { %v5515_v22 = vadd.f32 %v5514_v39, %v5376_v27  ;;  %v5632_v60 = vsel %vm5631_vm1, %v5608_v28, -1e+30  ;;  %v5626_v17 = vadd.f32 %v7387_v41, %v5521_v30 }
 0x4e6   : > { %5636 = vmax.xlane.f32.xlu0 %v5632_v60 }
 0x4e7   : > { %v5620_v9 = vadd.f32 %v5619_v20, %v5515_v22  ;;  %v5635_v26 = vsel %vm5631_vm1, %v5626_v17, -1e+30 }
 0x4e9   : > { %v5634_v4 = vsel %vm5631_vm1, %v5620_v9, -1e+30 }
 0x4ea   : > { %5640 = vmax.xlane.f32.xlu1 %v5634_v4  ;;  %5638 = vmax.xlane.f32.xlu0 %v5633_v21 }
 0x4ee   : > { %5642 = vmax.xlane.f32.xlu1 %v5635_v26 }
 0x56f   : > { %v5637_v52 = vpop.xlane.xlu0 %5636 }
 0x570   : > { %v5644_v33 = vsub.f32 %v5632_v60, %v5637_v52 }
 0x572   : > { %v5648_v0 = vmul.f32 1.442695, %v5644_v33 }
 0x573   : > { %v5641_v48 = vpop.xlane.xlu1 %5640  ;;  %v5639_v16 = vpop.xlane.xlu0 %5638 }
 0x574   : > { %7464 = vpow2.f32 %v5648_v0  ;;  %v5646_v42 = vsub.f32 %v5634_v4, %v5641_v48  ;;  %v5645_v5 = vsub.f32 %v5633_v21, %v5639_v16 }
 0x576   : > { %v5652_v1 = vmul.f32 1.442695, %v5646_v42  ;;  %v5650_v12 = vmul.f32 1.442695, %v5645_v5 }
 0x577   : > { %v5643_v3 = vpop.xlane.xlu1 %5642 }
 0x578   : > { %7466 = vpow2.f32 %v5652_v1  ;;  %v5647_v62 = vsub.f32 %v5635_v26, %v5643_v3 }
 0x579   : > { %7468 = vpow2.f32 %v5650_v12 }
 0x57a   : > { %v5654_v29 = vmul.f32 1.442695, %v5647_v62 }
 0x57c   : > { %7470 = vpow2.f32 %v5654_v29 }
 0x581   : > { %v7465_v44 = vpop.eup %7464 }
 0x582   : > { %5656 = vadd.xlane.f32.xlu0 %v7465_v44 }
 0x585   : > { %v7467_v11 = vpop.eup %7466 }
 0x586   : > { %v7469_v15 = vpop.eup %7468  ;;  %5660 = vadd.xlane.f32.xlu0 %v7467_v11 }
 0x587   : > { %5658 = vadd.xlane.f32.xlu1 %v7469_v15 }
 0x589   : > { %v7471_v45 = vpop.eup %7470 }
 0x58b   : > { %5662 = vadd.xlane.f32.xlu1 %v7471_v45 }
 0x60b   : > { %v5657_v50 = vpop.xlane.xlu0 %5656 }
 0x60c   : > { %7472 = vlog2.f32 %v5657_v50 }
 0x60f   : > { %v5661_v36 = vpop.xlane.xlu0 %5660 }
 0x610   : > { %v5659_v14 = vpop.xlane.xlu1 %5658  ;;  %7474 = vlog2.f32 %v5661_v36 }
 0x611   : > { %7476 = vlog2.f32 %v5659_v14 }
 0x614   : > { %v5663_v6 = vpop.xlane.xlu1 %5662 }
 0x615   : > { %7478 = vlog2.f32 %v5663_v6 }
 0x619   : > { %v7473_v25 = vpop.eup %7472 }
 0x61a   : > { %v5665_v13 = vmul.f32 0.6931472, %v7473_v25 }
 0x61c   : > { %v5672_v56 = vsub.f32 %v5644_v33, %v5665_v13 }
 0x61d   : > { %v7475_v38 = vpop.eup %7474 }
 0x61e   : > { %v7477_v49 = vpop.eup %7476  ;;  %5676 = vst [vmem:[%s216_s20] sm:$0xff] %v5672_v56  ;;  %v5669_v40 = vmul.f32 0.6931472, %v7475_v38 }
 0x61f   : > { %v5667_v2 = vmul.f32 0.6931472, %v7477_v49 }
 0x620   : > { %v5674_v63 = vsub.f32 %v5646_v42, %v5669_v40 }
 0x621   : > { %v5673_v55 = vsub.f32 %v5645_v5, %v5667_v2 }
 0x622   : > { %v7479_v43 = vpop.eup %7478  ;;  %5678 = vst [vmem:[%s216_s20 + $0x10] sm:$0xff] %v5674_v63 }
 0x623   : > { %5677 = vst [vmem:[%s216_s20 + $0x8] sm:$0xff] %v5673_v55  ;;  %v5671_v37 = vmul.f32 0.6931472, %v7479_v43 }
 0x625   : > { %v5675_v24 = vsub.f32 %v5647_v62, %v5671_v37 }
 0x627   : > { %5679 = vst [vmem:[%s216_s20 + $0x18] sm:$0xff] %v5675_v24 }
 0x628   : > { %7574 = shalt.err (!%p7571_p9)
}
 0x629   : > { %s7575_s24 = scalar_lea.hbm %s10944_s8, 512  ;;  %s7579_s4 = scalar_lea.hbm %s10990_s3, 1024 }
 0x62a   : > { %p7576_p13 = scmp.ne.s32.totalorder %s10944_s8, %s7575_s24  ;;  %p7580_p4 = scmp.lt.s32.totalorder %s10944_s8, %s10990_s3 }
 0x62b   : > { %p7581_p8 = scmp.lt.s32.totalorder %s7579_s4, %s7575_s24 }
 0x62c   : > { %p7577_p5 = pnand %p7576_p13, %p12135_p10 }
 0x62d   : > { %p7582_p3 = por %p7581_p8, %p7580_p4 }
 0x62e   : > { %p7578_p0 = pneg %p7577_p5 }
 0x630   : > { %p7583_p11 = pnand %p7582_p3, %p7578_p0 }
 0x632   : > { %7586 = shalt.err (!%p7583_p11)
}
 0x633   : > { %s7639_s18 = smov 128   ;;  %s7640_s20 = smov 8  }
 0x634   : > { %7401 = dma.vmem_to_hbm [thread:$0]  (%p12135_p10), %s10939_s23, 512, %s10944_s8, %s5681_s9, %s7639_s18, %s7639_s18, %s7640_s20  }
 0x635 PF: > { %s5709_s26 = sand.u32 1, %s7617_s12   ;;  %p12136_p1 = scmp.ne.s32.totalorder %s11448_s19, 0 }
 0x636   : > { %p12137_p2 = scmp.ge.s32.totalorder %s7629_s15, 2  ;;  %s5710_s28 = scalar_lea.sflag [#allocation4], %s5709_s26 }
 0x638   : > { %p7415_p6 = pnand %p12137_p2, %p12136_p1 }
 0x63a   : > { %p7416_p12 = pneg %p7415_p6 }
 0x63c   : > { %7612 = dma.done.wait (%p7416_p12), %s5710_s28, 512  }
 0x63d   : > { %7614 = vsyncadd (%p7416_p12), %s5710_s28, 4294966784  ;;  %p17_p7 = scmp.ge.s32.totalorder %s7733_s7, 4   ;;  %s12138_s12 = smov %s7621_s13 }
 0x63e   : > { %s12139_s13 = smov %s7625_s14  ;;  %s12140_s14 = smov %s7749_s11 }
 0x63f   : > { %s12141_s15 = smov %s7733_s7  ;;  %19 = sbr.rel (!%p17_p7) target bundleno = 6 (0x6), region = 85 }
 0x644   :  { %5715 = vsyncpa [#allocation3], 1 }
 0x645   :  { %5717 = vsyncpa [#allocation3 + $0x1], 1 }
 0x646   :  { %5718 = vsyncpa [#allocation6], 1 }
 0x647   :  { %5719 = vsyncpa [#allocation4], 1 }
 0x648   :  { %5721 = vsyncpa [#allocation4 + $0x1], 1 }

</bundles_post_ra>
